<compile_context>
chip_gen: v7x
topology: tpu7x:2x2x1
jax: 0.10.0
libtpu: 0.0.40
codegen_flags: <defaults>
</compile_context>

<pallas_src>
import functools

import numpy as np
import jax
import jax.numpy as jnp
from jax import lax
from jax.experimental import pallas as pl
from jax.experimental.pallas import tpu as pltpu

NEG_SLOPE = 0.01   # nn.LeakyReLU() default
GN_EPS = 1e-5      # nn.GroupNorm default eps
NUM_GROUPS = 8


# --------------------------- host-side helpers -------------------------------
def _standardize_weight(w):
    """PyTorch Conv2d_WS weight standardization. w: (O, I, kh, kw)."""
    mean = jnp.mean(w, axis=(1, 2, 3), keepdims=True)
    wc = w - mean
    # torch.std(dim=1) is unbiased (ddof=1); +1e-5 added to the std itself.
    std = jnp.std(wc.reshape(w.shape[0], -1), axis=1, ddof=1).reshape(-1, 1, 1, 1) + 1e-5
    return wc / std


def _interp_matrix(out_sz, in_sz):
    """(out_sz, in_sz) bilinear (align_corners=True) interpolation matrix."""
    m = np.zeros((out_sz, in_sz), np.float32)
    if out_sz == 1:
        m[0, 0] = 1.0
        return m
    scale = (in_sz - 1) / (out_sz - 1)
    for o in range(out_sz):
        src = o * scale
        i0 = min(int(np.floor(src)), in_sz - 1)
        i1 = min(i0 + 1, in_sz - 1)
        a = float(src - i0)
        m[o, i0] += 1.0 - a
        m[o, i1] += a
    return m


# --------------------------------- kernel ------------------------------------
def _upsample_gn_kernel(x_ref, cc_ref, my_ref, mwk_ref, w1_ref, b1_ref, g1_ref,
                        be1_ref, w2_ref, b2_ref, g2_ref, be2_ref,
                        gidr_ref, gidc_ref,
                        o_ref,
                        fpad1, fpad2, p1, p2,
                        *, H, W, Cx, Cc, Cout, group_size):
    """One batch element: fused upsample+concat+pad, then two [conv3x3_WS + GN + LeakyReLU].

    x_ref   : (1, Hx, Wx*Cx)      low-res input, channels-minor flattened
    cc_ref  : (1, H, W, Cc)       skip connection, NHWC
    my_ref  : (H, Hx)             H-direction bilinear interpolation matrix
    mwk_ref : (Wx*Cx, W*Cx)       W-direction interpolation, Mw^T (x) I_Cx
    w1_ref  : (9*Cin, Cout)       stage-1 standardized weights, im2col layout
    w2_ref  : (Cout, 9*Cout)      stage-2 standardized weights (row = out channel)
    b*_ref  : bias minus its per-group mean; g*/be*: GroupNorm affine
    gid*    : group-id vector as (1,Cout) row / (Cout,1) column
    o_ref   : (1, Cout, H*W)      channels-major output (lane-dense store)
    """
    Cin = Cx + Cc
    HW = H * W
    inv_n = 1.0 / float(HW * group_size)

    # ---- fused bilinear upsample (align_corners=True) + concat + zero pad ----
    fpad1[...] = jnp.zeros_like(fpad1)
    fpad2[...] = jnp.zeros_like(fpad2)

    # H-direction upsample: one matmul on the channels-minor slab.
    up_h = jnp.dot(my_ref[...], x_ref[0],
                   preferred_element_type=jnp.float32)          # (H, Wx*Cx)
    # W-direction upsample: one matmul against the Kronecker-expanded matrix,
    # then a single interior store (this IS the upsample + pad).
    up_hw = jnp.dot(up_h, mwk_ref[...],
                    preferred_element_type=jnp.float32)         # (H, W*Cx)
    fpad1[1:H + 1, 1:W + 1, 0:Cx] = up_hw.reshape(H, W, Cx)
    # concat: skip connection occupies the remaining channels.
    fpad1[1:H + 1, 1:W + 1, Cx:Cin] = cc_ref[0]

    # same-group indicator matrix, built in-kernel (no (Cout,Cout) DMA).
    gmat = (gidc_ref[...] == gidr_ref[...]).astype(jnp.float32)      # (Cout, Cout)

    # ----------------- stage 1: Conv2d_WS(3x3) + GroupNorm + LeakyReLU --------
    # im2col: one fat-K matmul (K = 9*Cin) instead of 9 thin ones.
    for ky in range(3):
        for kx in range(3):
            t = ky * 3 + kx
            p1[:, t * Cin:(t + 1) * Cin] = (
                fpad1[ky:ky + H, kx:kx + W, :].reshape(HW, Cin))
    acc1 = jnp.dot(p1[...], w1_ref[...],
                   preferred_element_type=jnp.float32)                # (HW, Cout)

    # GroupNorm, two-pass variance, bias folded into the per-channel shift.
    cs = jnp.sum(acc1, axis=0, keepdims=True)                         # (1, Cout)
    gsum = jnp.dot(cs, gmat, preferred_element_type=jnp.float32)      # (1, Cout)
    shift = b1_ref[...] - gsum * inv_n                                # b - group_mean
    centered = acc1 + shift
    ss = jnp.sum(centered * centered, axis=0, keepdims=True)
    var = jnp.dot(ss, gmat, preferred_element_type=jnp.float32) * inv_n
    scale = lax.rsqrt(var + GN_EPS) * g1_ref[...]
    y1 = centered * scale + be1_ref[...]
    y1 = jnp.where(y1 > 0, y1, NEG_SLOPE * y1)

    # stage-1 activation never leaves VMEM: write into the padded stage-2 input.
    fpad2[1:H + 1, 1:W + 1, :] = y1.reshape(H, W, Cout)

    # ----------------- stage 2: Conv2d_WS(3x3) + GroupNorm + LeakyReLU --------
    for ky in range(3):
        for kx in range(3):
            t = ky * 3 + kx
            p2[:, t * Cout:(t + 1) * Cout] = (
                fpad2[ky:ky + H, kx:kx + W, :].reshape(HW, Cout))
    # channels-major result (Cout, H*W): lane-dense output, NCHW for free.
    acc2 = lax.dot_general(w2_ref[...], p2[...],
                           dimension_numbers=(((1,), (1,)), ((), ())),
                           preferred_element_type=jnp.float32)        # (Cout, HW)

    grouped = jnp.dot(gmat, acc2, preferred_element_type=jnp.float32)
    gsum2 = jnp.sum(grouped, axis=1, keepdims=True)                   # (Cout, 1)
    shift2 = b2_ref[...] - gsum2 * inv_n
    centered2 = acc2 + shift2
    sq2 = centered2 * centered2
    gss2 = jnp.sum(jnp.dot(gmat, sq2, preferred_element_type=jnp.float32),
                   axis=1, keepdims=True)
    var2 = gss2 * inv_n
    scale2 = lax.rsqrt(var2 + GN_EPS) * g2_ref[...]
    y2 = centered2 * scale2 + be2_ref[...]
    y2 = jnp.where(y2 > 0, y2, NEG_SLOPE * y2)

    o_ref[0] = y2.astype(o_ref.dtype)


# -------------------------------- wrapper ------------------------------------
def upsample_gn_forward(x, concat_with, params):
    """UpSampleGN.forward. x, concat_with, output are NCHW."""
    B, Cx, Hx, Wx = x.shape
    _, Cc, H, W = concat_with.shape
    Cin = Cx + Cc
    Cout = params["w1"].shape[0]
    gs = Cout // NUM_GROUPS
    HW = H * W

    # static interpolation matrices (shapes are static under jit)
    my = jnp.asarray(_interp_matrix(H, Hx))                           # (H, Hx)
    mw = _interp_matrix(W, Wx)                                        # (W, Wx)
    # channels-minor expansion: out[:, wo*Cx + c] = sum_wi Mw[wo, wi] * in[:, wi*Cx + c]
    mwk = jnp.asarray(np.kron(mw.T, np.eye(Cx, dtype=np.float32)))    # (Wx*Cx, W*Cx)

    # kernel-friendly layouts (x is the small pre-upsample tensor)
    x_flat = jnp.transpose(x, (0, 2, 3, 1)).reshape(B, Hx, Wx * Cx)
    cc_nhwc = jnp.transpose(concat_with, (0, 2, 3, 1))                # (B, H, W, Cc)

    # weight standardization + im2col-friendly layouts
    w1s = _standardize_weight(params["w1"])                           # (Cout, Cin, 3, 3)
    w1_2d = jnp.transpose(w1s, (2, 3, 1, 0)).reshape(9 * Cin, Cout)   # row = tap*Cin + ci
    w2s = _standardize_weight(params["w2"])                           # (Cout, Cout, 3, 3)
    w2_2d = jnp.transpose(w2s, (0, 2, 3, 1)).reshape(Cout, 9 * Cout)  # col = tap*C + ci

    def centered_bias(b):
        gm = jnp.mean(b.reshape(NUM_GROUPS, gs), axis=1)
        return b - jnp.repeat(gm, gs)

    b1c = centered_bias(params["b1"]).reshape(1, Cout)
    g1 = params["g1"].reshape(1, Cout)
    be1 = params["be1"].reshape(1, Cout)
    b2c = centered_bias(params["b2"]).reshape(Cout, 1)
    g2 = params["g2"].reshape(Cout, 1)
    be2 = params["be2"].reshape(Cout, 1)

    gid = jnp.arange(Cout, dtype=jnp.float32) // gs
    gid_row = gid.reshape(1, Cout)
    gid_col = gid.reshape(Cout, 1)

    kernel = functools.partial(
        _upsample_gn_kernel, H=H, W=W, Cx=Cx, Cc=Cc, Cout=Cout, group_size=gs)

    out_flat = pl.pallas_call(
        kernel,
        out_shape=jax.ShapeDtypeStruct((B, Cout, HW), jnp.float32),
        grid_spec=pltpu.PrefetchScalarGridSpec(
            num_scalar_prefetch=0,
            grid=(B,),
            in_specs=[
                pl.BlockSpec((1, Hx, Wx * Cx), lambda b: (b, 0, 0)),       # x
                pl.BlockSpec((1, H, W, Cc), lambda b: (b, 0, 0, 0)),       # concat_with
                pl.BlockSpec((H, Hx), lambda b: (0, 0)),                   # My
                pl.BlockSpec((Wx * Cx, W * Cx), lambda b: (0, 0)),         # Mw^T (x) I_Cx
                pl.BlockSpec((9 * Cin, Cout), lambda b: (0, 0)),           # w1
                pl.BlockSpec((1, Cout), lambda b: (0, 0)),                 # b1 - gmean
                pl.BlockSpec((1, Cout), lambda b: (0, 0)),                 # gamma1
                pl.BlockSpec((1, Cout), lambda b: (0, 0)),                 # beta1
                pl.BlockSpec((Cout, 9 * Cout), lambda b: (0, 0)),          # w2
                pl.BlockSpec((Cout, 1), lambda b: (0, 0)),                 # b2 - gmean
                pl.BlockSpec((Cout, 1), lambda b: (0, 0)),                 # gamma2
                pl.BlockSpec((Cout, 1), lambda b: (0, 0)),                 # beta2
                pl.BlockSpec((1, Cout), lambda b: (0, 0)),                 # group id row
                pl.BlockSpec((Cout, 1), lambda b: (0, 0)),                 # group id col
            ],
            out_specs=pl.BlockSpec((1, Cout, HW), lambda b: (b, 0, 0)),
            scratch_shapes=[
                pltpu.VMEM((H + 2, W + 2, Cin), jnp.float32),              # fpad1
                pltpu.VMEM((H + 2, W + 2, Cout), jnp.float32),             # fpad2
                pltpu.VMEM((HW, 9 * Cin), jnp.float32),                    # im2col 1
                pltpu.VMEM((HW, 9 * Cout), jnp.float32),                   # im2col 2
            ],
        ),
        compiler_params=pltpu.CompilerParams(
            dimension_semantics=("parallel",),
            vmem_limit_bytes=32 * 1024 * 1024,
        ),
    )(x_flat, cc_nhwc, my, mwk, w1_2d, b1c, g1, be1, w2_2d, b2c, g2, be2,
      gid_row, gid_col)

    return out_flat.reshape(B, Cout, H, W)


# ----------------------------- pure-JAX reference -----------------------------
def bilinear_upsample_align_corners(x_nchw, Hout, Wout):
    """F.interpolate(mode='bilinear', align_corners=True)."""
    B, C, Hin, Win = x_nchw.shape

    def coords(out_sz, in_sz):
        if out_sz == 1:
            return jnp.zeros((out_sz,), jnp.float32)
        return jnp.arange(out_sz, dtype=jnp.float32) * ((in_sz - 1) / (out_sz - 1))

    ys, xs = coords(Hout, Hin), coords(Wout, Win)
    y0 = jnp.floor(ys).astype(jnp.int32)
    x0 = jnp.floor(xs).astype(jnp.int32)
    y1 = jnp.minimum(y0 + 1, Hin - 1)
    x1 = jnp.minimum(x0 + 1, Win - 1)
    wy = (ys - y0.astype(jnp.float32))[None, None, :, None]
    wx = (xs - x0.astype(jnp.float32))[None, None, None, :]

    g = lambda yy, xx: x_nchw[:, :, yy, :][:, :, :, xx]
    top = g(y0, x0) * (1.0 - wx) + g(y0, x1) * wx
    bot = g(y1, x0) * (1.0 - wx) + g(y1, x1) * wx
    return top * (1.0 - wy) + bot * wy


def _reference(x, concat_with, params):
    H, W = concat_with.shape[2], concat_with.shape[3]
    up_x = bilinear_upsample_align_corners(x, H, W)
    f = jnp.concatenate([up_x, concat_with], axis=1)

    def block(h, w, b, g, be):
        w = _standardize_weight(w)
        y = lax.conv_general_dilated(
            h, w, (1, 1), ((1, 1), (1, 1)),
            dimension_numbers=("NCHW", "OIHW", "NCHW")) + b[None, :, None, None]
        B, C, Hh, Ww = y.shape
        yg = y.reshape(B, NUM_GROUPS, C // NUM_GROUPS, Hh, Ww)
        m = yg.mean(axis=(2, 3, 4), keepdims=True)
        v = ((yg - m) ** 2).mean(axis=(2, 3, 4), keepdims=True)
        yn = ((yg - m) / jnp.sqrt(v + GN_EPS)).reshape(B, C, Hh, Ww)
        yn = yn * g[None, :, None, None] + be[None, :, None, None]
        return jnp.where(yn > 0, yn, NEG_SLOPE * yn)

    h = block(f, params["w1"], params["b1"], params["g1"], params["be1"])
    h = block(h, params["w2"], params["b2"], params["g2"], params["be2"])
    return h


if __name__ == "__main__":
    key = jax.random.PRNGKey(0)
    ks = jax.random.split(key, 10)

    B = 2
    Cx, Cc = 4, 4                 # skip_input = Cx + Cc = 8
    Cout = 16                     # output_features (divisible by 8 for GroupNorm)
    Hx, Wx = 8, 8
    H, W = 16, 16

    x = jax.random.normal(ks[0], (B, Cx, Hx, Wx), jnp.float32)
    concat_with = jax.random.normal(ks[1], (B, Cc, H, W), jnp.float32)

    params = {
        "w1": 0.1 * jax.random.normal(ks[2], (Cout, Cx + Cc, 3, 3), jnp.float32),
        "b1": 0.1 * jax.random.normal(ks[3], (Cout,), jnp.float32),
        "g1": 1.0 + 0.1 * jax.random.normal(ks[4], (Cout,), jnp.float32),
        "be1": 0.1 * jax.random.normal(ks[5], (Cout,), jnp.float32),
        "w2": 0.1 * jax.random.normal(ks[6], (Cout, Cout, 3, 3), jnp.float32),
        "b2": 0.1 * jax.random.normal(ks[7], (Cout,), jnp.float32),
        "g2": 1.0 + 0.1 * jax.random.normal(ks[8], (Cout,), jnp.float32),
        "be2": 0.1 * jax.random.normal(ks[9], (Cout,), jnp.float32),
    }

    out = jax.jit(upsample_gn_forward)(x, concat_with, params)
    out = jax.block_until_ready(out)

    ref = _reference(x, concat_with, params)
    assert out.shape == (B, Cout, H, W), out.shape
    err = float(jnp.max(jnp.abs(out - ref)))
    assert jnp.allclose(out, ref, atol=2e-3, rtol=2e-3), err
    print("KERNEL_OK")
</pallas_src>

<mosaic_0001>
module attributes {stable_mosaic.version = 11 : i64} {
  func.func @_upsample_gn_kernel(%arg0: i32, %arg1: memref<1x8x32xf32, #tpu.memory_space<vmem>>, %arg2: memref<1x16x16x4xf32, #tpu.memory_space<vmem>>, %arg3: memref<16x8xf32, #tpu.memory_space<vmem>>, %arg4: memref<32x64xf32, #tpu.memory_space<vmem>>, %arg5: memref<72x16xf32, #tpu.memory_space<vmem>>, %arg6: memref<1x16xf32, #tpu.memory_space<vmem>>, %arg7: memref<1x16xf32, #tpu.memory_space<vmem>>, %arg8: memref<1x16xf32, #tpu.memory_space<vmem>>, %arg9: memref<16x144xf32, #tpu.memory_space<vmem>>, %arg10: memref<16x1xf32, #tpu.memory_space<vmem>>, %arg11: memref<16x1xf32, #tpu.memory_space<vmem>>, %arg12: memref<16x1xf32, #tpu.memory_space<vmem>>, %arg13: memref<1x16xf32, #tpu.memory_space<vmem>>, %arg14: memref<16x1xf32, #tpu.memory_space<vmem>>, %arg15: memref<1x16x256xf32, #tpu.memory_space<vmem>>, %arg16: memref<18x18x8xf32, #tpu.memory_space<vmem>>, %arg17: memref<18x18x16xf32, #tpu.memory_space<vmem>>, %arg18: memref<256x72xf32, #tpu.memory_space<vmem>>, %arg19: memref<256x144xf32, #tpu.memory_space<vmem>>) attributes {dimension_semantics = [#tpu.dimension_semantics<parallel>], iteration_bounds = array<i64: 2>, scalar_prefetch = 0 : i64, scratch_operands = 4 : i64, tpu.core_type = #tpu.core_type<tc>, window_params = [{transform_indices = @transform_0, window_bounds = array<i64: 1, 8, 32>}, {transform_indices = @transform_1, window_bounds = array<i64: 1, 16, 16, 4>}, {pipeline_mode = #tpu.pipeline_mode<synchronous>, transform_indices = @transform_2, window_bounds = array<i64: 16, 8>}, {pipeline_mode = #tpu.pipeline_mode<synchronous>, transform_indices = @transform_3, window_bounds = array<i64: 32, 64>}, {pipeline_mode = #tpu.pipeline_mode<synchronous>, transform_indices = @transform_4, window_bounds = array<i64: 72, 16>}, {pipeline_mode = #tpu.pipeline_mode<synchronous>, transform_indices = @transform_5, window_bounds = array<i64: 1, 16>}, {pipeline_mode = #tpu.pipeline_mode<synchronous>, transform_indices = @transform_6, window_bounds = array<i64: 1, 16>}, {pipeline_mode = #tpu.pipeline_mode<synchronous>, transform_indices = @transform_7, window_bounds = array<i64: 1, 16>}, {pipeline_mode = #tpu.pipeline_mode<synchronous>, transform_indices = @transform_8, window_bounds = array<i64: 16, 144>}, {pipeline_mode = #tpu.pipeline_mode<synchronous>, transform_indices = @transform_9, window_bounds = array<i64: 16, 1>}, {pipeline_mode = #tpu.pipeline_mode<synchronous>, transform_indices = @transform_10, window_bounds = array<i64: 16, 1>}, {pipeline_mode = #tpu.pipeline_mode<synchronous>, transform_indices = @transform_11, window_bounds = array<i64: 16, 1>}, {pipeline_mode = #tpu.pipeline_mode<synchronous>, transform_indices = @transform_12, window_bounds = array<i64: 1, 16>}, {pipeline_mode = #tpu.pipeline_mode<synchronous>, transform_indices = @transform_13, window_bounds = array<i64: 16, 1>}, {transform_indices = @transform_14, window_bounds = array<i64: 1, 16, 256>}]} {
    %cst = arith.constant 0.000000e+00 : f32
    %0 = vector.broadcast %cst : f32 to vector<18x18x8xf32>
    %c0 = arith.constant 0 : index
    %c0_0 = arith.constant 0 : index
    %c0_1 = arith.constant 0 : index
    %1 = vector.load %arg16[%c0, %c0_0, %c0_1] : memref<18x18x8xf32, #tpu.memory_space<vmem>>, vector<18x18x8xf32>
    tpu.vector_store %arg16[%c0, %c0_0, %c0_1], %0 {strides = array<i32>} : memref<18x18x8xf32, #tpu.memory_space<vmem>>, vector<18x18x8xf32>,
    %cst_2 = arith.constant 0.000000e+00 : f32
    %2 = vector.broadcast %cst_2 : f32 to vector<18x18x16xf32>
    %c0_3 = arith.constant 0 : index
    %c0_4 = arith.constant 0 : index
    %c0_5 = arith.constant 0 : index
    %3 = vector.load %arg17[%c0_3, %c0_4, %c0_5] : memref<18x18x16xf32, #tpu.memory_space<vmem>>, vector<18x18x16xf32>
    tpu.vector_store %arg17[%c0_3, %c0_4, %c0_5], %2 {strides = array<i32>} : memref<18x18x16xf32, #tpu.memory_space<vmem>>, vector<18x18x16xf32>,
    %c0_6 = arith.constant 0 : index
    %c0_7 = arith.constant 0 : index
    %4 = vector.load %arg3[%c0_6, %c0_7] : memref<16x8xf32, #tpu.memory_space<vmem>>, vector<16x8xf32>
    %c0_8 = arith.constant 0 : index
    %c0_9 = arith.constant 0 : index
    %c0_10 = arith.constant 0 : index
    %5 = vector.load %arg1[%c0_8, %c0_9, %c0_10] : memref<1x8x32xf32, #tpu.memory_space<vmem>>, vector<1x8x32xf32>
    %6 = vector.shape_cast %5 : vector<1x8x32xf32> to vector<8x32xf32>
    %cst_11 = arith.constant dense<0.000000e+00> : vector<16x32xf32>
    %7 = tpu.matmul %4, %6, %cst_11 {dimension_numbers = #tpu.dot_dimension_numbers<[1], [0], [0], [1], [0, 0, 1, 1], [], []>} : vector<16x8xf32>, vector<8x32xf32>, vector<16x32xf32> -> vector<16x32xf32>
    %c0_12 = arith.constant 0 : index
    %c0_13 = arith.constant 0 : index
    %8 = vector.load %arg4[%c0_12, %c0_13] : memref<32x64xf32, #tpu.memory_space<vmem>>, vector<32x64xf32>
    %cst_14 = arith.constant dense<0.000000e+00> : vector<16x64xf32>
    %9 = tpu.matmul %7, %8, %cst_14 {dimension_numbers = #tpu.dot_dimension_numbers<[1], [0], [0], [1], [0, 0, 1, 1], [], []>} : vector<16x32xf32>, vector<32x64xf32>, vector<16x64xf32> -> vector<16x64xf32>
    %10 = vector.shape_cast %9 : vector<16x64xf32> to vector<16x16x4xf32>
    %c1 = arith.constant 1 : index
    %c1_15 = arith.constant 1 : index
    %c0_16 = arith.constant 0 : index
    %11 = vector.load %arg16[%c1, %c1_15, %c0_16] : memref<18x18x8xf32, #tpu.memory_space<vmem>>, vector<16x16x4xf32>
    tpu.vector_store %arg16[%c1, %c1_15, %c0_16], %10 {strides = array<i32>} : memref<18x18x8xf32, #tpu.memory_space<vmem>>, vector<16x16x4xf32>,
    %c0_17 = arith.constant 0 : index
    %c0_18 = arith.constant 0 : index
    %c0_19 = arith.constant 0 : index
    %c0_20 = arith.constant 0 : index
    %12 = vector.load %arg2[%c0_17, %c0_18, %c0_19, %c0_20] : memref<1x16x16x4xf32, #tpu.memory_space<vmem>>, vector<1x16x16x4xf32>
    %13 = vector.shape_cast %12 : vector<1x16x16x4xf32> to vector<16x16x4xf32>
    %c1_21 = arith.constant 1 : index
    %c1_22 = arith.constant 1 : index
    %c4 = arith.constant 4 : index
    %14 = vector.load %arg16[%c1_21, %c1_22, %c4] : memref<18x18x8xf32, #tpu.memory_space<vmem>>, vector<16x16x4xf32>
    tpu.vector_store %arg16[%c1_21, %c1_22, %c4], %13 {strides = array<i32>} : memref<18x18x8xf32, #tpu.memory_space<vmem>>, vector<16x16x4xf32>,
    %c0_23 = arith.constant 0 : index
    %c0_24 = arith.constant 0 : index
    %15 = vector.load %arg14[%c0_23, %c0_24] : memref<16x1xf32, #tpu.memory_space<vmem>>, vector<16x1xf32>
    %c0_25 = arith.constant 0 : index
    %c0_26 = arith.constant 0 : index
    %16 = vector.load %arg13[%c0_25, %c0_26] : memref<1x16xf32, #tpu.memory_space<vmem>>, vector<1x16xf32>
    %17 = vector.broadcast %15 : vector<16x1xf32> to vector<16x16xf32>
    %18 = vector.broadcast %16 : vector<1x16xf32> to vector<16x16xf32>
    %19 = arith.cmpf oeq, %17, %18 : vector<16x16xf32>
    %20 = arith.extui %19 : vector<16x16xi1> to vector<16x16xi32>
    %21 = arith.sitofp %20 : vector<16x16xi32> to vector<16x16xf32>
    %c0_27 = arith.constant 0 : index
    %c0_28 = arith.constant 0 : index
    %c0_29 = arith.constant 0 : index
    %22 = vector.load %arg16[%c0_27, %c0_28, %c0_29] : memref<18x18x8xf32, #tpu.memory_space<vmem>>, vector<16x16x8xf32>
    %23 = vector.shape_cast %22 : vector<16x16x8xf32> to vector<256x8xf32>
    %c0_30 = arith.constant 0 : index
    %c0_31 = arith.constant 0 : index
    %24 = vector.load %arg18[%c0_30, %c0_31] : memref<256x72xf32, #tpu.memory_space<vmem>>, vector<256x8xf32>
    tpu.vector_store %arg18[%c0_30, %c0_31], %23 {strides = array<i32>} : memref<256x72xf32, #tpu.memory_space<vmem>>, vector<256x8xf32>,
    %c0_32 = arith.constant 0 : index
    %c1_33 = arith.constant 1 : index
    %c0_34 = arith.constant 0 : index
    %25 = vector.load %arg16[%c0_32, %c1_33, %c0_34] : memref<18x18x8xf32, #tpu.memory_space<vmem>>, vector<16x16x8xf32>
    %26 = vector.shape_cast %25 : vector<16x16x8xf32> to vector<256x8xf32>
    %c0_35 = arith.constant 0 : index
    %c8 = arith.constant 8 : index
    %27 = vector.load %arg18[%c0_35, %c8] : memref<256x72xf32, #tpu.memory_space<vmem>>, vector<256x8xf32>
    tpu.vector_store %arg18[%c0_35, %c8], %26 {strides = array<i32>} : memref<256x72xf32, #tpu.memory_space<vmem>>, vector<256x8xf32>,
    %c0_36 = arith.constant 0 : index
    %c2 = arith.constant 2 : index
    %c0_37 = arith.constant 0 : index
    %28 = vector.load %arg16[%c0_36, %c2, %c0_37] : memref<18x18x8xf32, #tpu.memory_space<vmem>>, vector<16x16x8xf32>
    %29 = vector.shape_cast %28 : vector<16x16x8xf32> to vector<256x8xf32>
    %c0_38 = arith.constant 0 : index
    %c16 = arith.constant 16 : index
    %30 = vector.load %arg18[%c0_38, %c16] : memref<256x72xf32, #tpu.memory_space<vmem>>, vector<256x8xf32>
    tpu.vector_store %arg18[%c0_38, %c16], %29 {strides = array<i32>} : memref<256x72xf32, #tpu.memory_space<vmem>>, vector<256x8xf32>,
    %c1_39 = arith.constant 1 : index
    %c0_40 = arith.constant 0 : index
    %c0_41 = arith.constant 0 : index
    %31 = vector.load %arg16[%c1_39, %c0_40, %c0_41] : memref<18x18x8xf32, #tpu.memory_space<vmem>>, vector<16x16x8xf32>
    %32 = vector.shape_cast %31 : vector<16x16x8xf32> to vector<256x8xf32>
    %c0_42 = arith.constant 0 : index
    %c24 = arith.constant 24 : index
    %33 = vector.load %arg18[%c0_42, %c24] : memref<256x72xf32, #tpu.memory_space<vmem>>, vector<256x8xf32>
    tpu.vector_store %arg18[%c0_42, %c24], %32 {strides = array<i32>} : memref<256x72xf32, #tpu.memory_space<vmem>>, vector<256x8xf32>,
    %c1_43 = arith.constant 1 : index
    %c1_44 = arith.constant 1 : index
    %c0_45 = arith.constant 0 : index
    %34 = vector.load %arg16[%c1_43, %c1_44, %c0_45] : memref<18x18x8xf32, #tpu.memory_space<vmem>>, vector<16x16x8xf32>
    %35 = vector.shape_cast %34 : vector<16x16x8xf32> to vector<256x8xf32>
    %c0_46 = arith.constant 0 : index
    %c32 = arith.constant 32 : index
    %36 = vector.load %arg18[%c0_46, %c32] : memref<256x72xf32, #tpu.memory_space<vmem>>, vector<256x8xf32>
    tpu.vector_store %arg18[%c0_46, %c32], %35 {strides = array<i32>} : memref<256x72xf32, #tpu.memory_space<vmem>>, vector<256x8xf32>,
    %c1_47 = arith.constant 1 : index
    %c2_48 = arith.constant 2 : index
    %c0_49 = arith.constant 0 : index
    %37 = vector.load %arg16[%c1_47, %c2_48, %c0_49] : memref<18x18x8xf32, #tpu.memory_space<vmem>>, vector<16x16x8xf32>
    %38 = vector.shape_cast %37 : vector<16x16x8xf32> to vector<256x8xf32>
    %c0_50 = arith.constant 0 : index
    %c40 = arith.constant 40 : index
    %39 = vector.load %arg18[%c0_50, %c40] : memref<256x72xf32, #tpu.memory_space<vmem>>, vector<256x8xf32>
    tpu.vector_store %arg18[%c0_50, %c40], %38 {strides = array<i32>} : memref<256x72xf32, #tpu.memory_space<vmem>>, vector<256x8xf32>,
    %c2_51 = arith.constant 2 : index
    %c0_52 = arith.constant 0 : index
    %c0_53 = arith.constant 0 : index
    %40 = vector.load %arg16[%c2_51, %c0_52, %c0_53] : memref<18x18x8xf32, #tpu.memory_space<vmem>>, vector<16x16x8xf32>
    %41 = vector.shape_cast %40 : vector<16x16x8xf32> to vector<256x8xf32>
    %c0_54 = arith.constant 0 : index
    %c48 = arith.constant 48 : index
    %42 = vector.load %arg18[%c0_54, %c48] : memref<256x72xf32, #tpu.memory_space<vmem>>, vector<256x8xf32>
    tpu.vector_store %arg18[%c0_54, %c48], %41 {strides = array<i32>} : memref<256x72xf32, #tpu.memory_space<vmem>>, vector<256x8xf32>,
    %c2_55 = arith.constant 2 : index
    %c1_56 = arith.constant 1 : index
    %c0_57 = arith.constant 0 : index
    %43 = vector.load %arg16[%c2_55, %c1_56, %c0_57] : memref<18x18x8xf32, #tpu.memory_space<vmem>>, vector<16x16x8xf32>
    %44 = vector.shape_cast %43 : vector<16x16x8xf32> to vector<256x8xf32>
    %c0_58 = arith.constant 0 : index
    %c56 = arith.constant 56 : index
    %45 = vector.load %arg18[%c0_58, %c56] : memref<256x72xf32, #tpu.memory_space<vmem>>, vector<256x8xf32>
    tpu.vector_store %arg18[%c0_58, %c56], %44 {strides = array<i32>} : memref<256x72xf32, #tpu.memory_space<vmem>>, vector<256x8xf32>,
    %c2_59 = arith.constant 2 : index
    %c2_60 = arith.constant 2 : index
    %c0_61 = arith.constant 0 : index
    %46 = vector.load %arg16[%c2_59, %c2_60, %c0_61] : memref<18x18x8xf32, #tpu.memory_space<vmem>>, vector<16x16x8xf32>
    %47 = vector.shape_cast %46 : vector<16x16x8xf32> to vector<256x8xf32>
    %c0_62 = arith.constant 0 : index
    %c64 = arith.constant 64 : index
    %48 = vector.load %arg18[%c0_62, %c64] : memref<256x72xf32, #tpu.memory_space<vmem>>, vector<256x8xf32>
    tpu.vector_store %arg18[%c0_62, %c64], %47 {strides = array<i32>} : memref<256x72xf32, #tpu.memory_space<vmem>>, vector<256x8xf32>,
    %c0_63 = arith.constant 0 : index
    %c0_64 = arith.constant 0 : index
    %49 = vector.load %arg18[%c0_63, %c0_64] : memref<256x72xf32, #tpu.memory_space<vmem>>, vector<256x72xf32>
    %c0_65 = arith.constant 0 : index
    %c0_66 = arith.constant 0 : index
    %50 = vector.load %arg5[%c0_65, %c0_66] : memref<72x16xf32, #tpu.memory_space<vmem>>, vector<72x16xf32>
    %cst_67 = arith.constant dense<0.000000e+00> : vector<256x16xf32>
    %51 = tpu.matmul %49, %50, %cst_67 {dimension_numbers = #tpu.dot_dimension_numbers<[1], [0], [0], [1], [0, 0, 1, 1], [], []>} : vector<256x72xf32>, vector<72x16xf32>, vector<256x16xf32> -> vector<256x16xf32>
    %cst_68 = arith.constant dense<0.000000e+00> : vector<16xf32>
    %52 = vector.multi_reduction <add>, %51, %cst_68 [0] : vector<256x16xf32> to vector<16xf32>
    %53 = vector.shape_cast %52 : vector<16xf32> to vector<1x16xf32>
    %cst_69 = arith.constant dense<0.000000e+00> : vector<1x16xf32>
    %54 = tpu.matmul %53, %21, %cst_69 {dimension_numbers = #tpu.dot_dimension_numbers<[1], [0], [0], [1], [0, 0, 1, 1], [], []>} : vector<1x16xf32>, vector<16x16xf32>, vector<1x16xf32> -> vector<1x16xf32>
    %c0_70 = arith.constant 0 : index
    %c0_71 = arith.constant 0 : index
    %55 = vector.load %arg6[%c0_70, %c0_71] : memref<1x16xf32, #tpu.memory_space<vmem>>, vector<1x16xf32>
    %cst_72 = arith.constant 0.001953125 : f32
    %56 = vector.broadcast %cst_72 : f32 to vector<1x16xf32>
    %57 = arith.mulf %54, %56 : vector<1x16xf32>
    %58 = arith.subf %55, %57 : vector<1x16xf32>
    %59 = vector.broadcast %58 : vector<1x16xf32> to vector<256x16xf32>
    %60 = arith.addf %51, %59 : vector<256x16xf32>
    %61 = arith.mulf %60, %60 : vector<256x16xf32>
    %cst_73 = arith.constant dense<0.000000e+00> : vector<16xf32>
    %62 = vector.multi_reduction <add>, %61, %cst_73 [0] : vector<256x16xf32> to vector<16xf32>
    %63 = vector.shape_cast %62 : vector<16xf32> to vector<1x16xf32>
    %cst_74 = arith.constant dense<0.000000e+00> : vector<1x16xf32>
    %64 = tpu.matmul %63, %21, %cst_74 {dimension_numbers = #tpu.dot_dimension_numbers<[1], [0], [0], [1], [0, 0, 1, 1], [], []>} : vector<1x16xf32>, vector<16x16xf32>, vector<1x16xf32> -> vector<1x16xf32>
    %cst_75 = arith.constant 0.001953125 : f32
    %65 = vector.broadcast %cst_75 : f32 to vector<1x16xf32>
    %66 = arith.mulf %64, %65 : vector<1x16xf32>
    %cst_76 = arith.constant 9.99999974E-6 : f32
    %67 = vector.broadcast %cst_76 : f32 to vector<1x16xf32>
    %68 = arith.addf %66, %67 : vector<1x16xf32>
    %69 = math.rsqrt %68 : vector<1x16xf32>
    %c0_77 = arith.constant 0 : index
    %c0_78 = arith.constant 0 : index
    %70 = vector.load %arg7[%c0_77, %c0_78] : memref<1x16xf32, #tpu.memory_space<vmem>>, vector<1x16xf32>
    %71 = arith.mulf %69, %70 : vector<1x16xf32>
    %72 = vector.broadcast %71 : vector<1x16xf32> to vector<256x16xf32>
    %73 = arith.mulf %60, %72 : vector<256x16xf32>
    %c0_79 = arith.constant 0 : index
    %c0_80 = arith.constant 0 : index
    %74 = vector.load %arg8[%c0_79, %c0_80] : memref<1x16xf32, #tpu.memory_space<vmem>>, vector<1x16xf32>
    %75 = vector.broadcast %74 : vector<1x16xf32> to vector<256x16xf32>
    %76 = arith.addf %73, %75 : vector<256x16xf32>
    %cst_81 = arith.constant 0.000000e+00 : f32
    %77 = vector.broadcast %cst_81 : f32 to vector<256x16xf32>
    %78 = arith.cmpf ogt, %76, %77 : vector<256x16xf32>
    %cst_82 = arith.constant 0.00999999977 : f32
    %79 = vector.broadcast %cst_82 : f32 to vector<256x16xf32>
    %80 = arith.mulf %79, %76 : vector<256x16xf32>
    %81 = arith.select %78, %76, %80 : vector<256x16xi1>, vector<256x16xf32>
    %82 = vector.shape_cast %81 : vector<256x16xf32> to vector<16x16x16xf32>
    %c1_83 = arith.constant 1 : index
    %c1_84 = arith.constant 1 : index
    %c0_85 = arith.constant 0 : index
    %83 = vector.load %arg17[%c1_83, %c1_84, %c0_85] : memref<18x18x16xf32, #tpu.memory_space<vmem>>, vector<16x16x16xf32>
    tpu.vector_store %arg17[%c1_83, %c1_84, %c0_85], %82 {strides = array<i32>} : memref<18x18x16xf32, #tpu.memory_space<vmem>>, vector<16x16x16xf32>,
    %c0_86 = arith.constant 0 : index
    %c0_87 = arith.constant 0 : index
    %c0_88 = arith.constant 0 : index
    %84 = vector.load %arg17[%c0_86, %c0_87, %c0_88] : memref<18x18x16xf32, #tpu.memory_space<vmem>>, vector<16x16x16xf32>
    %85 = vector.shape_cast %84 : vector<16x16x16xf32> to vector<256x16xf32>
    %c0_89 = arith.constant 0 : index
    %c0_90 = arith.constant 0 : index
    %86 = vector.load %arg19[%c0_89, %c0_90] : memref<256x144xf32, #tpu.memory_space<vmem>>, vector<256x16xf32>
    tpu.vector_store %arg19[%c0_89, %c0_90], %85 {strides = array<i32>} : memref<256x144xf32, #tpu.memory_space<vmem>>, vector<256x16xf32>,
    %c0_91 = arith.constant 0 : index
    %c1_92 = arith.constant 1 : index
    %c0_93 = arith.constant 0 : index
    %87 = vector.load %arg17[%c0_91, %c1_92, %c0_93] : memref<18x18x16xf32, #tpu.memory_space<vmem>>, vector<16x16x16xf32>
    %88 = vector.shape_cast %87 : vector<16x16x16xf32> to vector<256x16xf32>
    %c0_94 = arith.constant 0 : index
    %c16_95 = arith.constant 16 : index
    %89 = vector.load %arg19[%c0_94, %c16_95] : memref<256x144xf32, #tpu.memory_space<vmem>>, vector<256x16xf32>
    tpu.vector_store %arg19[%c0_94, %c16_95], %88 {strides = array<i32>} : memref<256x144xf32, #tpu.memory_space<vmem>>, vector<256x16xf32>,
    %c0_96 = arith.constant 0 : index
    %c2_97 = arith.constant 2 : index
    %c0_98 = arith.constant 0 : index
    %90 = vector.load %arg17[%c0_96, %c2_97, %c0_98] : memref<18x18x16xf32, #tpu.memory_space<vmem>>, vector<16x16x16xf32>
    %91 = vector.shape_cast %90 : vector<16x16x16xf32> to vector<256x16xf32>
    %c0_99 = arith.constant 0 : index
    %c32_100 = arith.constant 32 : index
    %92 = vector.load %arg19[%c0_99, %c32_100] : memref<256x144xf32, #tpu.memory_space<vmem>>, vector<256x16xf32>
    tpu.vector_store %arg19[%c0_99, %c32_100], %91 {strides = array<i32>} : memref<256x144xf32, #tpu.memory_space<vmem>>, vector<256x16xf32>,
    %c1_101 = arith.constant 1 : index
    %c0_102 = arith.constant 0 : index
    %c0_103 = arith.constant 0 : index
    %93 = vector.load %arg17[%c1_101, %c0_102, %c0_103] : memref<18x18x16xf32, #tpu.memory_space<vmem>>, vector<16x16x16xf32>
    %94 = vector.shape_cast %93 : vector<16x16x16xf32> to vector<256x16xf32>
    %c0_104 = arith.constant 0 : index
    %c48_105 = arith.constant 48 : index
    %95 = vector.load %arg19[%c0_104, %c48_105] : memref<256x144xf32, #tpu.memory_space<vmem>>, vector<256x16xf32>
    tpu.vector_store %arg19[%c0_104, %c48_105], %94 {strides = array<i32>} : memref<256x144xf32, #tpu.memory_space<vmem>>, vector<256x16xf32>,
    %c1_106 = arith.constant 1 : index
    %c1_107 = arith.constant 1 : index
    %c0_108 = arith.constant 0 : index
    %96 = vector.load %arg17[%c1_106, %c1_107, %c0_108] : memref<18x18x16xf32, #tpu.memory_space<vmem>>, vector<16x16x16xf32>
    %97 = vector.shape_cast %96 : vector<16x16x16xf32> to vector<256x16xf32>
    %c0_109 = arith.constant 0 : index
    %c64_110 = arith.constant 64 : index
    %98 = vector.load %arg19[%c0_109, %c64_110] : memref<256x144xf32, #tpu.memory_space<vmem>>, vector<256x16xf32>
    tpu.vector_store %arg19[%c0_109, %c64_110], %97 {strides = array<i32>} : memref<256x144xf32, #tpu.memory_space<vmem>>, vector<256x16xf32>,
    %c1_111 = arith.constant 1 : index
    %c2_112 = arith.constant 2 : index
    %c0_113 = arith.constant 0 : index
    %99 = vector.load %arg17[%c1_111, %c2_112, %c0_113] : memref<18x18x16xf32, #tpu.memory_space<vmem>>, vector<16x16x16xf32>
    %100 = vector.shape_cast %99 : vector<16x16x16xf32> to vector<256x16xf32>
    %c0_114 = arith.constant 0 : index
    %c80 = arith.constant 80 : index
    %101 = vector.load %arg19[%c0_114, %c80] : memref<256x144xf32, #tpu.memory_space<vmem>>, vector<256x16xf32>
    tpu.vector_store %arg19[%c0_114, %c80], %100 {strides = array<i32>} : memref<256x144xf32, #tpu.memory_space<vmem>>, vector<256x16xf32>,
    %c2_115 = arith.constant 2 : index
    %c0_116 = arith.constant 0 : index
    %c0_117 = arith.constant 0 : index
    %102 = vector.load %arg17[%c2_115, %c0_116, %c0_117] : memref<18x18x16xf32, #tpu.memory_space<vmem>>, vector<16x16x16xf32>
    %103 = vector.shape_cast %102 : vector<16x16x16xf32> to vector<256x16xf32>
    %c0_118 = arith.constant 0 : index
    %c96 = arith.constant 96 : index
    %104 = vector.load %arg19[%c0_118, %c96] : memref<256x144xf32, #tpu.memory_space<vmem>>, vector<256x16xf32>
    tpu.vector_store %arg19[%c0_118, %c96], %103 {strides = array<i32>} : memref<256x144xf32, #tpu.memory_space<vmem>>, vector<256x16xf32>,
    %c2_119 = arith.constant 2 : index
    %c1_120 = arith.constant 1 : index
    %c0_121 = arith.constant 0 : index
    %105 = vector.load %arg17[%c2_119, %c1_120, %c0_121] : memref<18x18x16xf32, #tpu.memory_space<vmem>>, vector<16x16x16xf32>
    %106 = vector.shape_cast %105 : vector<16x16x16xf32> to vector<256x16xf32>
    %c0_122 = arith.constant 0 : index
    %c112 = arith.constant 112 : index
    %107 = vector.load %arg19[%c0_122, %c112] : memref<256x144xf32, #tpu.memory_space<vmem>>, vector<256x16xf32>
    tpu.vector_store %arg19[%c0_122, %c112], %106 {strides = array<i32>} : memref<256x144xf32, #tpu.memory_space<vmem>>, vector<256x16xf32>,
    %c2_123 = arith.constant 2 : index
    %c2_124 = arith.constant 2 : index
    %c0_125 = arith.constant 0 : index
    %108 = vector.load %arg17[%c2_123, %c2_124, %c0_125] : memref<18x18x16xf32, #tpu.memory_space<vmem>>, vector<16x16x16xf32>
    %109 = vector.shape_cast %108 : vector<16x16x16xf32> to vector<256x16xf32>
    %c0_126 = arith.constant 0 : index
    %c128 = arith.constant 128 : index
    %110 = vector.load %arg19[%c0_126, %c128] : memref<256x144xf32, #tpu.memory_space<vmem>>, vector<256x16xf32>
    tpu.vector_store %arg19[%c0_126, %c128], %109 {strides = array<i32>} : memref<256x144xf32, #tpu.memory_space<vmem>>, vector<256x16xf32>,
    %c0_127 = arith.constant 0 : index
    %c0_128 = arith.constant 0 : index
    %111 = vector.load %arg9[%c0_127, %c0_128] : memref<16x144xf32, #tpu.memory_space<vmem>>, vector<16x144xf32>
    %c0_129 = arith.constant 0 : index
    %c0_130 = arith.constant 0 : index
    %112 = vector.load %arg19[%c0_129, %c0_130] : memref<256x144xf32, #tpu.memory_space<vmem>>, vector<256x144xf32>
    %cst_131 = arith.constant dense<0.000000e+00> : vector<16x256xf32>
    %113 = tpu.matmul %111, %112, %cst_131 {dimension_numbers = #tpu.dot_dimension_numbers<[1], [1], [0], [0], [0, 0, 1, 0], [], []>} : vector<16x144xf32>, vector<256x144xf32>, vector<16x256xf32> -> vector<16x256xf32>
    %cst_132 = arith.constant dense<0.000000e+00> : vector<16x256xf32>
    %114 = tpu.matmul %21, %113, %cst_132 {dimension_numbers = #tpu.dot_dimension_numbers<[1], [0], [0], [1], [0, 0, 1, 1], [], []>} : vector<16x16xf32>, vector<16x256xf32>, vector<16x256xf32> -> vector<16x256xf32>
    %cst_133 = arith.constant dense<0.000000e+00> : vector<16xf32>
    %115 = vector.multi_reduction <add>, %114, %cst_133 [1] : vector<16x256xf32> to vector<16xf32>
    %116 = vector.shape_cast %115 : vector<16xf32> to vector<16x1xf32>
    %c0_134 = arith.constant 0 : index
    %c0_135 = arith.constant 0 : index
    %117 = vector.load %arg10[%c0_134, %c0_135] : memref<16x1xf32, #tpu.memory_space<vmem>>, vector<16x1xf32>
    %cst_136 = arith.constant 0.001953125 : f32
    %118 = vector.broadcast %cst_136 : f32 to vector<16x1xf32>
    %119 = arith.mulf %116, %118 : vector<16x1xf32>
    %120 = arith.subf %117, %119 : vector<16x1xf32>
    %121 = vector.broadcast %120 : vector<16x1xf32> to vector<16x256xf32>
    %122 = arith.addf %113, %121 : vector<16x256xf32>
    %123 = arith.mulf %122, %122 : vector<16x256xf32>
    %cst_137 = arith.constant dense<0.000000e+00> : vector<16x256xf32>
    %124 = tpu.matmul %21, %123, %cst_137 {dimension_numbers = #tpu.dot_dimension_numbers<[1], [0], [0], [1], [0, 0, 1, 1], [], []>} : vector<16x16xf32>, vector<16x256xf32>, vector<16x256xf32> -> vector<16x256xf32>
    %cst_138 = arith.constant dense<0.000000e+00> : vector<16xf32>
    %125 = vector.multi_reduction <add>, %124, %cst_138 [1] : vector<16x256xf32> to vector<16xf32>
    %126 = vector.shape_cast %125 : vector<16xf32> to vector<16x1xf32>
    %cst_139 = arith.constant 0.001953125 : f32
    %127 = vector.broadcast %cst_139 : f32 to vector<16x1xf32>
    %128 = arith.mulf %126, %127 : vector<16x1xf32>
    %cst_140 = arith.constant 9.99999974E-6 : f32
    %129 = vector.broadcast %cst_140 : f32 to vector<16x1xf32>
    %130 = arith.addf %128, %129 : vector<16x1xf32>
    %131 = math.rsqrt %130 : vector<16x1xf32>
    %c0_141 = arith.constant 0 : index
    %c0_142 = arith.constant 0 : index
    %132 = vector.load %arg11[%c0_141, %c0_142] : memref<16x1xf32, #tpu.memory_space<vmem>>, vector<16x1xf32>
    %133 = arith.mulf %131, %132 : vector<16x1xf32>
    %134 = vector.broadcast %133 : vector<16x1xf32> to vector<16x256xf32>
    %135 = arith.mulf %122, %134 : vector<16x256xf32>
    %c0_143 = arith.constant 0 : index
    %c0_144 = arith.constant 0 : index
    %136 = vector.load %arg12[%c0_143, %c0_144] : memref<16x1xf32, #tpu.memory_space<vmem>>, vector<16x1xf32>
    %137 = vector.broadcast %136 : vector<16x1xf32> to vector<16x256xf32>
    %138 = arith.addf %135, %137 : vector<16x256xf32>
    %cst_145 = arith.constant 0.000000e+00 : f32
    %139 = vector.broadcast %cst_145 : f32 to vector<16x256xf32>
    %140 = arith.cmpf ogt, %138, %139 : vector<16x256xf32>
    %cst_146 = arith.constant 0.00999999977 : f32
    %141 = vector.broadcast %cst_146 : f32 to vector<16x256xf32>
    %142 = arith.mulf %141, %138 : vector<16x256xf32>
    %143 = arith.select %140, %138, %142 : vector<16x256xi1>, vector<16x256xf32>
    %c0_147 = arith.constant 0 : index
    %c0_148 = arith.constant 0 : index
    %c0_149 = arith.constant 0 : index
    %144 = vector.load %arg15[%c0_147, %c0_148, %c0_149] : memref<1x16x256xf32, #tpu.memory_space<vmem>>, vector<1x16x256xf32>
    %145 = vector.shape_cast %144 : vector<1x16x256xf32> to vector<16x256xf32>
    %146 = vector.shape_cast %143 : vector<16x256xf32> to vector<1x16x256xf32>
    tpu.vector_store %arg15[%c0_147, %c0_148, %c0_149], %146 {strides = array<i32>} : memref<1x16x256xf32, #tpu.memory_space<vmem>>, vector<1x16x256xf32>,
    return
  }
  func.func @transform_0(%arg0: i32) -> (i32, i32, i32) {
    %c0_i32 = arith.constant 0 : i32
    %c0_i32_0 = arith.constant 0 : i32
    %c0_i32_1 = arith.constant 0 : i32
    return %arg0, %c0_i32, %c0_i32_0 : i32, i32, i32
  }
  func.func @transform_1(%arg0: i32) -> (i32, i32, i32, i32) {
    %c0_i32 = arith.constant 0 : i32
    %c0_i32_0 = arith.constant 0 : i32
    %c0_i32_1 = arith.constant 0 : i32
    %c0_i32_2 = arith.constant 0 : i32
    return %arg0, %c0_i32, %c0_i32_0, %c0_i32_1 : i32, i32, i32, i32
  }
  func.func @transform_2(%arg0: i32) -> (i32, i32) {
    %c0_i32 = arith.constant 0 : i32
    %c0_i32_0 = arith.constant 0 : i32
    %c0_i32_1 = arith.constant 0 : i32
    return %c0_i32, %c0_i32_0 : i32, i32
  }
  func.func @transform_3(%arg0: i32) -> (i32, i32) {
    %c0_i32 = arith.constant 0 : i32
    %c0_i32_0 = arith.constant 0 : i32
    %c0_i32_1 = arith.constant 0 : i32
    return %c0_i32, %c0_i32_0 : i32, i32
  }
  func.func @transform_4(%arg0: i32) -> (i32, i32) {
    %c0_i32 = arith.constant 0 : i32
    %c0_i32_0 = arith.constant 0 : i32
    %c0_i32_1 = arith.constant 0 : i32
    return %c0_i32, %c0_i32_0 : i32, i32
  }
  func.func @transform_5(%arg0: i32) -> (i32, i32) {
    %c0_i32 = arith.constant 0 : i32
    %c0_i32_0 = arith.constant 0 : i32
    %c0_i32_1 = arith.constant 0 : i32
    return %c0_i32, %c0_i32_0 : i32, i32
  }
  func.func @transform_6(%arg0: i32) -> (i32, i32) {
    %c0_i32 = arith.constant 0 : i32
    %c0_i32_0 = arith.constant 0 : i32
    %c0_i32_1 = arith.constant 0 : i32
    return %c0_i32, %c0_i32_0 : i32, i32
  }
  func.func @transform_7(%arg0: i32) -> (i32, i32) {
    %c0_i32 = arith.constant 0 : i32
    %c0_i32_0 = arith.constant 0 : i32
    %c0_i32_1 = arith.constant 0 : i32
    return %c0_i32, %c0_i32_0 : i32, i32
  }
  func.func @transform_8(%arg0: i32) -> (i32, i32) {
    %c0_i32 = arith.constant 0 : i32
    %c0_i32_0 = arith.constant 0 : i32
    %c0_i32_1 = arith.constant 0 : i32
    return %c0_i32, %c0_i32_0 : i32, i32
  }
  func.func @transform_9(%arg0: i32) -> (i32, i32) {
    %c0_i32 = arith.constant 0 : i32
    %c0_i32_0 = arith.constant 0 : i32
    %c0_i32_1 = arith.constant 0 : i32
    return %c0_i32, %c0_i32_0 : i32, i32
  }
  func.func @transform_10(%arg0: i32) -> (i32, i32) {
    %c0_i32 = arith.constant 0 : i32
    %c0_i32_0 = arith.constant 0 : i32
    %c0_i32_1 = arith.constant 0 : i32
    return %c0_i32, %c0_i32_0 : i32, i32
  }
  func.func @transform_11(%arg0: i32) -> (i32, i32) {
    %c0_i32 = arith.constant 0 : i32
    %c0_i32_0 = arith.constant 0 : i32
    %c0_i32_1 = arith.constant 0 : i32
    return %c0_i32, %c0_i32_0 : i32, i32
  }
  func.func @transform_12(%arg0: i32) -> (i32, i32) {
    %c0_i32 = arith.constant 0 : i32
    %c0_i32_0 = arith.constant 0 : i32
    %c0_i32_1 = arith.constant 0 : i32
    return %c0_i32, %c0_i32_0 : i32, i32
  }
  func.func @transform_13(%arg0: i32) -> (i32, i32) {
    %c0_i32 = arith.constant 0 : i32
    %c0_i32_0 = arith.constant 0 : i32
    %c0_i32_1 = arith.constant 0 : i32
    return %c0_i32, %c0_i32_0 : i32, i32
  }
  func.func @transform_14(%arg0: i32) -> (i32, i32, i32) {
    %c0_i32 = arith.constant 0 : i32
    %c0_i32_0 = arith.constant 0 : i32
    %c0_i32_1 = arith.constant 0 : i32
    return %arg0, %c0_i32, %c0_i32_0 : i32, i32, i32
  }
}

</mosaic_0001>

<bundles_post_ra>
// kernel: upsample_gn_forward.1
= control target key start
LH: loop header
LB: loop body
LE: loop exit
PB: predicated region body
PF: predicated region fallthrough
CT: control target
= control target key end

     0   :  { %s6768_s29 = smov 0   ;;  %s9806_s0 = inlined_call_operand.vmem [shape: f32[2,8,32], index: 0, kind: input, shape index: {}]   ;;  %s9807_s1 = inlined_call_operand.vmem [shape: f32[2,16,16,4], index: 1, kind: input, shape index: {}]   ;;  %s9808_s2 = inlined_call_operand.vmem [shape: f32[16,8], index: 2, kind: input, shape index: {}]   ;;  %s9809_s3 = inlined_call_operand.vmem [shape: f32[32,64], index: 3, kind: input, shape index: {}]   ;;  %s9810_s4 = inlined_call_operand.vmem [shape: f32[72,16], index: 4, kind: input, shape index: {}]   ;;  %s9811_s5 = inlined_call_operand.vmem [shape: f32[1,16], index: 5, kind: input, shape index: {}]   ;;  %s9812_s6 = inlined_call_operand.vmem [shape: f32[1,16], index: 6, kind: input, shape index: {}]   ;;  %s9813_s7 = inlined_call_operand.vmem [shape: f32[1,16], index: 7, kind: input, shape index: {}]   ;;  %s9814_s8 = inlined_call_operand.vmem [shape: f32[16,144], index: 8, kind: input, shape index: {}]   ;;  %s9815_s9 = inlined_call_operand.vmem [shape: f32[16,1], index: 9, kind: input, shape index: {}]   ;;  %s9816_s10 = inlined_call_operand.vmem [shape: f32[16,1], index: 10, kind: input, shape index: {}]   ;;  %s9817_s11 = inlined_call_operand.vmem [shape: f32[16,1], index: 11, kind: input, shape index: {}]   ;;  %s9818_s12 = inlined_call_operand.vmem [shape: f32[1,16], index: 12, kind: input, shape index: {}]   ;;  %s9819_s13 = inlined_call_operand.vmem [shape: f32[16,1], index: 13, kind: input, shape index: {}]   ;;  %s9820_s14 = inlined_call_operand.vmem [shape: f32[2,16,256], index: 14, kind: output, shape index: {}]  }
   0x1   :  { %9834 = sst [smem:[#allocation6_spill]] %s9806_s0 }
   0x2 LB: > { %s6239_s30 = sadd.s32 4294967295, %s6660_s29   ;;  %p6243_p0 = scmp.ge.s32.totalorder %s6660_s29, 1  ;;  %s6660_s29 = sphi %s6768_s29, %s24_s29  }
   0x3   : > { %p421_p1 = scmp.lt.s32.totalorder %s6660_s29, 3 }
   0x5   : > { %p422_p2 = pnand %p6243_p0, %p421_p1 }
   0x6   : > { %p471_p3 = scmp.lt.s32.totalorder (!%p422_p2), %s6239_s30, 1  ;;  %vm485_vm0 = vcmask (!%p422_p2), 64512   ;;  %v597_v0 = vld [vmem:[%s9808_s2] sm:$0xff] (!%p422_p2)  ;;  %v682_v2 = vld [vmem:[%s9809_s3 + $0x8] sm:$0xff] (!%p422_p2)  ;;  %v683_v3 = vld [vmem:[%s9809_s3 + $0x10] sm:$0xff] (!%p422_p2)  ;;  %s9835_s0 = sld [smem:[#allocation6_spill]] (!%p422_p2) }
   0x7   : > { %425 = sbr.rel (%p422_p2) target bundleno = 3845 (0xf05), region = 76  ;;  %6395 = vmatprep.mubr.msk.f32.mxu0 (!%p422_p2), %vm485_vm0, %v597_v0  ;;  %v681_v1 = vld [vmem:[%s9809_s3] sm:$0xff] (!%p422_p2)  ;;  %v684_v4 = vld [vmem:[%s9809_s3 + $0x18] sm:$0xff] (!%p422_p2)  ;;  %v598_v7 = vld [vmem:[%s9808_s2 + $0x8] sm:$0xff] (!%p422_p2)  ;;  %v9832_v11 = vmov (!%p422_p2), 0.0   ;;  %vm488_vm1 = vcmask (!%p422_p2), 58368  }
   0x8   : > { %v6489_v5 = vpack.c.bf16 (!%p422_p2), %v682_v2, %v681_v1  ;;  %v6493_v8 = vpack.c.bf16 (!%p422_p2), %v684_v4, %v683_v3  ;;  %486 = vst.msk [vmem:[#allocation2] sm:$0xff] (!%p422_p2), %vm485_vm0, %v9832_v11  ;;  %487 = vst.msk [vmem:[#allocation2 + $0x8] sm:$0xff] (!%p422_p2), %vm485_vm0, %v9832_v11  ;;  %s9821_s22 = smov (!%p422_p2), 8   ;;  %s9823_s23 = smov (!%p422_p2), 16   ;;  %vm685_vm2 = vcmask (!%p422_p2), 261120   ;;  %vm1879_vm3 = vcmask (!%p422_p2), 130112  }
   0x9   : > { %490 = vst.msk [vmem:[#allocation2 + $0x18] sm:$0xff] (!%p422_p2), %vm485_vm0, %v9832_v11  ;;  %491 = vst.msk [vmem:[#allocation2 + $0x20] sm:$0xff] (!%p422_p2), %vm485_vm0, %v9832_v11  ;;  %vm2072_vm4 = vcmask (!%p422_p2), 195712   ;;  %s9825_s24 = smov (!%p422_p2), 120   ;;  %s6667_s25 = smov (!%p422_p2), 124   ;;  %vm1404_vm5 = vcmask (!%p422_p2), 31744  }
   0xa   : > { %493 = vst.msk [vmem:[#allocation2 + $0x30] sm:$0xff] (!%p422_p2), %vm485_vm0, %v9832_v11  ;;  %494 = vst.msk [vmem:[#allocation2 + $0x38] sm:$0xff] (!%p422_p2), %vm485_vm0, %v9832_v11  ;;  %s9828_s26 = smov (!%p422_p2), 112   ;;  %s6669_s27 = smov (!%p422_p2), 116   ;;  %vm1597_vm6 = vcmask (!%p422_p2), 64544   ;;  %vm2265_vm7 = vcmask (!%p422_p2), 261312  }
   0xb   : > { %496 = vst.msk [vmem:[#allocation2 + $0x48] sm:$0xff] (!%p422_p2), %vm485_vm0, %v9832_v11  ;;  %497 = vst.msk [vmem:[#allocation2 + $0x50] sm:$0xff] (!%p422_p2), %vm485_vm0, %v9832_v11  ;;  %s6671_s15 = smov (!%p422_p2), 108   ;;  %s6672_s16 = smov (!%p422_p2), 92   ;;  %vm2458_vm8 = vcmask (!%p422_p2), 326912   ;;  %vm2651_vm9 = vcmask (!%p422_p2), 392512  }
   0xc   : > { %499 = vst.msk [vmem:[#allocation2 + $0x60] sm:$0xff] (!%p422_p2), %vm485_vm0, %v9832_v11  ;;  %500 = vst.msk [vmem:[#allocation2 + $0x68] sm:$0xff] (!%p422_p2), %vm485_vm0, %v9832_v11  ;;  %s6674_s18 = smov (!%p422_p2), 84   ;;  %s9826_s19 = smov (!%p422_p2), 96   ;;  %vm2845_vm10 = vcmask (!%p422_p2), 458112   ;;  %vm3038_vm11 = vcmask (!%p422_p2), 523712  }
   0xd   : > { %502 = vst.msk [vmem:[#allocation2 + $0x78] sm:$0xff] (!%p422_p2), %vm485_vm0, %v9832_v11  ;;  %503 = vst.msk [vmem:[#allocation2 + $0x80] sm:$0xff] (!%p422_p2), %vm485_vm0, %v9832_v11  ;;  %vm3231_vm12 = vcmask (!%p422_p2), 589312   ;;  %vm3305_vm13 = vcmask (!%p422_p2), 588800   ;;  %vm541_vm14 = vcmask (!%p422_p2), 130048   ;;  %vm544_vm15 = vcmask (!%p422_p2), 123904  }
   0xe   : > { %s9864_s30 = smov (!%p471_p3, %s6239_s30), 1  ;;  %505 = vst.msk [vmem:[#allocation2 + $0x90] sm:$0xff] %vm485_vm0, %v9832_v11  ;;  %506 = vst.msk [vmem:[#allocation2 + $0x98] sm:$0xff] %vm485_vm0, %v9832_v11 }
   0xf   : > { %s6244_s21 = sshll.u32 %s9864_s30, 3  ;;  %s6335_s17 = sshll.u32 %s9864_s30, 8  ;;  %508 = vst.msk [vmem:[#allocation2 + $0xa8] sm:$0xff] %vm485_vm0, %v9832_v11  ;;  %509 = vst.msk [vmem:[#allocation2 + $0xb0] sm:$0xff] %vm485_vm0, %v9832_v11  ;;  %v1719_v41 = vld [vmem:[#allocation2 + $0x1] sm:$0xff] }
  0x10   : > { %s474_s28 = scalar_lea.vmem %s9835_s0, %s6244_s21  ;;  %s6806_s20 = scalar_lea.vmem %s9807_s1, %s6335_s17  ;;  %511 = vst.msk [vmem:[#allocation2 + $0xc0] sm:$0xff] %vm485_vm0, %v9832_v11  ;;  %512 = vst.msk [vmem:[#allocation2 + $0xc8] sm:$0xff] %vm485_vm0, %v9832_v11  ;;  %v1912_v43 = vld [vmem:[#allocation2 + $0x2] sm:$0xff] }
  0x11   : > { %v599_v6 = vld [vmem:[%s474_s28] sm:$0xff]  ;;  %v1438_v10 = vld [vmem:[%s6806_s20 + $0x8] sm:$0xff]  ;;  %s6662_s21 = smov 4   ;;  %514 = vst.msk [vmem:[#allocation2 + $0xd8] sm:$0xff] %vm485_vm0, %v9832_v11  ;;  %515 = vst.msk [vmem:[#allocation2 + $0xe0] sm:$0xff] %vm485_vm0, %v9832_v11  ;;  %s6670_s28 = smov 104  }
  0x12   : > { %6393 = vmatprep.subr.mxu0 %v599_v6  ;;  %v1437_v9 = vld [vmem:[%s6806_s20] sm:$0xff]  ;;  %1503 = vrot.lane.b32.xlu0 %v1438_v10, %s6662_s21  ;;  %517 = vst.msk [vmem:[#allocation2 + $0xf0] sm:$0xff] %vm485_vm0, %v9832_v11  ;;  %518 = vst.msk [vmem:[#allocation2 + $0xf8] sm:$0xff] %vm485_vm0, %v9832_v11  ;;  %v1439_v12 = vld [vmem:[%s6806_s20 + $0x10] sm:$0xff]  ;;  %s6673_s17 = smov 100   ;;  %s9837_s0 = smov 96  }
  0x13   : > { %6394 = vmatpush3.msra.mxu0 %v599_v6  ;;  %1501 = vrot.lane.b32.xlu1 %v1437_v9, %s6662_s21  ;;  %520 = vst.msk [vmem:[#allocation2 + $0x108] sm:$0xff] %vm485_vm0, %v9832_v11  ;;  %521 = vst.msk [vmem:[#allocation2 + $0x110] sm:$0xff] %vm485_vm0, %v9832_v11  ;;  %v1440_v13 = vld [vmem:[%s6806_s20 + $0x18] sm:$0xff]  ;;  %v1441_v14 = vld [vmem:[%s6806_s20 + $0x20] sm:$0xff] }
  0x14   : > { %6396 = vmatmul.mubr.msk.f32.vlgmr.msra.gmra.mrb[0].mxu0 %vm485_vm0, %v598_v7  ;;  %6490 = vmatprep.subr.bf16.mxu0 %v6489_v5  ;;  %523 = vst.msk [vmem:[#allocation2 + $0x120] sm:$0xff] %vm485_vm0, %v9832_v11  ;;  %524 = vst.msk [vmem:[#allocation2 + $0x128] sm:$0xff] %vm485_vm0, %v9832_v11  ;;  %v1442_v15 = vld [vmem:[%s6806_s20 + $0x28] sm:$0xff]  ;;  %v1443_v16 = vld [vmem:[%s6806_s20 + $0x30] sm:$0xff] }
  0x15   : > { %6492 = vmatpush3.bf16.msra.mxu0 %v6489_v5  ;;  %526 = vst.msk [vmem:[#allocation2 + $0x138] sm:$0xff] %vm485_vm0, %v9832_v11  ;;  %527 = vst.msk [vmem:[#allocation2 + $0x140] sm:$0xff] %vm485_vm0, %v9832_v11  ;;  %v1444_v17 = vld [vmem:[%s6806_s20 + $0x38] sm:$0xff]  ;;  %v1445_v18 = vld [vmem:[%s6806_s20 + $0x40] sm:$0xff] }
  0x16   : > { %6494 = vmatprep.subr.bf16.mxu0 %v6493_v8  ;;  %529 = vst.msk [vmem:[#allocation2 + $0x150] sm:$0xff] %vm485_vm0, %v9832_v11  ;;  %530 = vst.msk [vmem:[#allocation2 + $0x158] sm:$0xff] %vm485_vm0, %v9832_v11  ;;  %1507 = vrot.lane.b32.xlu0 %v1440_v13, %s6662_s21  ;;  %v1446_v19 = vld [vmem:[%s6806_s20 + $0x48] sm:$0xff]  ;;  %v1447_v20 = vld [vmem:[%s6806_s20 + $0x50] sm:$0xff] }
  0x17   : > { %532 = vst.msk [vmem:[#allocation2 + $0x168] sm:$0xff] %vm485_vm0, %v9832_v11  ;;  %533 = vst.msk [vmem:[#allocation2 + $0x170] sm:$0xff] %vm485_vm0, %v9832_v11  ;;  %1505 = vrot.lane.b32.xlu1 %v1439_v12, %s6662_s21  ;;  %v1449_v21 = vld [vmem:[%s6806_s20 + $0x60] sm:$0xff]  ;;  %v1448_v22 = vld [vmem:[%s6806_s20 + $0x58] sm:$0xff] }
  0x18   : > { %535 = vst.msk [vmem:[#allocation2 + $0x180] sm:$0xff] %vm485_vm0, %v9832_v11  ;;  %536 = vst.msk [vmem:[#allocation2 + $0x188] sm:$0xff] %vm485_vm0, %v9832_v11  ;;  %v1451_v23 = vld [vmem:[%s6806_s20 + $0x70] sm:$0xff]  ;;  %v1450_v24 = vld [vmem:[%s6806_s20 + $0x68] sm:$0xff] }
  0x19   : > { %6496 = vmatpush3.bf16.msra.mxu0 %v6493_v8  ;;  %538 = vst.msk [vmem:[#allocation2 + $0x198] sm:$0xff] %vm485_vm0, %v9832_v11  ;;  %539 = vst.msk [vmem:[#allocation2 + $0x1a0] sm:$0xff] %vm485_vm0, %v9832_v11  ;;  %v1453_v25 = vld [vmem:[%s6806_s20 + $0x80] sm:$0xff]  ;;  %v1452_v26 = vld [vmem:[%s6806_s20 + $0x78] sm:$0xff] }
  0x1a   : > { %489 = vst.msk [vmem:[#allocation2 + $0x10] sm:$0x3] %vm488_vm1, %v9832_v11  ;;  %492 = vst.msk [vmem:[#allocation2 + $0x28] sm:$0x3] %vm488_vm1, %v9832_v11  ;;  %1511 = vrot.lane.b32.xlu0 %v1442_v15, %s6662_s21  ;;  %v1455_v27 = vld [vmem:[%s6806_s20 + $0x90] sm:$0xff]  ;;  %v1454_v28 = vld [vmem:[%s6806_s20 + $0x88] sm:$0xff] }
  0x1b   : > { %495 = vst.msk [vmem:[#allocation2 + $0x40] sm:$0x3] %vm488_vm1, %v9832_v11  ;;  %498 = vst.msk [vmem:[#allocation2 + $0x58] sm:$0x3] %vm488_vm1, %v9832_v11  ;;  %1509 = vrot.lane.b32.xlu1 %v1441_v14, %s6662_s21  ;;  %v1457_v29 = vld [vmem:[%s6806_s20 + $0xa0] sm:$0xff]  ;;  %v1456_v30 = vld [vmem:[%s6806_s20 + $0x98] sm:$0xff] }
  0x1c   : > { %501 = vst.msk [vmem:[#allocation2 + $0x70] sm:$0x3] %vm488_vm1, %v9832_v11  ;;  %504 = vst.msk [vmem:[#allocation2 + $0x88] sm:$0x3] %vm488_vm1, %v9832_v11  ;;  %v1459_v31 = vld [vmem:[%s6806_s20 + $0xb0] sm:$0xff]  ;;  %v1458_v32 = vld [vmem:[%s6806_s20 + $0xa8] sm:$0xff] }
  0x1d   : > { %507 = vst.msk [vmem:[#allocation2 + $0xa0] sm:$0x3] %vm488_vm1, %v9832_v11  ;;  %510 = vst.msk [vmem:[#allocation2 + $0xb8] sm:$0x3] %vm488_vm1, %v9832_v11  ;;  %v1461_v33 = vld [vmem:[%s6806_s20 + $0xc0] sm:$0xff]  ;;  %v1460_v34 = vld [vmem:[%s6806_s20 + $0xb8] sm:$0xff] }
  0x1e   : > { %513 = vst.msk [vmem:[#allocation2 + $0xd0] sm:$0x3] %vm488_vm1, %v9832_v11  ;;  %516 = vst.msk [vmem:[#allocation2 + $0xe8] sm:$0x3] %vm488_vm1, %v9832_v11  ;;  %1515 = vrot.lane.b32.xlu0 %v1444_v17, %s6662_s21  ;;  %v1463_v35 = vld [vmem:[%s6806_s20 + $0xd0] sm:$0xff]  ;;  %v1462_v36 = vld [vmem:[%s6806_s20 + $0xc8] sm:$0xff] }
  0x1f   : > { %519 = vst.msk [vmem:[#allocation2 + $0x100] sm:$0x3] %vm488_vm1, %v9832_v11  ;;  %522 = vst.msk [vmem:[#allocation2 + $0x118] sm:$0x3] %vm488_vm1, %v9832_v11  ;;  %1513 = vrot.lane.b32.xlu1 %v1443_v16, %s6662_s21  ;;  %v1465_v37 = vld [vmem:[%s6806_s20 + $0xe0] sm:$0xff]  ;;  %v1464_v38 = vld [vmem:[%s6806_s20 + $0xd8] sm:$0xff] }
  0x20   : > { %525 = vst.msk [vmem:[#allocation2 + $0x130] sm:$0x3] %vm488_vm1, %v9832_v11  ;;  %528 = vst.msk [vmem:[#allocation2 + $0x148] sm:$0x3] %vm488_vm1, %v9832_v11  ;;  %v1467_v39 = vld [vmem:[%s6806_s20 + $0xf0] sm:$0xff]  ;;  %v1466_v40 = vld [vmem:[%s6806_s20 + $0xe8] sm:$0xff] }
  0x21   : > { %531 = vst.msk [vmem:[#allocation2 + $0x160] sm:$0x3] %vm488_vm1, %v9832_v11  ;;  %534 = vst.msk [vmem:[#allocation2 + $0x178] sm:$0x3] %vm488_vm1, %v9832_v11  ;;  %v1468_v42 = vld [vmem:[%s6806_s20 + $0xf8] sm:$0xff]  ;;  %v1720_v44 = vld [vmem:[#allocation2 + $0x9] sm:$0xff] }
  0x22   : > { %537 = vst.msk [vmem:[#allocation2 + $0x190] sm:$0x3] %vm488_vm1, %v9832_v11  ;;  %540 = vst.msk [vmem:[#allocation2 + $0x1a8] sm:$0x3] %vm488_vm1, %v9832_v11  ;;  %1519 = vrot.lane.b32.xlu0 %v1446_v19, %s6662_s21  ;;  %v1913_v45 = vld [vmem:[#allocation2 + $0xa] sm:$0xff]  ;;  %v1655_v60 = vld [vmem:[#allocation2] sm:$0xff] }
  0x23   : > { %1517 = vrot.lane.b32.xlu1 %v1445_v18, %s6662_s21  ;;  %v1656_v61 = vld [vmem:[#allocation2 + $0x8] sm:$0xff]  ;;  %1687 = vst.msk [vmem:[#allocation4] sm:$0xff] %vm485_vm0, %v1655_v60  ;;  %s6676_s20 = smov 76  }
  0x24   : > { %1688 = vst.msk [vmem:[#allocation4 + $0x8] sm:$0xff] %vm485_vm0, %v1656_v61 }
  0x25   : > { %547 = vst.msk [vmem:[#allocation3 + $0x20] sm:$0xff] %vm541_vm14, %v9832_v11  ;;  %542 = vst.msk [vmem:[#allocation3] sm:$0xff] %vm541_vm14, %v9832_v11 }
  0x26   : > { %1525 = vrot.lane.b32.xlu0 %v1449_v21, %s6662_s21  ;;  %548 = vst.msk [vmem:[#allocation3 + $0x28] sm:$0x3] %vm544_vm15, %v9832_v11  ;;  %545 = vst.msk [vmem:[#allocation3 + $0x10] sm:$0x3] %vm544_vm15, %v9832_v11 }
  0x27   : > { %1521 = vrot.lane.b32.xlu1 %v1447_v20, %s6662_s21  ;;  %543 = vst.msk [vmem:[#allocation3 + $0x8] sm:$0xff] %vm541_vm14, %v9832_v11  ;;  %546 = vst.msk [vmem:[#allocation3 + $0x18] sm:$0xff] %vm541_vm14, %v9832_v11 }
  0x28   : > { %549 = vst.msk [vmem:[#allocation3 + $0x30] sm:$0xff] %vm541_vm14, %v9832_v11  ;;  %550 = vst.msk [vmem:[#allocation3 + $0x38] sm:$0xff] %vm541_vm14, %v9832_v11 }
  0x29   : > { %551 = vst.msk [vmem:[#allocation3 + $0x40] sm:$0x3] %vm544_vm15, %v9832_v11  ;;  %554 = vst.msk [vmem:[#allocation3 + $0x58] sm:$0x3] %vm544_vm15, %v9832_v11 }
  0x2a   : > { %1529 = vrot.lane.b32.xlu0 %v1451_v23, %s6662_s21  ;;  %552 = vst.msk [vmem:[#allocation3 + $0x48] sm:$0xff] %vm541_vm14, %v9832_v11  ;;  %553 = vst.msk [vmem:[#allocation3 + $0x50] sm:$0xff] %vm541_vm14, %v9832_v11 }
  0x2b   : > { %1523 = vrot.lane.b32.xlu1 %v1448_v22, %s6662_s21  ;;  %555 = vst.msk [vmem:[#allocation3 + $0x60] sm:$0xff] %vm541_vm14, %v9832_v11  ;;  %556 = vst.msk [vmem:[#allocation3 + $0x68] sm:$0xff] %vm541_vm14, %v9832_v11 }
  0x2c   : > { %557 = vst.msk [vmem:[#allocation3 + $0x70] sm:$0x3] %vm544_vm15, %v9832_v11  ;;  %560 = vst.msk [vmem:[#allocation3 + $0x88] sm:$0x3] %vm544_vm15, %v9832_v11 }
  0x2d   : > { %558 = vst.msk [vmem:[#allocation3 + $0x78] sm:$0xff] %vm541_vm14, %v9832_v11  ;;  %559 = vst.msk [vmem:[#allocation3 + $0x80] sm:$0xff] %vm541_vm14, %v9832_v11 }
  0x2e   : > { %1533 = vrot.lane.b32.xlu0 %v1453_v25, %s6662_s21  ;;  %v6681_v25 = vmov 1983009808   ;;  %561 = vst.msk [vmem:[#allocation3 + $0x90] sm:$0xff] %vm541_vm14, %v9832_v11  ;;  %562 = vst.msk [vmem:[#allocation3 + $0x98] sm:$0xff] %vm541_vm14, %v9832_v11 }
  0x2f   : > { %1527 = vrot.lane.b32.xlu1 %v1450_v24, %s6662_s21  ;;  %563 = vst.msk [vmem:[#allocation3 + $0xa0] sm:$0x3] %vm544_vm15, %v9832_v11  ;;  %566 = vst.msk [vmem:[#allocation3 + $0xb8] sm:$0x3] %vm544_vm15, %v9832_v11 }
  0x30   : > { %564 = vst.msk [vmem:[#allocation3 + $0xa8] sm:$0xff] %vm541_vm14, %v9832_v11  ;;  %565 = vst.msk [vmem:[#allocation3 + $0xb0] sm:$0xff] %vm541_vm14, %v9832_v11 }
  0x31   : > { %567 = vst.msk [vmem:[#allocation3 + $0xc0] sm:$0xff] %vm541_vm14, %v9832_v11  ;;  %568 = vst.msk [vmem:[#allocation3 + $0xc8] sm:$0xff] %vm541_vm14, %v9832_v11 }
  0x32   : > { %1537 = vrot.lane.b32.xlu0 %v1455_v27, %s6662_s21  ;;  %v864_v27 = vlaneseq  ;;  %569 = vst.msk [vmem:[#allocation3 + $0xd0] sm:$0x3] %vm544_vm15, %v9832_v11  ;;  %572 = vst.msk [vmem:[#allocation3 + $0xe8] sm:$0x3] %vm544_vm15, %v9832_v11 }
  0x33   : > { %1531 = vrot.lane.b32.xlu1 %v1452_v26, %s6662_s21  ;;  %v862_v26 = vunpack.c.l.s4 %v6681_v25  ;;  %570 = vst.msk [vmem:[#allocation3 + $0xd8] sm:$0xff] %vm541_vm14, %v9832_v11  ;;  %571 = vst.msk [vmem:[#allocation3 + $0xe0] sm:$0xff] %vm541_vm14, %v9832_v11 }
  0x34   : > { %573 = vst.msk [vmem:[#allocation3 + $0xf0] sm:$0xff] %vm541_vm14, %v9832_v11  ;;  %574 = vst.msk [vmem:[#allocation3 + $0xf8] sm:$0xff] %vm541_vm14, %v9832_v11 }
  0x35   : > { %575 = vst.msk [vmem:[#allocation3 + $0x100] sm:$0x3] %vm544_vm15, %v9832_v11  ;;  %578 = vst.msk [vmem:[#allocation3 + $0x118] sm:$0x3] %vm544_vm15, %v9832_v11 }
  0x36   : > { %1541 = vrot.lane.b32.xlu0 %v1457_v29, %s6662_s21  ;;  %576 = vst.msk [vmem:[#allocation3 + $0x108] sm:$0xff] %vm541_vm14, %v9832_v11  ;;  %577 = vst.msk [vmem:[#allocation3 + $0x110] sm:$0xff] %vm541_vm14, %v9832_v11 }
  0x37   : > { %1535 = vrot.lane.b32.xlu1 %v1454_v28, %s6662_s21  ;;  %579 = vst.msk [vmem:[#allocation3 + $0x120] sm:$0xff] %vm541_vm14, %v9832_v11  ;;  %580 = vst.msk [vmem:[#allocation3 + $0x128] sm:$0xff] %vm541_vm14, %v9832_v11 }
  0x38   : > { %581 = vst.msk [vmem:[#allocation3 + $0x130] sm:$0x3] %vm544_vm15, %v9832_v11  ;;  %584 = vst.msk [vmem:[#allocation3 + $0x148] sm:$0x3] %vm544_vm15, %v9832_v11 }
  0x39   : > { %582 = vst.msk [vmem:[#allocation3 + $0x138] sm:$0xff] %vm541_vm14, %v9832_v11  ;;  %583 = vst.msk [vmem:[#allocation3 + $0x140] sm:$0xff] %vm541_vm14, %v9832_v11 }
  0x3a   : > { %1545 = vrot.lane.b32.xlu0 %v1459_v31, %s6662_s21  ;;  %v7098_v31 = vshrl.u32 %v864_v27, 7  ;;  %585 = vst.msk [vmem:[#allocation3 + $0x150] sm:$0xff] %vm541_vm14, %v9832_v11  ;;  %586 = vst.msk [vmem:[#allocation3 + $0x158] sm:$0xff] %vm541_vm14, %v9832_v11 }
  0x3b   : > { %1539 = vrot.lane.b32.xlu1 %v1456_v30, %s6662_s21  ;;  %v863_v30 = vunpack.c.0.s8 %v862_v26  ;;  %587 = vst.msk [vmem:[#allocation3 + $0x160] sm:$0x3] %vm544_vm15, %v9832_v11  ;;  %590 = vst.msk [vmem:[#allocation3 + $0x178] sm:$0x3] %vm544_vm15, %v9832_v11 }
  0x3c   : > { %588 = vst.msk [vmem:[#allocation3 + $0x168] sm:$0xff] %vm541_vm14, %v9832_v11  ;;  %589 = vst.msk [vmem:[#allocation3 + $0x170] sm:$0xff] %vm541_vm14, %v9832_v11 }
  0x3d   : > { %591 = vst.msk [vmem:[#allocation3 + $0x180] sm:$0xff] %vm541_vm14, %v9832_v11  ;;  %592 = vst.msk [vmem:[#allocation3 + $0x188] sm:$0xff] %vm541_vm14, %v9832_v11 }
  0x3e   : > { %1549 = vrot.lane.b32.xlu0 %v1461_v33, %s6662_s21  ;;  %593 = vst.msk [vmem:[#allocation3 + $0x190] sm:$0x3] %vm544_vm15, %v9832_v11  ;;  %596 = vst.msk [vmem:[#allocation3 + $0x1a8] sm:$0x3] %vm544_vm15, %v9832_v11 }
  0x3f   : > { %1543 = vrot.lane.b32.xlu1 %v1458_v32, %s6662_s21  ;;  %594 = vst.msk [vmem:[#allocation3 + $0x198] sm:$0xff] %vm541_vm14, %v9832_v11  ;;  %595 = vst.msk [vmem:[#allocation3 + $0x1a0] sm:$0xff] %vm541_vm14, %v9832_v11 }
  0x42   : > { %1553 = vrot.lane.b32.xlu0 %v1463_v35, %s6662_s21 }
  0x43   : > { %1547 = vrot.lane.b32.xlu1 %v1460_v34, %s6662_s21  ;;  %v6682_v34 = vmov 1934713408  }
  0x44   : > { %v926_v35 = vunpack.c.l.s4 %v6682_v34 }
  0x46   : > { %1557 = vrot.lane.b32.xlu0 %v1465_v37, %s6662_s21  ;;  %v7101_v37 = vsub.s32 %v863_v30, %v7098_v31 }
  0x47   : > { %1551 = vrot.lane.b32.xlu1 %v1462_v36, %s6662_s21 }
  0x4a   : > { %1561 = vrot.lane.b32.xlu0 %v1467_v39, %s6662_s21 }
  0x4b   : > { %1555 = vrot.lane.b32.xlu1 %v1464_v38, %s6662_s21 }
  0x4e   : > { %1783 = vrot.lane.b32.xlu0 %v1719_v41, %s9821_s22 }
  0x4f   : > { %1559 = vrot.lane.b32.xlu1 %v1466_v40, %s6662_s21 }
  0x52   : > { %1976 = vrot.lane.b32.xlu0 %v1912_v43, %s9823_s23  ;;  %v927_v43 = vunpack.c.0.s8 %v926_v35 }
  0x53   : > { %1563 = vrot.lane.b32.xlu1 %v1468_v42, %s6662_s21  ;;  %s6677_s21 = smov 88  }
  0x54   : > { %v7112_v25 = vsub.s32 %v927_v43, %v7098_v31 }
  0x57   : > { %1785 = vrot.lane.b32.xlu1 %v1720_v44, %s9821_s22  ;;  %s6678_s22 = smov 68  }
  0x5b   : > { %1978 = vrot.lane.b32.xlu1 %v1913_v45, %s9823_s23  ;;  %s6679_s23 = smov 80  }
  0x84   : > { %v6988_v50 = vpop.permute.xlu0 %1503 }
  0x85   : > { %v6984_v48 = vpop.permute.xlu1 %1501 }
  0x88   : > { %v6992_v52 = vpop.permute.xlu0 %1507 }
  0x89   : > { %v6986_v49 = vpop.permute.xlu1 %1505 }
  0x8c   : > { %v6996_v54 = vpop.permute.xlu0 %1511 }
  0x8d   : > { %v6990_v51 = vpop.permute.xlu1 %1509 }
  0x90   : > { %v7000_v56 = vpop.permute.xlu0 %1515 }
  0x91   : > { %v6994_v53 = vpop.permute.xlu1 %1513 }
  0x94   : > { %v7004_v58 = vpop.permute.xlu0 %1519 }
  0x95   : > { %v6998_v55 = vpop.permute.xlu1 %1517 }
  0x98   : > { %v7010_v62 = vpop.permute.xlu0 %1525 }
  0x99   : > { %v7002_v57 = vpop.permute.xlu1 %1521 }
  0x9c   : > { %v7014_v0 = vpop.permute.xlu0 %1529 }
  0x9d   : > { %v7006_v59 = vpop.permute.xlu1 %1523 }
  0xa0   : > { %v7018_v2 = vpop.permute.xlu0 %1533 }
  0xa1   : > { %v7012_v63 = vpop.permute.xlu1 %1527 }
  0xa4   : > { %v7022_v4 = vpop.permute.xlu0 %1537 }
  0xa5   : > { %v7016_v1 = vpop.permute.xlu1 %1531 }
  0xa8   : > { %v7026_v6 = vpop.permute.xlu0 %1541 }
  0xa9   : > { %v7020_v3 = vpop.permute.xlu1 %1535 }
  0xac   : > { %v7030_v8 = vpop.permute.xlu0 %1545 }
  0xad   : > { %v7024_v5 = vpop.permute.xlu1 %1539 }
  0xb0   : > { %v7034_v10 = vpop.permute.xlu0 %1549 }
  0xb1   : > { %v7028_v7 = vpop.permute.xlu1 %1543 }
  0xb4   : > { %v7038_v13 = vpop.permute.xlu0 %1553 }
  0xb5   : > { %v7032_v9 = vpop.permute.xlu1 %1547 }
  0xb8   : > { %v7042_v15 = vpop.permute.xlu0 %1557 }
  0xb9   : > { %v7036_v12 = vpop.permute.xlu1 %1551 }
  0xbc   : > { %v7046_v17 = vpop.permute.xlu0 %1561 }
  0xbd   : > { %v7040_v14 = vpop.permute.xlu1 %1555 }
  0xc0   : > { %v1784_v19 = vpop.permute.xlu0 %1783 }
  0xc1   : > { %v7044_v16 = vpop.permute.xlu1 %1559  ;;  %1880 = vst.msk [vmem:[#allocation4] sm:$0xff] %vm1879_vm3, %v1784_v19 }
  0xc4   : > { %v1977_v21 = vpop.permute.xlu0 %1976 }
  0xc5   : > { %v7048_v18 = vpop.permute.xlu1 %1563  ;;  %2073 = vst.msk [vmem:[#allocation4] sm:$0xff] %vm2072_vm4, %v1977_v21 }
  0xc9   : > { %v1786_v20 = vpop.permute.xlu1 %1785 }
  0xca   : > { %1881 = vst.msk [vmem:[#allocation4 + $0x8] sm:$0xff] %vm1879_vm3, %v1786_v20 }
  0xcd   : > { %v1979_v22 = vpop.permute.xlu1 %1978 }
  0xce   : > { %2074 = vst.msk [vmem:[#allocation4 + $0x8] sm:$0xff] %vm2072_vm4, %v1979_v22 }
  0xe7   : > { %v6397_v46 = vpop.f32.mrb[0].mxu0 }
  0xe8   : > { %v672_v47 = vpop.f32.mrb[1].mxu0 }
  0xe9   : > { %6406 = vmatprep.mubr.msk.f32.mxu0 %vm685_vm2, %v672_v47 }
  0xea   : > { %6407 = vmatmul.mubr.msk.f32.vlgmr.msra.gmra.mrb[2].mxu0 %vm685_vm2, %v6397_v46 }
 0x1bd   : > { %v7054_v23 = vpop.f32.mrb[2].mxu0 }
 0x1be   : > { %777 = vrot.lane.b32.xlu1 %v7054_v23, %s9825_s24  ;;  %771 = vrot.lane.b32.xlu0 %v7054_v23, %s6667_s25  ;;  %v7060_v24 = vpop.f32.mrb[3].mxu0  ;;  %s6680_s24 = smov 72  }
 0x1c2   : > { %789 = vrot.lane.b32.xlu1 %v7054_v23, %s9828_s26  ;;  %783 = vrot.lane.b32.xlu0 %v7054_v23, %s6669_s27 }
 0x1c6   : > { %801 = vrot.lane.b32.xlu1 %v7054_v23, %s6670_s28  ;;  %795 = vrot.lane.b32.xlu0 %v7054_v23, %s6671_s15 }
 0x1ca   : > { %819 = vrot.lane.b32.xlu1 %v7054_v23, %s6672_s16  ;;  %807 = vrot.lane.b32.xlu0 %v7054_v23, %s6673_s17 }
 0x1ce   : > { %831 = vrot.lane.b32.xlu1 %v7054_v23, %s6674_s18  ;;  %813 = vrot.lane.b32.xlu0 %v7054_v23, %s9826_s19  ;;  %s9836_s19 = smov 120  }
 0x1d2   : > { %843 = vrot.lane.b32.xlu1 %v7054_v23, %s6676_s20  ;;  %825 = vrot.lane.b32.xlu0 %v7054_v23, %s6677_s21 }
 0x1d6   : > { %855 = vrot.lane.b32.xlu1 %v7054_v23, %s6678_s22  ;;  %837 = vrot.lane.b32.xlu0 %v7054_v23, %s6679_s23 }
 0x1da   : > { %849 = vrot.lane.b32.xlu0 %v7054_v23, %s6680_s24  ;;  %781 = vrot.lane.b32.xlu1 %v7060_v24, %s6669_s27  ;;  %s6686_s27 = smov 32  }
 0x1de   : > { %787 = vrot.lane.b32.xlu1 %v7060_v24, %s9828_s26  ;;  %769 = vrot.lane.b32.xlu0 %v7060_v24, %s6667_s25  ;;  %s6685_s25 = smov 56  }
 0x1e2   : > { %799 = vrot.lane.b32.xlu1 %v7060_v24, %s6670_s28  ;;  %775 = vrot.lane.b32.xlu0 %v7060_v24, %s9836_s19  ;;  %s6687_s28 = smov 64  }
 0x1e6   : > { %811 = vrot.lane.b32.xlu1 %v7060_v24, %s9837_s0  ;;  %793 = vrot.lane.b32.xlu0 %v7060_v24, %s6671_s15  ;;  %s9838_s15 = smov 16  }
 0x1ea   : > { %823 = vrot.lane.b32.xlu1 %v7060_v24, %s6677_s21  ;;  %805 = vrot.lane.b32.xlu0 %v7060_v24, %s6673_s17  ;;  %s6688_s17 = smov 40  }
 0x1ee   : > { %835 = vrot.lane.b32.xlu1 %v7060_v24, %s6679_s23  ;;  %817 = vrot.lane.b32.xlu0 %v7060_v24, %s6672_s16  ;;  %s9839_s16 = smov 8  }
 0x1f2   : > { %847 = vrot.lane.b32.xlu1 %v7060_v24, %s6680_s24  ;;  %829 = vrot.lane.b32.xlu0 %v7060_v24, %s6674_s18  ;;  %s6684_s24 = smov 24  }
 0x1f6   : > { %841 = vrot.lane.b32.xlu0 %v7060_v24, %s6676_s20 }
 0x1fa   : > { %853 = vrot.lane.b32.xlu0 %v7060_v24, %s6678_s22  ;;  %s6683_s22 = smov 48  }
 0x230   : > { %v778_v28 = vpop.permute.xlu1 %777  ;;  %v772_v29 = vpop.permute.xlu0 %771 }
 0x231   : > { %v1131_v38 = vcombine.low %v7054_v23, %v778_v28  ;;  %v1132_v42 = vcombine.high %v7054_v23, %v778_v28 }
 0x233   : > { %v1139_v47 = vrot.slane %v1131_v38, %v7101_v37  ;;  %v1146_v22 = vrot.slane %v1132_v42, %v7101_v37 }
 0x234   : > { %v790_v32 = vpop.permute.xlu1 %789  ;;  %v784_v33 = vpop.permute.xlu0 %783 }
 0x235   : > { %v1147_v36 = vcombine.low %v772_v29, %v784_v33  ;;  %v1148_v39 = vcombine.high %v772_v29, %v784_v33 }
 0x237   : > { %v1155_v44 = vrot.slane %v1147_v36, %v7101_v37  ;;  %v1162_v60 = vrot.slane %v1148_v39, %v7101_v37 }
 0x238   : > { %v802_v40 = vpop.permute.xlu1 %801  ;;  %v796_v41 = vpop.permute.xlu0 %795 }
 0x239   : > { %v1163_v45 = vcombine.low %v790_v32, %v802_v40  ;;  %v1164_v46 = vcombine.high %v790_v32, %v802_v40  ;;  %v1195_v23 = vcombine.low %v1139_v47, %v1155_v44  ;;  %v1196_v26 = vcombine.high %v1139_v47, %v1155_v44 }
 0x23a   : > { %v1211_v32 = vcombine.low %v1146_v22, %v1162_v60  ;;  %v1212_v33 = vcombine.high %v1146_v22, %v1162_v60 }
 0x23b   : > { %v1171_v27 = vrot.slane %v1163_v45, %v7101_v37  ;;  %v1178_v28 = vrot.slane %v1164_v46, %v7101_v37  ;;  %v1210_v42 = vrot.slane %v1196_v26, %v7112_v25 }
 0x23c   : > { %v7108_v61 = vpop.permute.xlu1 %819  ;;  %v808_v19 = vpop.permute.xlu0 %807  ;;  %v1219_v47 = vrot.slane %v1211_v32, %v7112_v25  ;;  %v1226_v60 = vrot.slane %v1212_v33, %v7112_v25 }
 0x23d   : > { %v1179_v20 = vcombine.low %v796_v41, %v808_v19  ;;  %v1180_v21 = vcombine.high %v796_v41, %v808_v19  ;;  %v1203_v41 = vrot.slane %v1195_v23, %v7112_v25 }
 0x23f   : > { %v1187_v29 = vrot.slane %v1179_v20, %v7101_v37  ;;  %v1194_v30 = vrot.slane %v1180_v21, %v7101_v37 }
 0x240   : > { %v832_v34 = vpop.permute.xlu1 %831  ;;  %v814_v35 = vpop.permute.xlu0 %813 }
 0x241   : > { %v1227_v36 = vcombine.low %v1171_v27, %v1187_v29  ;;  %v1228_v38 = vcombine.high %v1171_v27, %v1187_v29  ;;  %v1243_v39 = vcombine.low %v1178_v28, %v1194_v30  ;;  %v1244_v40 = vcombine.high %v1178_v28, %v1194_v30 }
 0x243   : > { %v1235_v43 = vrot.slane %v1227_v36, %v7112_v25  ;;  %v1242_v44 = vrot.slane %v1228_v38, %v7112_v25  ;;  %v1251_v45 = vrot.slane %v1243_v39, %v7112_v25  ;;  %v1258_v46 = vrot.slane %v1244_v40, %v7112_v25 }
 0x244   : > { %v844_v19 = vpop.permute.xlu1 %843  ;;  %v826_v20 = vpop.permute.xlu0 %825 }
 0x245   : > { %v1259_v21 = vcombine.low %v1203_v41, %v1235_v43  ;;  %v1260_v22 = vcombine.high %v1203_v41, %v1235_v43  ;;  %v1261_v23 = vcombine.low %v1210_v42, %v1242_v44  ;;  %v1262_v26 = vcombine.high %v1210_v42, %v1242_v44 }
 0x246   : > { %v1263_v27 = vcombine.low %v1219_v47, %v1251_v45  ;;  %v1264_v28 = vcombine.high %v1219_v47, %v1251_v45  ;;  %v1265_v29 = vcombine.low %v1226_v60, %v1258_v46  ;;  %v1266_v30 = vcombine.high %v1226_v60, %v1258_v46 }
 0x247   : > { %1421 = vst.msk [vmem:[#allocation2 + $0xd9] sm:$0xff] %vm1404_vm5, %v1259_v21  ;;  %1423 = vst.msk [vmem:[#allocation2 + $0xf1] sm:$0xff] %vm1404_vm5, %v1260_v22  ;;  %v1267_v32 = vcombine.low %v814_v35, %v826_v20 }
 0x248   : > { %1425 = vst.msk [vmem:[#allocation2 + $0x109] sm:$0xff] %vm1404_vm5, %v1261_v23  ;;  %1427 = vst.msk [vmem:[#allocation2 + $0x121] sm:$0xff] %vm1404_vm5, %v1262_v26  ;;  %v856_v33 = vpop.permute.xlu1 %855  ;;  %v838_v36 = vpop.permute.xlu0 %837 }
 0x249   : > { %1429 = vst.msk [vmem:[#allocation2 + $0x139] sm:$0xff] %vm1404_vm5, %v1263_v27  ;;  %1431 = vst.msk [vmem:[#allocation2 + $0x151] sm:$0xff] %vm1404_vm5, %v1264_v28  ;;  %v1315_v38 = vcombine.low %v844_v19, %v856_v33  ;;  %v1316_v39 = vcombine.high %v844_v19, %v856_v33 }
 0x24a   : > { %1433 = vst.msk [vmem:[#allocation2 + $0x169] sm:$0xff] %vm1404_vm5, %v1265_v29  ;;  %1435 = vst.msk [vmem:[#allocation2 + $0x181] sm:$0xff] %vm1404_vm5, %v1266_v30 }
 0x24b   : > { %1614 = vst.msk [vmem:[#allocation2 + $0xd9] sm:$0xff] %vm1597_vm6, %v7018_v2  ;;  %1616 = vst.msk [vmem:[#allocation2 + $0xf1] sm:$0xff] %vm1597_vm6, %v7022_v4  ;;  %v1283_v2 = vcombine.low %v7108_v61, %v832_v34  ;;  %v1268_v4 = vcombine.high %v814_v35, %v826_v20 }
 0x24c   : > { %1618 = vst.msk [vmem:[#allocation2 + $0x109] sm:$0xff] %vm1597_vm6, %v7026_v6  ;;  %1620 = vst.msk [vmem:[#allocation2 + $0x121] sm:$0xff] %vm1597_vm6, %v7030_v8  ;;  %v1284_v6 = vcombine.high %v7108_v61, %v832_v34  ;;  %v1275_v8 = vrot.slane %v1267_v32, %v7101_v37  ;;  %v850_v40 = vpop.permute.xlu0 %849  ;;  %v1323_v61 = vrot.slane %v1315_v38, %v7101_v37 }
 0x24d   : > { %1622 = vst.msk [vmem:[#allocation2 + $0x139] sm:$0xff] %vm1597_vm6, %v7034_v10  ;;  %1624 = vst.msk [vmem:[#allocation2 + $0x151] sm:$0xff] %vm1597_vm6, %v7038_v13  ;;  %v7153_v10 = vpop.permute.xlu1 %781  ;;  %v1291_v13 = vrot.slane %v1283_v2, %v7101_v37  ;;  %v1282_v41 = vrot.slane %v1268_v4, %v7101_v37  ;;  %v1300_v42 = vcombine.high %v838_v36, %v850_v40 }
 0x24e   : > { %1626 = vst.msk [vmem:[#allocation2 + $0x169] sm:$0xff] %vm1597_vm6, %v7042_v15  ;;  %1628 = vst.msk [vmem:[#allocation2 + $0x181] sm:$0xff] %vm1597_vm6, %v7046_v17  ;;  %v1299_v15 = vcombine.low %v838_v36, %v850_v40  ;;  %v1298_v17 = vrot.slane %v1284_v6, %v7101_v37  ;;  %v1330_v34 = vrot.slane %v1316_v39, %v7101_v37 }
 0x24f   : > { %v1331_v43 = vcombine.low %v1275_v8, %v1291_v13  ;;  %v1332_v44 = vcombine.high %v1275_v8, %v1291_v13  ;;  %v1314_v47 = vrot.slane %v1300_v42, %v7101_v37 }
 0x250   : > { %v1307_v46 = vrot.slane %v1299_v15, %v7101_v37  ;;  %v7167_v19 = vpop.permute.xlu0 %769  ;;  %v1347_v21 = vcombine.low %v1282_v41, %v1298_v17  ;;  %v1348_v22 = vcombine.high %v1282_v41, %v1298_v17 }
 0x251   : > { %v7165_v60 = vpop.permute.xlu1 %787  ;;  %v1379_v29 = vcombine.low %v1314_v47, %v1330_v34  ;;  %v1380_v30 = vcombine.high %v1314_v47, %v1330_v34  ;;  %v1339_v33 = vrot.slane %v1331_v43, %v7112_v25  ;;  %v1346_v36 = vrot.slane %v1332_v44, %v7112_v25 }
 0x252   : > { %v2699_v35 = vld [vmem:[#allocation2 + $0xd8] sm:$0xff]  ;;  %v7158_v45 = vld [vmem:[#allocation2 + $0xf0] sm:$0xff]  ;;  %v1363_v27 = vcombine.low %v1307_v46, %v1323_v61  ;;  %v1364_v28 = vcombine.high %v1307_v46, %v1323_v61  ;;  %v1355_v13 = vrot.slane %v1347_v21, %v7112_v25  ;;  %v1362_v41 = vrot.slane %v1348_v22, %v7112_v25 }
 0x253   : > { %2777 = vrot.lane.b32.xlu1 %v2699_v35, %s6683_s22  ;;  %v7169_v20 = vld [vmem:[#allocation2 + $0x108] sm:$0xff]  ;;  %1705 = vst.msk [vmem:[#allocation4 + $0x90] sm:$0xff] %vm485_vm0, %v2699_v35  ;;  %1707 = vst.msk [vmem:[#allocation4 + $0xa0] sm:$0xff] %vm485_vm0, %v7158_v45  ;;  %v7174_v23 = vld [vmem:[#allocation2 + $0x120] sm:$0xff]  ;;  %v1387_v6 = vrot.slane %v1379_v29, %v7112_v25  ;;  %v1394_v8 = vrot.slane %v1380_v30, %v7112_v25  ;;  %v875_v21 = vcombine.low %v7167_v19, %v7153_v10 }
 0x254   : > { %v7176_v26 = vld [vmem:[#allocation2 + $0x138] sm:$0xff]  ;;  %1709 = vst.msk [vmem:[#allocation4 + $0xb0] sm:$0xff] %vm485_vm0, %v7169_v20  ;;  %v7180_v32 = vld [vmem:[#allocation2 + $0x150] sm:$0xff]  ;;  %1711 = vst.msk [vmem:[#allocation4 + $0xc0] sm:$0xff] %vm485_vm0, %v7174_v23  ;;  %v1371_v2 = vrot.slane %v1363_v27, %v7112_v25  ;;  %v1378_v4 = vrot.slane %v1364_v28, %v7112_v25  ;;  %v776_v39 = vpop.permute.xlu0 %775 }
 0x255   : > { %1713 = vst.msk [vmem:[#allocation4 + $0xd0] sm:$0xff] %vm485_vm0, %v7176_v26  ;;  %1715 = vst.msk [vmem:[#allocation4 + $0xe0] sm:$0xff] %vm485_vm0, %v7180_v32  ;;  %v800_v38 = vpop.permute.xlu1 %799  ;;  %v1685_v40 = vld [vmem:[#allocation2 + $0x168] sm:$0xff]  ;;  %v859_v15 = vcombine.low %v7060_v24, %v776_v39  ;;  %v1399_v61 = vcombine.low %v1355_v13, %v1387_v6  ;;  %v1400_v34 = vcombine.high %v1355_v13, %v1387_v6 }
 0x256   : > { %1717 = vst.msk [vmem:[#allocation4 + $0xf0] sm:$0xff] %vm485_vm0, %v1685_v40  ;;  %v1395_v42 = vcombine.low %v1339_v33, %v1371_v2  ;;  %v1396_v17 = vcombine.high %v1339_v33, %v1371_v2  ;;  %v1397_v43 = vcombine.low %v1346_v36, %v1378_v4  ;;  %v1398_v44 = vcombine.high %v1346_v36, %v1378_v4 }
 0x257   : > { %2201 = vrot.lane.b32.xlu1 %v2699_v35, %s6684_s24  ;;  %v1401_v46 = vcombine.low %v1362_v41, %v1394_v8  ;;  %v1402_v47 = vcombine.high %v1362_v41, %v1394_v8  ;;  %v7199_v35 = vld [vmem:[#allocation2 + $0xd9] sm:$0xff]  ;;  %v860_v22 = vcombine.high %v7060_v24, %v776_v39  ;;  %1430 = vst.msk [vmem:[#allocation2 + $0x141] sm:$0xff] %vm1404_vm5, %v1399_v61  ;;  %1432 = vst.msk [vmem:[#allocation2 + $0x159] sm:$0xff] %vm1404_vm5, %v1400_v34 }
 0x258   : > { %1422 = vst.msk [vmem:[#allocation2 + $0xe1] sm:$0xff] %vm1404_vm5, %v1395_v42  ;;  %1424 = vst.msk [vmem:[#allocation2 + $0xf9] sm:$0xff] %vm1404_vm5, %v1396_v17  ;;  %v794_v28 = vpop.permute.xlu0 %793 }
 0x259   : > { %1426 = vst.msk [vmem:[#allocation2 + $0x111] sm:$0xff] %vm1404_vm5, %v1397_v43  ;;  %1428 = vst.msk [vmem:[#allocation2 + $0x129] sm:$0xff] %vm1404_vm5, %v1398_v44  ;;  %v7210_v27 = vpop.permute.xlu1 %811  ;;  %v874_v24 = vrot.slane %v860_v22, %v7101_v37 }
 0x25a   : > { %1434 = vst.msk [vmem:[#allocation2 + $0x171] sm:$0xff] %vm1404_vm5, %v1401_v46  ;;  %1436 = vst.msk [vmem:[#allocation2 + $0x189] sm:$0xff] %vm1404_vm5, %v1402_v47 }
 0x25b   : > { %2970 = vrot.lane.b32.xlu1 %v7199_v35, %s6685_s25  ;;  %1615 = vst.msk [vmem:[#allocation2 + $0xe1] sm:$0xff] %vm1597_vm6, %v7020_v3  ;;  %1617 = vst.msk [vmem:[#allocation2 + $0xf9] sm:$0xff] %vm1597_vm6, %v7024_v5  ;;  %v876_v3 = vcombine.high %v7167_v19, %v7153_v10  ;;  %v867_v5 = vrot.slane %v859_v15, %v7101_v37 }
 0x25c   : > { %1619 = vst.msk [vmem:[#allocation2 + $0x111] sm:$0xff] %vm1597_vm6, %v7028_v7  ;;  %1621 = vst.msk [vmem:[#allocation2 + $0x129] sm:$0xff] %vm1597_vm6, %v7032_v9  ;;  %v891_v7 = vcombine.low %v7165_v60, %v800_v38  ;;  %v892_v9 = vcombine.high %v7165_v60, %v800_v38 }
 0x25d   : > { %1623 = vst.msk [vmem:[#allocation2 + $0x141] sm:$0xff] %vm1597_vm6, %v7036_v12  ;;  %1625 = vst.msk [vmem:[#allocation2 + $0x159] sm:$0xff] %vm1597_vm6, %v7040_v14  ;;  %v883_v12 = vrot.slane %v875_v21, %v7101_v37  ;;  %v806_v14 = vpop.permute.xlu0 %805  ;;  %v890_v10 = vrot.slane %v876_v3, %v7101_v37 }
 0x25e   : > { %1627 = vst.msk [vmem:[#allocation2 + $0x171] sm:$0xff] %vm1597_vm6, %v7044_v16  ;;  %1629 = vst.msk [vmem:[#allocation2 + $0x189] sm:$0xff] %vm1597_vm6, %v7048_v18  ;;  %v7241_v16 = vpop.permute.xlu1 %823  ;;  %v907_v18 = vcombine.low %v794_v28, %v806_v14  ;;  %v908_v29 = vcombine.high %v794_v28, %v806_v14  ;;  %v899_v33 = vrot.slane %v891_v7, %v7101_v37 }
 0x25f   : > { %2394 = vrot.lane.b32.xlu1 %v7199_v35, %s6686_s27  ;;  %v923_v19 = vcombine.low %v867_v5, %v883_v12  ;;  %v924_v30 = vcombine.high %v867_v5, %v883_v12  ;;  %v906_v60 = vrot.slane %v892_v9, %v7101_v37  ;;  %v939_v4 = vcombine.low %v874_v24, %v890_v10 }
 0x260   : > { %v915_v36 = vrot.slane %v907_v18, %v7101_v37  ;;  %v922_v2 = vrot.slane %v908_v29, %v7101_v37  ;;  %v940_v6 = vcombine.high %v874_v24, %v890_v10 }
 0x261   : > { %v7250_v39 = vpop.permute.xlu0 %817  ;;  %v931_v17 = vrot.slane %v923_v19, %v7112_v25  ;;  %v938_v43 = vrot.slane %v924_v30, %v7112_v25  ;;  %v947_v22 = vrot.slane %v939_v4, %v7112_v25  ;;  %v995_v4 = vcombine.low %v7210_v27, %v7241_v16 }
 0x262   : > { %v7248_v8 = vld [vmem:[#allocation2 + $0xda] sm:$0xff]  ;;  %v955_v40 = vcombine.low %v899_v33, %v915_v36  ;;  %v956_v13 = vcombine.high %v899_v33, %v915_v36  ;;  %v971_v41 = vcombine.low %v906_v60, %v922_v2  ;;  %v972_v15 = vcombine.high %v906_v60, %v922_v2  ;;  %v7266_v47 = vpop.permute.xlu1 %835  ;;  %v7306_v36 = vld [vmem:[#allocation2 + $0xe2] sm:$0xff] }
 0x263   : > { %v2700_v38 = vld [vmem:[#allocation2 + $0xe0] sm:$0xff]  ;;  %3163 = vrot.lane.b32.xlu1 %v7248_v8, %s6687_s28  ;;  %v7254_v42 = vld [vmem:[#allocation2 + $0xf8] sm:$0xff]  ;;  %v7268_v21 = vld [vmem:[#allocation2 + $0x110] sm:$0xff]  ;;  %v954_v28 = vrot.slane %v940_v6, %v7112_v25  ;;  %v1003_v6 = vrot.slane %v995_v4, %v7101_v37 }
 0x264   : > { %1706 = vst.msk [vmem:[#allocation4 + $0x98] sm:$0xff] %vm485_vm0, %v2700_v38  ;;  %2779 = vrot.lane.b32.xlu0 %v2700_v38, %s6683_s22  ;;  %1708 = vst.msk [vmem:[#allocation4 + $0xa8] sm:$0xff] %vm485_vm0, %v7254_v42  ;;  %v963_v44 = vrot.slane %v955_v40, %v7112_v25  ;;  %v970_v61 = vrot.slane %v956_v13, %v7112_v25  ;;  %v979_v34 = vrot.slane %v971_v41, %v7112_v25  ;;  %v7272_v3 = vld [vmem:[#allocation2 + $0xe1] sm:$0xff]  ;;  %v7292_v60 = vld [vmem:[#allocation2 + $0x158] sm:$0xff] }
 0x265   : > { %v986_v46 = vrot.slane %v972_v15, %v7112_v25  ;;  %v830_v5 = vpop.permute.xlu0 %829  ;;  %v7274_v7 = vld [vmem:[#allocation2 + $0x128] sm:$0xff]  ;;  %1710 = vst.msk [vmem:[#allocation4 + $0xb8] sm:$0xff] %vm485_vm0, %v7268_v21  ;;  %v7280_v18 = vld [vmem:[#allocation2 + $0x140] sm:$0xff]  ;;  %1716 = vst.msk [vmem:[#allocation4 + $0xe8] sm:$0xff] %vm485_vm0, %v7292_v60 }
 0x266   : > { %v987_v9 = vcombine.low %v931_v17, %v963_v44  ;;  %v988_v12 = vcombine.high %v931_v17, %v963_v44  ;;  %v989_v24 = vcombine.low %v938_v43, %v970_v61  ;;  %v990_v14 = vcombine.high %v938_v43, %v970_v61  ;;  %1712 = vst.msk [vmem:[#allocation4 + $0xc8] sm:$0xff] %vm485_vm0, %v7274_v7 }
 0x267   : > { %2396 = vrot.lane.b32.xlu1 %v7272_v3, %s6686_s27  ;;  %v991_v29 = vcombine.low %v947_v22, %v979_v34  ;;  %v992_v10 = vcombine.high %v947_v22, %v979_v34  ;;  %v993_v19 = vcombine.low %v954_v28, %v986_v46  ;;  %v994_v30 = vcombine.high %v954_v28, %v986_v46 }
 0x268   : > { %2203 = vrot.lane.b32.xlu0 %v2700_v38, %s6684_s24  ;;  %1714 = vst.msk [vmem:[#allocation4 + $0xd8] sm:$0xff] %vm485_vm0, %v7280_v18  ;;  %v1011_v33 = vcombine.low %v7250_v39, %v830_v5 }
 0x269   : > { %1405 = vst.msk [vmem:[#allocation2 + $0x19] sm:$0xff] %vm1404_vm5, %v987_v9  ;;  %1407 = vst.msk [vmem:[#allocation2 + $0x31] sm:$0xff] %vm1404_vm5, %v988_v12  ;;  %v842_v2 = vpop.permute.xlu0 %841 }
 0x26a   : > { %1409 = vst.msk [vmem:[#allocation2 + $0x49] sm:$0xff] %vm1404_vm5, %v989_v24  ;;  %1411 = vst.msk [vmem:[#allocation2 + $0x61] sm:$0xff] %vm1404_vm5, %v990_v14 }
 0x26b   : > { %1413 = vst.msk [vmem:[#allocation2 + $0x79] sm:$0xff] %vm1404_vm5, %v991_v29  ;;  %1415 = vst.msk [vmem:[#allocation2 + $0x91] sm:$0xff] %vm1404_vm5, %v992_v10  ;;  %3165 = vrot.lane.b32.xlu1 %v7306_v36, %s6687_s28 }
 0x26c   : > { %1417 = vst.msk [vmem:[#allocation2 + $0xa9] sm:$0xff] %vm1404_vm5, %v993_v19  ;;  %1419 = vst.msk [vmem:[#allocation2 + $0xc1] sm:$0xff] %vm1404_vm5, %v994_v30  ;;  %2972 = vrot.lane.b32.xlu0 %v7272_v3, %s6685_s25 }
 0x26d   : > { %1598 = vst.msk [vmem:[#allocation2 + $0x19] sm:$0xff] %vm1597_vm6, %v6984_v48  ;;  %1600 = vst.msk [vmem:[#allocation2 + $0x31] sm:$0xff] %vm1597_vm6, %v6986_v49  ;;  %v848_v48 = vpop.permute.xlu1 %847  ;;  %v1012_v49 = vcombine.high %v7250_v39, %v830_v5 }
 0x26e   : > { %1602 = vst.msk [vmem:[#allocation2 + $0x49] sm:$0xff] %vm1597_vm6, %v6990_v51  ;;  %1604 = vst.msk [vmem:[#allocation2 + $0x61] sm:$0xff] %vm1597_vm6, %v6994_v53  ;;  %v7323_v51 = vld [vmem:[#allocation2 + $0x170] sm:$0xff]  ;;  %v996_v53 = vcombine.high %v7210_v27, %v7241_v16 }
 0x26f   : > { %1606 = vst.msk [vmem:[#allocation2 + $0x79] sm:$0xff] %vm1597_vm6, %v6998_v55  ;;  %1608 = vst.msk [vmem:[#allocation2 + $0x91] sm:$0xff] %vm1597_vm6, %v7002_v57  ;;  %v1019_v55 = vrot.slane %v1011_v33, %v7101_v37  ;;  %v1027_v57 = vcombine.low %v7266_v47, %v848_v48  ;;  %v1026_v38 = vrot.slane %v1012_v49, %v7101_v37  ;;  %2012 = vrot.lane.b32.xlu1 %v7248_v8, %s9838_s15 }
 0x270   : > { %1610 = vst.msk [vmem:[#allocation2 + $0xa9] sm:$0xff] %vm1597_vm6, %v7010_v62  ;;  %1612 = vst.msk [vmem:[#allocation2 + $0xc1] sm:$0xff] %vm1597_vm6, %v7014_v0  ;;  %v1028_v62 = vcombine.high %v7266_v47, %v848_v48  ;;  %v854_v0 = vpop.permute.xlu0 %853  ;;  %1819 = vrot.lane.b32.xlu0 %v7199_v35, %s9839_s16  ;;  %v1010_v27 = vrot.slane %v996_v53, %v7101_v37 }
 0x271   : > { %1718 = vst.msk [vmem:[#allocation4 + $0xf8] sm:$0xff] %vm485_vm0, %v7323_v51  ;;  %v1043_v39 = vcombine.low %v842_v2, %v854_v0  ;;  %v1044_v40 = vcombine.high %v842_v2, %v854_v0  ;;  %v1059_v16 = vcombine.low %v1003_v6, %v1019_v55  ;;  %v1060_v13 = vcombine.high %v1003_v6, %v1019_v55 }
 0x272   : > { %v1035_v17 = vrot.slane %v1027_v57, %v7101_v37  ;;  %v1042_v43 = vrot.slane %v1028_v62, %v7101_v37  ;;  %v1075_v35 = vcombine.low %v1010_v27, %v1026_v38  ;;  %v1076_v46 = vcombine.high %v1010_v27, %v1026_v38  ;;  %v3089_v38 = vld [vmem:[#allocation2 + $0x10a] sm:$0xff] }
 0x273   : > { %v1051_v44 = vrot.slane %v1043_v39, %v7101_v37  ;;  %v1058_v61 = vrot.slane %v1044_v40, %v7101_v37  ;;  %2781 = vrot.lane.b32.xlu1 %v7158_v45, %s6683_s22  ;;  %v1067_v24 = vrot.slane %v1059_v16, %v7112_v25  ;;  %v1074_v14 = vrot.slane %v1060_v13, %v7112_v25  ;;  %v2319_v39 = vld [vmem:[#allocation2 + $0x111] sm:$0xff]  ;;  %v3091_v40 = vld [vmem:[#allocation2 + $0x122] sm:$0xff] }
 0x274   : > { %v7341_v41 = vld [vmem:[#allocation2 + $0x18] sm:$0xff]  ;;  %v7343_v15 = vld [vmem:[#allocation2 + $0x30] sm:$0xff]  ;;  %2587 = vrot.lane.b32.xlu0 %v7248_v8, %s6688_s17  ;;  %v1083_v2 = vrot.slane %v1075_v35, %v7112_v25  ;;  %v1090_v4 = vrot.slane %v1076_v46, %v7112_v25 }
 0x275   : > { %v7349_v34 = vld [vmem:[#allocation2 + $0x48] sm:$0xff]  ;;  %1689 = vst.msk [vmem:[#allocation4 + $0x10] sm:$0xff] %vm485_vm0, %v7341_v41  ;;  %1691 = vst.msk [vmem:[#allocation4 + $0x20] sm:$0xff] %vm485_vm0, %v7343_v15  ;;  %v7357_v47 = vld [vmem:[#allocation2 + $0x60] sm:$0xff]  ;;  %v1091_v37 = vcombine.low %v1035_v17, %v1051_v44  ;;  %v1092_v28 = vcombine.high %v1035_v17, %v1051_v44  ;;  %v1107_v5 = vcombine.low %v1042_v43, %v1058_v61 }
 0x276   : > { %v7359_v22 = vld [vmem:[#allocation2 + $0x78] sm:$0xff]  ;;  %1693 = vst.msk [vmem:[#allocation4 + $0x30] sm:$0xff] %vm485_vm0, %v7349_v34  ;;  %v1108_v9 = vcombine.high %v1042_v43, %v1058_v61  ;;  %v7365_v12 = vld [vmem:[#allocation2 + $0x90] sm:$0xff]  ;;  %1695 = vst.msk [vmem:[#allocation4 + $0x40] sm:$0xff] %vm485_vm0, %v7357_v47 }
 0x277   : > { %1697 = vst.msk [vmem:[#allocation4 + $0x50] sm:$0xff] %vm485_vm0, %v7359_v22  ;;  %v7373_v29 = vld [vmem:[#allocation2 + $0xa8] sm:$0xff]  ;;  %v7375_v10 = vld [vmem:[#allocation2 + $0xc0] sm:$0xff]  ;;  %1699 = vst.msk [vmem:[#allocation4 + $0x60] sm:$0xff] %vm485_vm0, %v7365_v12  ;;  %v1099_v8 = vrot.slane %v1091_v37, %v7112_v25  ;;  %v1106_v19 = vrot.slane %v1092_v28, %v7112_v25  ;;  %v1115_v30 = vrot.slane %v1107_v5, %v7112_v25  ;;  %2205 = vrot.lane.b32.xlu1 %v7158_v45, %s6684_s24 }
 0x278   : > { %v1122_v33 = vrot.slane %v1108_v9, %v7112_v25  ;;  %1701 = vst.msk [vmem:[#allocation4 + $0x70] sm:$0xff] %vm485_vm0, %v7373_v29  ;;  %1703 = vst.msk [vmem:[#allocation4 + $0x80] sm:$0xff] %vm485_vm0, %v7375_v10  ;;  %1821 = vrot.lane.b32.xlu0 %v7272_v3, %s9839_s16  ;;  %v2894_v25 = vld [vmem:[#allocation2 + $0xf1] sm:$0xff]  ;;  %v3088_v45 = vld [vmem:[#allocation2 + $0xfa] sm:$0xff] }
 0x279   : > { %v1123_v48 = vcombine.low %v1067_v24, %v1099_v8  ;;  %v1124_v49 = vcombine.high %v1067_v24, %v1099_v8  ;;  %v1125_v53 = vcombine.low %v1074_v14, %v1106_v19  ;;  %v1126_v55 = vcombine.high %v1074_v14, %v1106_v19  ;;  %v3092_v13 = vld [vmem:[#allocation2 + $0x12a] sm:$0xff]  ;;  %v2900_v46 = vld [vmem:[#allocation2 + $0x139] sm:$0xff]  ;;  %v2323_v8 = vld [vmem:[#allocation2 + $0x141] sm:$0xff] }
 0x27a   : > { %v1127_v57 = vcombine.low %v1083_v2, %v1115_v30  ;;  %v1128_v62 = vcombine.high %v1083_v2, %v1115_v30  ;;  %v1129_v0 = vcombine.low %v1090_v4, %v1122_v33  ;;  %v1130_v6 = vcombine.high %v1090_v4, %v1122_v33  ;;  %v3093_v9 = vld [vmem:[#allocation2 + $0x13a] sm:$0xff]  ;;  %v3094_v33 = vld [vmem:[#allocation2 + $0x142] sm:$0xff] }
 0x27b   : > { %1406 = vst.msk [vmem:[#allocation2 + $0x21] sm:$0xff] %vm1404_vm5, %v1123_v48  ;;  %1408 = vst.msk [vmem:[#allocation2 + $0x39] sm:$0xff] %vm1404_vm5, %v1124_v49  ;;  %2974 = vrot.lane.b32.xlu1 %v2894_v25, %s6685_s25 }
 0x27c   : > { %1410 = vst.msk [vmem:[#allocation2 + $0x51] sm:$0xff] %vm1404_vm5, %v1125_v53  ;;  %1412 = vst.msk [vmem:[#allocation2 + $0x69] sm:$0xff] %vm1404_vm5, %v1126_v55  ;;  %2589 = vrot.lane.b32.xlu0 %v7306_v36, %s6688_s17 }
 0x27d   : > { %1414 = vst.msk [vmem:[#allocation2 + $0x81] sm:$0xff] %vm1404_vm5, %v1127_v57  ;;  %1416 = vst.msk [vmem:[#allocation2 + $0x99] sm:$0xff] %vm1404_vm5, %v1128_v62  ;;  %v2902_v62 = vld [vmem:[#allocation2 + $0x151] sm:$0xff] }
 0x27e   : > { %1418 = vst.msk [vmem:[#allocation2 + $0xb1] sm:$0xff] %vm1404_vm5, %v1129_v0  ;;  %1420 = vst.msk [vmem:[#allocation2 + $0xc9] sm:$0xff] %vm1404_vm5, %v1130_v6 }
 0x27f   : > { %1599 = vst.msk [vmem:[#allocation2 + $0x21] sm:$0xff] %vm1597_vm6, %v6988_v50  ;;  %1601 = vst.msk [vmem:[#allocation2 + $0x39] sm:$0xff] %vm1597_vm6, %v6992_v52  ;;  %2398 = vrot.lane.b32.xlu1 %v2894_v25, %s6686_s27  ;;  %v3087_v50 = vld [vmem:[#allocation2 + $0xf2] sm:$0xff] }
 0x280   : > { %1603 = vst.msk [vmem:[#allocation2 + $0x51] sm:$0xff] %vm1597_vm6, %v6996_v54  ;;  %1605 = vst.msk [vmem:[#allocation2 + $0x69] sm:$0xff] %vm1597_vm6, %v7000_v56  ;;  %2014 = vrot.lane.b32.xlu0 %v7306_v36, %s9838_s15 }
 0x281   : > { %1607 = vst.msk [vmem:[#allocation2 + $0x81] sm:$0xff] %vm1597_vm6, %v7004_v58  ;;  %1609 = vst.msk [vmem:[#allocation2 + $0x99] sm:$0xff] %vm1597_vm6, %v7006_v59  ;;  %v2317_v58 = vld [vmem:[#allocation2 + $0xf9] sm:$0xff] }
 0x282   : > { %1611 = vst.msk [vmem:[#allocation2 + $0xb1] sm:$0xff] %vm1597_vm6, %v7012_v63  ;;  %1613 = vst.msk [vmem:[#allocation2 + $0xc9] sm:$0xff] %vm1597_vm6, %v7016_v1 }
 0x283   : > { %3167 = vrot.lane.b32.xlu1 %v3087_v50, %s6687_s28 }
 0x284   : > { %2783 = vrot.lane.b32.xlu0 %v7254_v42, %s6683_s22 }
 0x286   : > { %v7423_v52 = vld [vmem:[#allocation2 + $0x20] sm:$0xff]  ;;  %v7426_v54 = vld [vmem:[#allocation2 + $0x38] sm:$0xff] }
 0x287   : > { %1690 = vst.msk [vmem:[#allocation4 + $0x18] sm:$0xff] %vm485_vm0, %v7423_v52  ;;  %1692 = vst.msk [vmem:[#allocation4 + $0x28] sm:$0xff] %vm485_vm0, %v7426_v54  ;;  %v7434_v56 = vld [vmem:[#allocation2 + $0x50] sm:$0xff]  ;;  %v7436_v59 = vld [vmem:[#allocation2 + $0x68] sm:$0xff]  ;;  %2400 = vrot.lane.b32.xlu1 %v2317_v58, %s6686_s27 }
 0x288   : > { %1694 = vst.msk [vmem:[#allocation4 + $0x38] sm:$0xff] %vm485_vm0, %v7434_v56  ;;  %v7441_v63 = vld [vmem:[#allocation2 + $0x80] sm:$0xff]  ;;  %1696 = vst.msk [vmem:[#allocation4 + $0x48] sm:$0xff] %vm485_vm0, %v7436_v59  ;;  %2207 = vrot.lane.b32.xlu0 %v7254_v42, %s6684_s24  ;;  %v7449_v1 = vld [vmem:[#allocation2 + $0x98] sm:$0xff] }
 0x289   : > { %1698 = vst.msk [vmem:[#allocation4 + $0x58] sm:$0xff] %vm485_vm0, %v7441_v63  ;;  %v7451_v3 = vld [vmem:[#allocation2 + $0xb0] sm:$0xff]  ;;  %1700 = vst.msk [vmem:[#allocation4 + $0x68] sm:$0xff] %vm485_vm0, %v7449_v1  ;;  %v7456_v36 = vld [vmem:[#allocation2 + $0xc8] sm:$0xff] }
 0x28a   : > { %1702 = vst.msk [vmem:[#allocation4 + $0x78] sm:$0xff] %vm485_vm0, %v7451_v3  ;;  %1704 = vst.msk [vmem:[#allocation4 + $0x88] sm:$0xff] %vm485_vm0, %v7456_v36  ;;  %v2896_v42 = vld [vmem:[#allocation2 + $0x109] sm:$0xff] }
 0x28b   : > { %3169 = vrot.lane.b32.xlu1 %v3088_v45, %s6687_s28 }
 0x28c   : > { %2976 = vrot.lane.b32.xlu0 %v2317_v58, %s6685_s25 }
 0x28f   : > { %2016 = vrot.lane.b32.xlu1 %v3087_v50, %s9838_s15 }
 0x290   : > { %1823 = vrot.lane.b32.xlu0 %v2894_v25, %s9839_s16 }
 0x293   : > { %2785 = vrot.lane.b32.xlu1 %v7169_v20, %s6683_s22 }
 0x294   : > { %2591 = vrot.lane.b32.xlu0 %v3087_v50, %s6688_s17  ;;  %v3095_v50 = vld [vmem:[#allocation2 + $0x152] sm:$0xff] }
 0x297   : > { %2209 = vrot.lane.b32.xlu1 %v7169_v20, %s6684_s24  ;;  %v3090_v20 = vld [vmem:[#allocation2 + $0x112] sm:$0xff] }
 0x298   : > { %1825 = vrot.lane.b32.xlu0 %v2317_v58, %s9839_s16 }
 0x29b   : > { %2978 = vrot.lane.b32.xlu1 %v2896_v42, %s6685_s25 }
 0x29c   : > { %2593 = vrot.lane.b32.xlu0 %v3088_v45, %s6688_s17 }
 0x29f   : > { %2402 = vrot.lane.b32.xlu1 %v2896_v42, %s6686_s27 }
 0x2a0   : > { %2018 = vrot.lane.b32.xlu0 %v3088_v45, %s9838_s15 }
 0x2a3   : > { %3171 = vrot.lane.b32.xlu1 %v3089_v38, %s6687_s28 }
 0x2a4   : > { %2787 = vrot.lane.b32.xlu0 %v7268_v21, %s6683_s22 }
 0x2a7   : > { %2404 = vrot.lane.b32.xlu1 %v2319_v39, %s6686_s27 }
 0x2a8   : > { %2211 = vrot.lane.b32.xlu0 %v7268_v21, %s6684_s24  ;;  %v2898_v21 = vld [vmem:[#allocation2 + $0x121] sm:$0xff] }
 0x2ab   : > { %3173 = vrot.lane.b32.xlu1 %v3090_v20, %s6687_s28 }
 0x2ac   : > { %2980 = vrot.lane.b32.xlu0 %v2319_v39, %s6685_s25 }
 0x2af   : > { %2020 = vrot.lane.b32.xlu1 %v3089_v38, %s9838_s15 }
 0x2b0   : > { %1827 = vrot.lane.b32.xlu0 %v2896_v42, %s9839_s16  ;;  %v2325_v42 = vld [vmem:[#allocation2 + $0x159] sm:$0xff] }
 0x2b3   : > { %2789 = vrot.lane.b32.xlu1 %v7174_v23, %s6683_s22 }
 0x2b4   : > { %2595 = vrot.lane.b32.xlu0 %v3089_v38, %s6688_s17 }
 0x2b7   : > { %2213 = vrot.lane.b32.xlu1 %v7174_v23, %s6684_s24  ;;  %v2321_v23 = vld [vmem:[#allocation2 + $0x129] sm:$0xff] }
 0x2b8   : > { %1829 = vrot.lane.b32.xlu0 %v2319_v39, %s9839_s16 }
 0x2bb   : > { %2982 = vrot.lane.b32.xlu1 %v2898_v21, %s6685_s25 }
 0x2bc   : > { %2597 = vrot.lane.b32.xlu0 %v3090_v20, %s6688_s17 }
 0x2bf   : > { %2406 = vrot.lane.b32.xlu1 %v2898_v21, %s6686_s27 }
 0x2c0   : > { %2022 = vrot.lane.b32.xlu0 %v3090_v20, %s9838_s15  ;;  %v3096_v20 = vld [vmem:[#allocation2 + $0x15a] sm:$0xff] }
 0x2c3   : > { %3175 = vrot.lane.b32.xlu1 %v3091_v40, %s6687_s28 }
 0x2c4   : > { %2791 = vrot.lane.b32.xlu0 %v7274_v7, %s6683_s22 }
 0x2c5   : > { %v7498_v27 = vpop.permute.xlu1 %2777 }
 0x2c7   : > { %2408 = vrot.lane.b32.xlu1 %v2321_v23, %s6686_s27 }
 0x2c8   : > { %2215 = vrot.lane.b32.xlu0 %v7274_v7, %s6684_s24 }
 0x2c9   : > { %v7503_v16 = vpop.permute.xlu1 %2201 }
 0x2cb   : > { %3177 = vrot.lane.b32.xlu1 %v3092_v13, %s6687_s28 }
 0x2cc   : > { %2984 = vrot.lane.b32.xlu0 %v2321_v23, %s6685_s25 }
 0x2cd   : > { %v7507_v17 = vpop.permute.xlu1 %2970 }
 0x2cf   : > { %2024 = vrot.lane.b32.xlu1 %v3091_v40, %s9838_s15 }
 0x2d0   : > { %1831 = vrot.lane.b32.xlu0 %v2898_v21, %s9839_s16 }
 0x2d1   : > { %v7511_v43 = vpop.permute.xlu1 %2394 }
 0x2d3   : > { %2793 = vrot.lane.b32.xlu1 %v7176_v26, %s6683_s22 }
 0x2d4   : > { %2599 = vrot.lane.b32.xlu0 %v3091_v40, %s6688_s17 }
 0x2d5   : > { %v7516_v7 = vpop.permute.xlu1 %3163 }
 0x2d6   : > { %v7518_v44 = vpop.permute.xlu0 %2779 }
 0x2d7   : > { %2217 = vrot.lane.b32.xlu1 %v7176_v26, %s6684_s24 }
 0x2d8   : > { %1833 = vrot.lane.b32.xlu0 %v2321_v23, %s9839_s16 }
 0x2d9   : > { %v7523_v61 = vpop.permute.xlu1 %2396 }
 0x2da   : > { %v7525_v35 = vpop.permute.xlu0 %2203 }
 0x2db   : > { %2986 = vrot.lane.b32.xlu1 %v2900_v46, %s6685_s25 }
 0x2dc   : > { %2601 = vrot.lane.b32.xlu0 %v3092_v13, %s6688_s17 }
 0x2dd   : > { %v7529_v37 = vpop.permute.xlu1 %3165 }
 0x2de   : > { %v7531_v28 = vpop.permute.xlu0 %2972 }
 0x2df   : > { %2410 = vrot.lane.b32.xlu1 %v2900_v46, %s6686_s27 }
 0x2e0   : > { %2026 = vrot.lane.b32.xlu0 %v3092_v13, %s9838_s15  ;;  %v2711_v13 = vld [vmem:[#allocation2 + $0x168] sm:$0xff] }
 0x2e1   : > { %v2013_v26 = vpop.permute.xlu1 %2012 }
 0x2e2   : > { %v1820_v5 = vpop.permute.xlu0 %1819 }
 0x2e3   : > { %1898 = vst.msk [vmem:[#allocation4 + $0x90] sm:$0xff] %vm1879_vm3, %v1820_v5  ;;  %3179 = vrot.lane.b32.xlu1 %v3093_v9, %s6687_s28 }
 0x2e4   : > { %2091 = vst.msk [vmem:[#allocation4 + $0x90] sm:$0xff] %vm2072_vm4, %v2013_v26  ;;  %2795 = vrot.lane.b32.xlu0 %v7280_v18, %s6683_s22 }
 0x2e5   : > { %v7540_v24 = vpop.permute.xlu1 %2781 }
 0x2e6   : > { %v7542_v14 = vpop.permute.xlu0 %2587 }
 0x2e7   : > { %2412 = vrot.lane.b32.xlu1 %v2323_v8, %s6686_s27 }
 0x2e8   : > { %2219 = vrot.lane.b32.xlu0 %v7280_v18, %s6684_s24 }
 0x2e9   : > { %v2206_v19 = vpop.permute.xlu1 %2205 }
 0x2ea   : > { %2284 = vst.msk [vmem:[#allocation4 + $0x90] sm:$0xff] %vm2265_vm7, %v2206_v19  ;;  %v1822_v30 = vpop.permute.xlu0 %1821 }
 0x2eb   : > { %1899 = vst.msk [vmem:[#allocation4 + $0x98] sm:$0xff] %vm1879_vm3, %v1822_v30  ;;  %3181 = vrot.lane.b32.xlu1 %v3094_v33, %s6687_s28  ;;  %v1721_v30 = vld [vmem:[#allocation2 + $0x19] sm:$0xff] }
 0x2ec   : > { %2988 = vrot.lane.b32.xlu0 %v2323_v8, %s6685_s25 }
 0x2ed   : > { %v7551_v2 = vpop.permute.xlu1 %2974 }
 0x2ee   : > { %v7553_v4 = vpop.permute.xlu0 %2589 }
 0x2ef   : > { %2028 = vrot.lane.b32.xlu1 %v3093_v9, %s9838_s15 }
 0x2f0   : > { %1835 = vrot.lane.b32.xlu0 %v2900_v46, %s9839_s16 }
 0x2f1   : > { %v2399_v18 = vpop.permute.xlu1 %2398 }
 0x2f2   : > { %2477 = vst.msk [vmem:[#allocation4 + $0x90] sm:$0xff] %vm2458_vm8, %v2399_v18  ;;  %v2015_v48 = vpop.permute.xlu0 %2014 }
 0x2f3   : > { %2092 = vst.msk [vmem:[#allocation4 + $0x98] sm:$0xff] %vm2072_vm4, %v2015_v48  ;;  %2797 = vrot.lane.b32.xlu1 %v7180_v32, %s6683_s22  ;;  %v2491_v48 = vld [vmem:[#allocation2 + $0x1a] sm:$0xff] }
 0x2f4   : > { %2603 = vrot.lane.b32.xlu0 %v3093_v9, %s6688_s17 }
 0x2f5   : > { %v7562_v49 = vpop.permute.xlu1 %3167 }
 0x2f6   : > { %v7564_v53 = vpop.permute.xlu0 %2783 }
 0x2f7   : > { %2221 = vrot.lane.b32.xlu1 %v7180_v32, %s6684_s24 }
 0x2f8   : > { %1837 = vrot.lane.b32.xlu0 %v2323_v8, %s9839_s16 }
 0x2f9   : > { %v2401_v55 = vpop.permute.xlu1 %2400 }
 0x2fa   : > { %v2208_v57 = vpop.permute.xlu0 %2207 }
 0x2fb   : > { %2285 = vst.msk [vmem:[#allocation4 + $0x98] sm:$0xff] %vm2265_vm7, %v2208_v57  ;;  %2990 = vrot.lane.b32.xlu1 %v2902_v62, %s6685_s25 }
 0x2fc   : > { %2478 = vst.msk [vmem:[#allocation4 + $0x98] sm:$0xff] %vm2458_vm8, %v2401_v55  ;;  %2605 = vrot.lane.b32.xlu0 %v3094_v33, %s6688_s17 }
 0x2fd   : > { %v7573_v0 = vpop.permute.xlu1 %3169 }
 0x2fe   : > { %v7575_v6 = vpop.permute.xlu0 %2976 }
 0x2ff   : > { %2414 = vrot.lane.b32.xlu1 %v2902_v62, %s6686_s27 }
 0x300   : > { %2030 = vrot.lane.b32.xlu0 %v3094_v33, %s9838_s15 }
 0x301   : > { %v2017_v32 = vpop.permute.xlu1 %2016 }
 0x302   : > { %v1824_v25 = vpop.permute.xlu0 %1823 }
 0x303   : > { %1900 = vst.msk [vmem:[#allocation4 + $0xa0] sm:$0xff] %vm1879_vm3, %v1824_v25  ;;  %3183 = vrot.lane.b32.xlu1 %v3095_v50, %s6687_s28  ;;  %v3297_v25 = vld [vmem:[%s9810_s4 + $0x8] sm:$0xff] }
 0x304   : > { %2093 = vst.msk [vmem:[#allocation4 + $0xa0] sm:$0xff] %vm2072_vm4, %v2017_v32  ;;  %2799 = vrot.lane.b32.xlu0 %v7292_v60, %s6683_s22  ;;  %v3296_v32 = vld [vmem:[%s9810_s4] sm:$0xff] }
 0x305   : > { %v2786_v58 = vpop.permute.xlu1 %2785 }
 0x306   : > { %v2592_v45 = vpop.permute.xlu0 %2591 }
 0x307   : > { %2670 = vst.msk [vmem:[#allocation4 + $0x90] sm:$0xff] %vm2651_vm9, %v2592_v45  ;;  %2416 = vrot.lane.b32.xlu1 %v2325_v42, %s6686_s27 }
 0x308   : > { %2223 = vrot.lane.b32.xlu0 %v7292_v60, %s6684_s24  ;;  %2864 = vst.msk [vmem:[#allocation4 + $0x90] sm:$0xff] %vm2845_vm10, %v2786_v58  ;;  %v6497_v58 = vpack.c.bf16 %v3297_v25, %v3296_v32 }
 0x309   : > { %v2210_v38 = vpop.permute.xlu1 %2209 }
 0x30a   : > { %2286 = vst.msk [vmem:[#allocation4 + $0xa0] sm:$0xff] %vm2265_vm7, %v2210_v38  ;;  %v1826_v39 = vpop.permute.xlu0 %1825  ;;  %6498 = vmatprep.subr.bf16.mxu0 %v6497_v58  ;;  %v3299_v38 = vld [vmem:[%s9810_s4 + $0x18] sm:$0xff] }
 0x30b   : > { %1901 = vst.msk [vmem:[#allocation4 + $0xa8] sm:$0xff] %vm1879_vm3, %v1826_v39  ;;  %3185 = vrot.lane.b32.xlu1 %v3096_v20, %s6687_s28  ;;  %6500 = vmatpush3.bf16.msra.mxu0 %v6497_v58 }
 0x30c   : > { %2992 = vrot.lane.b32.xlu0 %v2325_v42, %s6685_s25 }
 0x30d   : > { %v2979_v21 = vpop.permute.xlu1 %2978 }
 0x30e   : > { %3057 = vst.msk [vmem:[#allocation4 + $0x90] sm:$0xff] %vm3038_vm11, %v2979_v21  ;;  %v2594_v40 = vpop.permute.xlu0 %2593 }
 0x30f   : > { %2671 = vst.msk [vmem:[#allocation4 + $0x98] sm:$0xff] %vm2651_vm9, %v2594_v40  ;;  %2032 = vrot.lane.b32.xlu1 %v3095_v50, %s9838_s15  ;;  %v2878_v40 = vld [vmem:[#allocation2 + $0x31] sm:$0xff] }
 0x310   : > { %1839 = vrot.lane.b32.xlu0 %v2902_v62, %s9839_s16 }
 0x311   : > { %v2403_v60 = vpop.permute.xlu1 %2402 }
 0x312   : > { %2479 = vst.msk [vmem:[#allocation4 + $0xa0] sm:$0xff] %vm2458_vm8, %v2403_v60  ;;  %v2019_v23 = vpop.permute.xlu0 %2018  ;;  %v3300_v60 = vld [vmem:[%s9810_s4 + $0x20] sm:$0xff] }
 0x313   : > { %2094 = vst.msk [vmem:[#allocation4 + $0xa8] sm:$0xff] %vm2072_vm4, %v2019_v23  ;;  %2801 = vrot.lane.b32.xlu1 %v2711_v13, %s6683_s22  ;;  %v3301_v23 = vld [vmem:[%s9810_s4 + $0x28] sm:$0xff] }
 0x314   : > { %2607 = vrot.lane.b32.xlu0 %v3095_v50, %s6688_s17 }
 0x315   : > { %v3172_v46 = vpop.permute.xlu1 %3171 }
 0x316   : > { %3250 = vst.msk [vmem:[#allocation4 + $0x90] sm:$0xff] %vm3231_vm12, %v3172_v46  ;;  %v2788_v26 = vpop.permute.xlu0 %2787  ;;  %v6505_v46 = vpack.c.bf16 %v3301_v23, %v3300_v60 }
 0x317   : > { %2865 = vst.msk [vmem:[#allocation4 + $0x98] sm:$0xff] %vm2845_vm10, %v2788_v26  ;;  %2225 = vrot.lane.b32.xlu1 %v2711_v13, %s6684_s24 }
 0x318   : > { %1841 = vrot.lane.b32.xlu0 %v2325_v42, %s9839_s16  ;;  %v3298_v42 = vld [vmem:[%s9810_s4 + $0x10] sm:$0xff] }
 0x319   : > { %v2405_v5 = vpop.permute.xlu1 %2404 }
 0x31a   : > { %v2212_v9 = vpop.permute.xlu0 %2211 }
 0x31b   : > { %2287 = vst.msk [vmem:[#allocation4 + $0xa8] sm:$0xff] %vm2265_vm7, %v2212_v9  ;;  %2171 = vrot.lane.b32.xlu1 %v7423_v52, %s6684_s24  ;;  %v3303_v9 = vld [vmem:[%s9810_s4 + $0x38] sm:$0xff] }
 0x31c   : > { %2480 = vst.msk [vmem:[#allocation4 + $0xa8] sm:$0xff] %vm2458_vm8, %v2405_v5  ;;  %2609 = vrot.lane.b32.xlu0 %v3096_v20, %s6688_s17  ;;  %v3302_v5 = vld [vmem:[%s9810_s4 + $0x30] sm:$0xff] }
 0x31d   : > { %v3174_v8 = vpop.permute.xlu1 %3173 }
 0x31e   : > { %v2981_v19 = vpop.permute.xlu0 %2980 }
 0x31f   : > { %3058 = vst.msk [vmem:[#allocation4 + $0x98] sm:$0xff] %vm3038_vm11, %v2981_v19  ;;  %1787 = vrot.lane.b32.xlu1 %v1721_v30, %s9839_s16  ;;  %v6509_v19 = vpack.c.bf16 %v3303_v9, %v3302_v5  ;;  %v3074_v5 = vld [vmem:[#allocation2 + $0x52] sm:$0xff] }
 0x320   : > { %3251 = vst.msk [vmem:[#allocation4 + $0x98] sm:$0xff] %vm3231_vm12, %v3174_v8  ;;  %2034 = vrot.lane.b32.xlu0 %v3096_v20, %s9838_s15  ;;  %v6501_v20 = vpack.c.bf16 %v3299_v38, %v3298_v42 }
 0x321   : > { %v2021_v33 = vpop.permute.xlu1 %2020 }
 0x322   : > { %v1828_v18 = vpop.permute.xlu0 %1827  ;;  %6502 = vmatprep.subr.bf16.mxu0 %v6501_v20 }
 0x323   : > { %1902 = vst.msk [vmem:[#allocation4 + $0xb0] sm:$0xff] %vm1879_vm3, %v1828_v18  ;;  %2555 = vrot.lane.b32.xlu1 %v2491_v48, %s6688_s17  ;;  %6504 = vmatpush3.bf16.msra.mxu0 %v6501_v20  ;;  %v3304_v18 = vld [vmem:[%s9810_s4 + $0x40] sm:$0xff] }
 0x324   : > { %2095 = vst.msk [vmem:[#allocation4 + $0xb0] sm:$0xff] %vm2072_vm4, %v2021_v33  ;;  %2169 = vrot.lane.b32.xlu0 %v7341_v41, %s6684_s24  ;;  %v2299_v41 = vld [vmem:[#allocation2 + $0x21] sm:$0xff]  ;;  %6506 = vmatprep.subr.bf16.mxu0 %v6505_v46  ;;  %v3071_v33 = vld [vmem:[#allocation2 + $0x32] sm:$0xff] }
 0x325   : > { %v2790_v52 = vpop.permute.xlu1 %2789 }
 0x326   : > { %v2596_v55 = vpop.permute.xlu0 %2595 }
 0x327   : > { %2672 = vst.msk [vmem:[#allocation4 + $0xa0] sm:$0xff] %vm2651_vm9, %v2596_v55  ;;  %1980 = vrot.lane.b32.xlu1 %v2491_v48, %s9838_s15  ;;  %6508 = vmatpush3.bf16.msra.mxu0 %v6505_v46  ;;  %v2301_v55 = vld [vmem:[#allocation2 + $0x39] sm:$0xff] }
 0x328   : > { %2866 = vst.msk [vmem:[#allocation4 + $0xa0] sm:$0xff] %vm2845_vm10, %v2790_v52  ;;  %2362 = vrot.lane.b32.xlu0 %v1721_v30, %s6686_s27  ;;  %6510 = vmatprep.subr.bf16.mxu0 %v6509_v19 }
 0x329   : > { %v2214_v57 = vpop.permute.xlu1 %2213 }
 0x32a   : > { %2288 = vst.msk [vmem:[#allocation4 + $0xb0] sm:$0xff] %vm2265_vm7, %v2214_v57  ;;  %v1830_v62 = vpop.permute.xlu0 %1829 }
 0x32b   : > { %1903 = vst.msk [vmem:[#allocation4 + $0xb8] sm:$0xff] %vm1879_vm3, %v1830_v62  ;;  %2749 = vrot.lane.b32.xlu1 %v7343_v15, %s6683_s22  ;;  %6512 = vmatpush3.bf16.msra.mxu0 %v6509_v19 }
 0x32c   : > { %2364 = vrot.lane.b32.xlu0 %v2299_v41, %s6686_s27  ;;  %6425 = vmatprep.subr.mxu0 %v3304_v18 }
 0x32d   : > { %v2983_v50 = vpop.permute.xlu1 %2982 }
 0x32e   : > { %3059 = vst.msk [vmem:[#allocation4 + $0xa0] sm:$0xff] %vm3038_vm11, %v2983_v50  ;;  %v2598_v45 = vpop.permute.xlu0 %2597 }
 0x32f   : > { %2673 = vst.msk [vmem:[#allocation4 + $0xa8] sm:$0xff] %vm2651_vm9, %v2598_v45  ;;  %2173 = vrot.lane.b32.xlu1 %v7343_v15, %s6684_s24  ;;  %v2492_v15 = vld [vmem:[#allocation2 + $0x22] sm:$0xff]  ;;  %6426 = vmatpush3.msra.mxu0 %v3304_v18 }
 0x330   : > { %1789 = vrot.lane.b32.xlu0 %v2299_v41, %s9839_s16  ;;  %v3072_v41 = vld [vmem:[#allocation2 + $0x3a] sm:$0xff] }
 0x331   : > { %v2407_v39 = vpop.permute.xlu1 %2406 }
 0x332   : > { %2481 = vst.msk [vmem:[#allocation4 + $0xb0] sm:$0xff] %vm2458_vm8, %v2407_v39  ;;  %v2023_v21 = vpop.permute.xlu0 %2022  ;;  %v2880_v39 = vld [vmem:[#allocation2 + $0x49] sm:$0xff] }
 0x333   : > { %2096 = vst.msk [vmem:[#allocation4 + $0xb8] sm:$0xff] %vm2072_vm4, %v2023_v21  ;;  %2942 = vrot.lane.b32.xlu1 %v2878_v40, %s6685_s25 }
 0x334   : > { %2557 = vrot.lane.b32.xlu0 %v2492_v15, %s6688_s17 }
 0x335   : > { %v3176_v13 = vpop.permute.xlu1 %3175 }
 0x336   : > { %3252 = vst.msk [vmem:[#allocation4 + $0xa0] sm:$0xff] %vm3231_vm12, %v3176_v13  ;;  %v2792_v26 = vpop.permute.xlu0 %2791  ;;  %v2303_v13 = vld [vmem:[#allocation2 + $0x51] sm:$0xff] }
 0x337   : > { %2867 = vst.msk [vmem:[#allocation4 + $0xa8] sm:$0xff] %vm2845_vm10, %v2792_v26  ;;  %2366 = vrot.lane.b32.xlu1 %v2878_v40, %s6686_s27 }
 0x338   : > { %1982 = vrot.lane.b32.xlu0 %v2492_v15, %s9838_s15  ;;  %v3073_v15 = vld [vmem:[#allocation2 + $0x4a] sm:$0xff] }
 0x339   : > { %v2409_v8 = vpop.permute.xlu1 %2408 }
 0x33a   : > { %v2216_v30 = vpop.permute.xlu0 %2215 }
 0x33b   : > { %2289 = vst.msk [vmem:[#allocation4 + $0xb8] sm:$0xff] %vm2265_vm7, %v2216_v30  ;;  %3135 = vrot.lane.b32.xlu1 %v3071_v33, %s6687_s28 }
 0x33c   : > { %2482 = vst.msk [vmem:[#allocation4 + $0xb8] sm:$0xff] %vm2458_vm8, %v2409_v8  ;;  %2751 = vrot.lane.b32.xlu0 %v7426_v54, %s6683_s22 }
 0x33d   : > { %v3178_v48 = vpop.permute.xlu1 %3177 }
 0x33e   : > { %v2985_v52 = vpop.permute.xlu0 %2984 }
 0x33f   : > { %3060 = vst.msk [vmem:[#allocation4 + $0xa8] sm:$0xff] %vm3038_vm11, %v2985_v52  ;;  %2368 = vrot.lane.b32.xlu1 %v2301_v55, %s6686_s27  ;;  %v2882_v52 = vld [vmem:[#allocation2 + $0x61] sm:$0xff] }
 0x340   : > { %3253 = vst.msk [vmem:[#allocation4 + $0xa8] sm:$0xff] %vm3231_vm12, %v3178_v48  ;;  %2175 = vrot.lane.b32.xlu0 %v7426_v54, %s6684_s24 }
 0x341   : > { %v2025_v57 = vpop.permute.xlu1 %2024 }
 0x342   : > { %v1832_v62 = vpop.permute.xlu0 %1831 }
 0x343   : > { %1904 = vst.msk [vmem:[#allocation4 + $0xc0] sm:$0xff] %vm1879_vm3, %v1832_v62  ;;  %3137 = vrot.lane.b32.xlu1 %v3072_v41, %s6687_s28 }
 0x344   : > { %2097 = vst.msk [vmem:[#allocation4 + $0xc0] sm:$0xff] %vm2072_vm4, %v2025_v57  ;;  %2944 = vrot.lane.b32.xlu0 %v2301_v55, %s6685_s25 }
 0x345   : > { %v2794_v32 = vpop.permute.xlu1 %2793 }
 0x346   : > { %v2600_v25 = vpop.permute.xlu0 %2599 }
 0x347   : > { %2674 = vst.msk [vmem:[#allocation4 + $0xb0] sm:$0xff] %vm2651_vm9, %v2600_v25  ;;  %1984 = vrot.lane.b32.xlu1 %v3071_v33, %s9838_s15 }
 0x348   : > { %2868 = vst.msk [vmem:[#allocation4 + $0xb0] sm:$0xff] %vm2845_vm10, %v2794_v32  ;;  %1791 = vrot.lane.b32.xlu0 %v2878_v40, %s9839_s16 }
 0x349   : > { %v2218_v54 = vpop.permute.xlu1 %2217 }
 0x34a   : > { %2290 = vst.msk [vmem:[#allocation4 + $0xc0] sm:$0xff] %vm2265_vm7, %v2218_v54  ;;  %v1834_v50 = vpop.permute.xlu0 %1833  ;;  %v2305_v54 = vld [vmem:[#allocation2 + $0x69] sm:$0xff] }
 0x34b   : > { %1905 = vst.msk [vmem:[#allocation4 + $0xc8] sm:$0xff] %vm1879_vm3, %v1834_v50  ;;  %2753 = vrot.lane.b32.xlu1 %v7349_v34, %s6683_s22 }
 0x34c   : > { %2559 = vrot.lane.b32.xlu0 %v3071_v33, %s6688_s17 }
 0x34d   : > { %v2987_v58 = vpop.permute.xlu1 %2986 }
 0x34e   : > { %3061 = vst.msk [vmem:[#allocation4 + $0xb0] sm:$0xff] %vm3038_vm11, %v2987_v58  ;;  %v2602_v45 = vpop.permute.xlu0 %2601 }
 0x34f   : > { %2675 = vst.msk [vmem:[#allocation4 + $0xb8] sm:$0xff] %vm2651_vm9, %v2602_v45  ;;  %2177 = vrot.lane.b32.xlu1 %v7349_v34, %s6684_s24  ;;  %v3076_v45 = vld [vmem:[#allocation2 + $0x6a] sm:$0xff] }
 0x350   : > { %1793 = vrot.lane.b32.xlu0 %v2301_v55, %s9839_s16 }
 0x351   : > { %v2411_v42 = vpop.permute.xlu1 %2410 }
 0x352   : > { %2483 = vst.msk [vmem:[#allocation4 + $0xc0] sm:$0xff] %vm2458_vm8, %v2411_v42  ;;  %v2027_v38 = vpop.permute.xlu0 %2026 }
 0x353   : > { %2098 = vst.msk [vmem:[#allocation4 + $0xc8] sm:$0xff] %vm2072_vm4, %v2027_v38  ;;  %2946 = vrot.lane.b32.xlu1 %v2880_v39, %s6685_s25 }
 0x354   : > { %2561 = vrot.lane.b32.xlu0 %v3072_v41, %s6688_s17 }
 0x355   : > { %v3180_v20 = vpop.permute.xlu1 %3179 }
 0x356   : > { %3254 = vst.msk [vmem:[#allocation4 + $0xb0] sm:$0xff] %vm3231_vm12, %v3180_v20  ;;  %v2796_v21 = vpop.permute.xlu0 %2795 }
 0x357   : > { %2869 = vst.msk [vmem:[#allocation4 + $0xb8] sm:$0xff] %vm2845_vm10, %v2796_v21  ;;  %2370 = vrot.lane.b32.xlu1 %v2880_v39, %s6686_s27 }
 0x358   : > { %1986 = vrot.lane.b32.xlu0 %v3072_v41, %s9838_s15  ;;  %v3075_v41 = vld [vmem:[#allocation2 + $0x62] sm:$0xff] }
 0x359   : > { %v2413_v34 = vpop.permute.xlu1 %2412 }
 0x35a   : > { %v2220_v40 = vpop.permute.xlu0 %2219 }
 0x35b   : > { %2291 = vst.msk [vmem:[#allocation4 + $0xc8] sm:$0xff] %vm2265_vm7, %v2220_v40  ;;  %3139 = vrot.lane.b32.xlu1 %v3073_v15, %s6687_s28 }
 0x35c   : > { %2484 = vst.msk [vmem:[#allocation4 + $0xc8] sm:$0xff] %vm2458_vm8, %v2413_v34  ;;  %2755 = vrot.lane.b32.xlu0 %v7434_v56, %s6683_s22 }
 0x35d   : > { %v3182_v60 = vpop.permute.xlu1 %3181 }
 0x35e   : > { %v2989_v23 = vpop.permute.xlu0 %2988 }
 0x35f   : > { %3062 = vst.msk [vmem:[#allocation4 + $0xb8] sm:$0xff] %vm3038_vm11, %v2989_v23  ;;  %2372 = vrot.lane.b32.xlu1 %v2303_v13, %s6686_s27 }
 0x360   : > { %3255 = vst.msk [vmem:[#allocation4 + $0xb8] sm:$0xff] %vm3231_vm12, %v3182_v60  ;;  %2179 = vrot.lane.b32.xlu0 %v7434_v56, %s6684_s24 }
 0x361   : > { %v2029_v46 = vpop.permute.xlu1 %2028 }
 0x362   : > { %v1836_v26 = vpop.permute.xlu0 %1835 }
 0x363   : > { %1906 = vst.msk [vmem:[#allocation4 + $0xd0] sm:$0xff] %vm1879_vm3, %v1836_v26  ;;  %3141 = vrot.lane.b32.xlu1 %v3074_v5, %s6687_s28 }
 0x364   : > { %2099 = vst.msk [vmem:[#allocation4 + $0xd0] sm:$0xff] %vm2072_vm4, %v2029_v46  ;;  %2948 = vrot.lane.b32.xlu0 %v2303_v13, %s6685_s25  ;;  %v3077_v46 = vld [vmem:[#allocation2 + $0x7a] sm:$0xff] }
 0x365   : > { %v2798_v9 = vpop.permute.xlu1 %2797 }
 0x366   : > { %v2604_v8 = vpop.permute.xlu0 %2603 }
 0x367   : > { %2676 = vst.msk [vmem:[#allocation4 + $0xc0] sm:$0xff] %vm2651_vm9, %v2604_v8  ;;  %1988 = vrot.lane.b32.xlu1 %v3073_v15, %s9838_s15 }
 0x368   : > { %2870 = vst.msk [vmem:[#allocation4 + $0xc0] sm:$0xff] %vm2845_vm10, %v2798_v9  ;;  %1795 = vrot.lane.b32.xlu0 %v2880_v39, %s9839_s16  ;;  %v2307_v9 = vld [vmem:[#allocation2 + $0x81] sm:$0xff] }
 0x369   : > { %v2222_v56 = vpop.permute.xlu1 %2221 }
 0x36a   : > { %2292 = vst.msk [vmem:[#allocation4 + $0xd0] sm:$0xff] %vm2265_vm7, %v2222_v56  ;;  %v1838_v19 = vpop.permute.xlu0 %1837 }
 0x36b   : > { %1907 = vst.msk [vmem:[#allocation4 + $0xd8] sm:$0xff] %vm1879_vm3, %v1838_v19  ;;  %2757 = vrot.lane.b32.xlu1 %v7357_v47, %s6683_s22  ;;  %v3078_v19 = vld [vmem:[#allocation2 + $0x82] sm:$0xff] }
 0x36c   : > { %2563 = vrot.lane.b32.xlu0 %v3073_v15, %s6688_s17  ;;  %v2884_v15 = vld [vmem:[#allocation2 + $0x79] sm:$0xff] }
 0x36d   : > { %v2991_v30 = vpop.permute.xlu1 %2990 }
 0x36e   : > { %3063 = vst.msk [vmem:[#allocation4 + $0xc0] sm:$0xff] %vm3038_vm11, %v2991_v30  ;;  %v2606_v33 = vpop.permute.xlu0 %2605 }
 0x36f   : > { %2677 = vst.msk [vmem:[#allocation4 + $0xc8] sm:$0xff] %vm2651_vm9, %v2606_v33  ;;  %2181 = vrot.lane.b32.xlu1 %v7357_v47, %s6684_s24 }
 0x370   : > { %1797 = vrot.lane.b32.xlu0 %v2303_v13, %s9839_s16 }
 0x371   : > { %v2415_v18 = vpop.permute.xlu1 %2414 }
 0x372   : > { %2485 = vst.msk [vmem:[#allocation4 + $0xd0] sm:$0xff] %vm2458_vm8, %v2415_v18  ;;  %v2031_v48 = vpop.permute.xlu0 %2030 }
 0x373   : > { %2100 = vst.msk [vmem:[#allocation4 + $0xd8] sm:$0xff] %vm2072_vm4, %v2031_v48  ;;  %2950 = vrot.lane.b32.xlu1 %v2882_v52, %s6685_s25 }
 0x374   : > { %2565 = vrot.lane.b32.xlu0 %v3074_v5, %s6688_s17 }
 0x375   : > { %v3184_v55 = vpop.permute.xlu1 %3183 }
 0x376   : > { %3256 = vst.msk [vmem:[#allocation4 + $0xc0] sm:$0xff] %vm3231_vm12, %v3184_v55  ;;  %v2800_v57 = vpop.permute.xlu0 %2799 }
 0x377   : > { %2871 = vst.msk [vmem:[#allocation4 + $0xc8] sm:$0xff] %vm2845_vm10, %v2800_v57  ;;  %2374 = vrot.lane.b32.xlu1 %v2882_v52, %s6686_s27 }
 0x378   : > { %1990 = vrot.lane.b32.xlu0 %v3074_v5, %s9838_s15 }
 0x379   : > { %v2417_v47 = vpop.permute.xlu1 %2416 }
 0x37a   : > { %v2224_v62 = vpop.permute.xlu0 %2223 }
 0x37b   : > { %2293 = vst.msk [vmem:[#allocation4 + $0xd8] sm:$0xff] %vm2265_vm7, %v2224_v62  ;;  %3143 = vrot.lane.b32.xlu1 %v3075_v41, %s6687_s28 }
 0x37c   : > { %2486 = vst.msk [vmem:[#allocation4 + $0xd8] sm:$0xff] %vm2458_vm8, %v2417_v47  ;;  %2759 = vrot.lane.b32.xlu0 %v7436_v59, %s6683_s22  ;;  %v2886_v47 = vld [vmem:[#allocation2 + $0x91] sm:$0xff] }
 0x37d   : > { %v3186_v32 = vpop.permute.xlu1 %3185 }
 0x37e   : > { %v2993_v25 = vpop.permute.xlu0 %2992 }
 0x37f   : > { %3064 = vst.msk [vmem:[#allocation4 + $0xc8] sm:$0xff] %vm3038_vm11, %v2993_v25  ;;  %2376 = vrot.lane.b32.xlu1 %v2305_v54, %s6686_s27 }
 0x380   : > { %3257 = vst.msk [vmem:[#allocation4 + $0xc8] sm:$0xff] %vm3231_vm12, %v3186_v32  ;;  %2183 = vrot.lane.b32.xlu0 %v7436_v59, %s6684_s24 }
 0x381   : > { %v2033_v50 = vpop.permute.xlu1 %2032 }
 0x382   : > { %v1840_v58 = vpop.permute.xlu0 %1839 }
 0x383   : > { %1908 = vst.msk [vmem:[#allocation4 + $0xe0] sm:$0xff] %vm1879_vm3, %v1840_v58  ;;  %3145 = vrot.lane.b32.xlu1 %v3076_v45, %s6687_s28 }
 0x384   : > { %2101 = vst.msk [vmem:[#allocation4 + $0xe0] sm:$0xff] %vm2072_vm4, %v2033_v50  ;;  %2952 = vrot.lane.b32.xlu0 %v2305_v54, %s6685_s25 }
 0x385   : > { %v2802_v42 = vpop.permute.xlu1 %2801 }
 0x386   : > { %v2608_v38 = vpop.permute.xlu0 %2607 }
 0x387   : > { %2678 = vst.msk [vmem:[#allocation4 + $0xd0] sm:$0xff] %vm2651_vm9, %v2608_v38  ;;  %1992 = vrot.lane.b32.xlu1 %v3075_v41, %s9838_s15 }
 0x388   : > { %2872 = vst.msk [vmem:[#allocation4 + $0xd0] sm:$0xff] %vm2845_vm10, %v2802_v42  ;;  %1799 = vrot.lane.b32.xlu0 %v2882_v52, %s9839_s16 }
 0x389   : > { %v2226_v59 = vpop.permute.xlu1 %2225 }
 0x38a   : > { %2294 = vst.msk [vmem:[#allocation4 + $0xe0] sm:$0xff] %vm2265_vm7, %v2226_v59  ;;  %v1842_v39 = vpop.permute.xlu0 %1841 }
 0x38b   : > { %1909 = vst.msk [vmem:[#allocation4 + $0xe8] sm:$0xff] %vm1879_vm3, %v1842_v39  ;;  %2761 = vrot.lane.b32.xlu1 %v7359_v22, %s6683_s22  ;;  %v3080_v39 = vld [vmem:[#allocation2 + $0x9a] sm:$0xff] }
 0x38c   : > { %2567 = vrot.lane.b32.xlu0 %v3075_v41, %s6688_s17 }
 0x38d   : > { %v2172_v20 = vpop.permute.xlu1 %2171 }
 0x38e   : > { %2267 = vst.msk [vmem:[#allocation4 + $0x8] sm:$0xff] %vm2265_vm7, %v2172_v20  ;;  %v2610_v21 = vpop.permute.xlu0 %2609 }
 0x38f   : > { %2679 = vst.msk [vmem:[#allocation4 + $0xd8] sm:$0xff] %vm2651_vm9, %v2610_v21  ;;  %2185 = vrot.lane.b32.xlu1 %v7359_v22, %s6684_s24 }
 0x390   : > { %1801 = vrot.lane.b32.xlu0 %v2305_v54, %s9839_s16  ;;  %v3079_v54 = vld [vmem:[#allocation2 + $0x92] sm:$0xff] }
 0x391   : > { %v1788_v34 = vpop.permute.xlu1 %1787 }
 0x392   : > { %1882 = vst.msk [vmem:[#allocation4 + $0x10] sm:$0xff] %vm1879_vm3, %v1788_v34  ;;  %v2035_v40 = vpop.permute.xlu0 %2034 }
 0x393   : > { %2102 = vst.msk [vmem:[#allocation4 + $0xe8] sm:$0xff] %vm2072_vm4, %v2035_v40  ;;  %2954 = vrot.lane.b32.xlu1 %v2884_v15, %s6685_s25 }
 0x394   : > { %2569 = vrot.lane.b32.xlu0 %v3076_v45, %s6688_s17 }
 0x395   : > { %v2556_v60 = vpop.permute.xlu1 %2555 }
 0x396   : > { %v2170_v23 = vpop.permute.xlu0 %2169 }
 0x397   : > { %2266 = vst.msk [vmem:[#allocation4] sm:$0xff] %vm2265_vm7, %v2170_v23  ;;  %2378 = vrot.lane.b32.xlu1 %v2884_v15, %s6686_s27 }
 0x398   : > { %1994 = vrot.lane.b32.xlu0 %v3076_v45, %s9838_s15  ;;  %v2309_v45 = vld [vmem:[#allocation2 + $0x99] sm:$0xff] }
 0x399   : > { %v1981_v22 = vpop.permute.xlu1 %1980 }
 0x39a   : > { %2075 = vst.msk [vmem:[#allocation4 + $0x10] sm:$0xff] %vm2072_vm4, %v1981_v22  ;;  %v2363_v13 = vpop.permute.xlu0 %2362  ;;  %v2888_v22 = vld [vmem:[#allocation2 + $0xa9] sm:$0xff] }
 0x39b   : > { %2459 = vst.msk [vmem:[#allocation4] sm:$0xff] %vm2458_vm8, %v2363_v13  ;;  %3147 = vrot.lane.b32.xlu1 %v3077_v46, %s6687_s28 }
 0x39c   : > { %2652 = vst.msk [vmem:[#allocation4] sm:$0xff] %vm2651_vm9, %v2556_v60  ;;  %2763 = vrot.lane.b32.xlu0 %v7441_v63, %s6683_s22 }
 0x39d   : > { %v2750_v26 = vpop.permute.xlu1 %2749 }
 0x39e   : > { %2846 = vst.msk [vmem:[#allocation4] sm:$0xff] %vm2845_vm10, %v2750_v26  ;;  %v2365_v5 = vpop.permute.xlu0 %2364 }
 0x39f   : > { %2460 = vst.msk [vmem:[#allocation4 + $0x8] sm:$0xff] %vm2458_vm8, %v2365_v5  ;;  %2380 = vrot.lane.b32.xlu1 %v2307_v9, %s6686_s27 }
 0x3a0   : > { %2187 = vrot.lane.b32.xlu0 %v7441_v63, %s6684_s24 }
 0x3a1   : > { %v2174_v8 = vpop.permute.xlu1 %2173 }
 0x3a2   : > { %2268 = vst.msk [vmem:[#allocation4 + $0x10] sm:$0xff] %vm2265_vm7, %v2174_v8  ;;  %v1790_v56 = vpop.permute.xlu0 %1789 }
 0x3a3   : > { %1883 = vst.msk [vmem:[#allocation4 + $0x18] sm:$0xff] %vm1879_vm3, %v1790_v56  ;;  %3149 = vrot.lane.b32.xlu1 %v3078_v19, %s6687_s28 }
 0x3a4   : > { %2956 = vrot.lane.b32.xlu0 %v2307_v9, %s6685_s25 }
 0x3a5   : > { %v2943_v30 = vpop.permute.xlu1 %2942 }
 0x3a6   : > { %3039 = vst.msk [vmem:[#allocation4] sm:$0xff] %vm3038_vm11, %v2943_v30  ;;  %v2558_v33 = vpop.permute.xlu0 %2557 }
 0x3a7   : > { %2653 = vst.msk [vmem:[#allocation4 + $0x8] sm:$0xff] %vm2651_vm9, %v2558_v33  ;;  %1996 = vrot.lane.b32.xlu1 %v3077_v46, %s9838_s15 }
 0x3a8   : > { %1803 = vrot.lane.b32.xlu0 %v2884_v15, %s9839_s16 }
 0x3a9   : > { %v2367_v63 = vpop.permute.xlu1 %2366 }
 0x3aa   : > { %2461 = vst.msk [vmem:[#allocation4 + $0x10] sm:$0xff] %vm2458_vm8, %v2367_v63  ;;  %v1983_v18 = vpop.permute.xlu0 %1982 }
 0x3ab   : > { %2076 = vst.msk [vmem:[#allocation4 + $0x18] sm:$0xff] %vm2072_vm4, %v1983_v18  ;;  %2765 = vrot.lane.b32.xlu1 %v7365_v12, %s6683_s22  ;;  %v3082_v18 = vld [vmem:[#allocation2 + $0xb2] sm:$0xff] }
 0x3ac   : > { %2571 = vrot.lane.b32.xlu0 %v3077_v46, %s6688_s17 }
 0x3ad   : > { %v3136_v48 = vpop.permute.xlu1 %3135 }
 0x3ae   : > { %3232 = vst.msk [vmem:[#allocation4] sm:$0xff] %vm3231_vm12, %v3136_v48  ;;  %v2752_v52 = vpop.permute.xlu0 %2751 }
 0x3af   : > { %2847 = vst.msk [vmem:[#allocation4 + $0x8] sm:$0xff] %vm2845_vm10, %v2752_v52  ;;  %2189 = vrot.lane.b32.xlu1 %v7365_v12, %s6684_s24 }
 0x3b0   : > { %1805 = vrot.lane.b32.xlu0 %v2307_v9, %s9839_s16  ;;  %v3081_v9 = vld [vmem:[#allocation2 + $0xaa] sm:$0xff] }
 0x3b1   : > { %v2369_v55 = vpop.permute.xlu1 %2368 }
 0x3b2   : > { %v2176_v57 = vpop.permute.xlu0 %2175 }
 0x3b3   : > { %2269 = vst.msk [vmem:[#allocation4 + $0x18] sm:$0xff] %vm2265_vm7, %v2176_v57  ;;  %2958 = vrot.lane.b32.xlu1 %v2886_v47, %s6685_s25 }
 0x3b4   : > { %2462 = vst.msk [vmem:[#allocation4 + $0x18] sm:$0xff] %vm2458_vm8, %v2369_v55  ;;  %2573 = vrot.lane.b32.xlu0 %v3078_v19, %s6688_s17 }
 0x3b5   : > { %v3138_v62 = vpop.permute.xlu1 %3137  ;;  %v3264_v41 = vld [vmem:[#allocation4] sm:$0xff] }
 0x3b6   : > { %v2945_v32 = vpop.permute.xlu0 %2944  ;;  %6427 = vmatprep.mubr.msk.f32.mxu0 %vm3305_vm13, %v3264_v41 }
 0x3b7   : > { %3040 = vst.msk [vmem:[#allocation4 + $0x8] sm:$0xff] %vm3038_vm11, %v2945_v32  ;;  %2382 = vrot.lane.b32.xlu1 %v2886_v47, %s6686_s27  ;;  %v2890_v32 = vld [vmem:[#allocation2 + $0xc1] sm:$0xff] }
 0x3b8   : > { %3233 = vst.msk [vmem:[#allocation4 + $0x8] sm:$0xff] %vm3231_vm12, %v3138_v62  ;;  %1998 = vrot.lane.b32.xlu0 %v3078_v19, %s9838_s15  ;;  %v2311_v19 = vld [vmem:[#allocation2 + $0xb1] sm:$0xff] }
 0x3b9   : > { %v1985_v12 = vpop.permute.xlu1 %1984 }
 0x3ba   : > { %v1792_v25 = vpop.permute.xlu0 %1791 }
 0x3bb   : > { %1884 = vst.msk [vmem:[#allocation4 + $0x20] sm:$0xff] %vm1879_vm3, %v1792_v25  ;;  %3151 = vrot.lane.b32.xlu1 %v3079_v54, %s6687_s28 }
 0x3bc   : > { %2077 = vst.msk [vmem:[#allocation4 + $0x20] sm:$0xff] %vm2072_vm4, %v1985_v12  ;;  %2767 = vrot.lane.b32.xlu0 %v7449_v1, %s6683_s22 }
 0x3bd   : > { %v2754_v50 = vpop.permute.xlu1 %2753 }
 0x3be   : > { %v2560_v58 = vpop.permute.xlu0 %2559 }
 0x3bf   : > { %2654 = vst.msk [vmem:[#allocation4 + $0x10] sm:$0xff] %vm2651_vm9, %v2560_v58  ;;  %2384 = vrot.lane.b32.xlu1 %v2309_v45, %s6686_s27  ;;  %v3265_v42 = vld [vmem:[#allocation4 + $0x8] sm:$0xff] }
 0x3c0   : > { %2848 = vst.msk [vmem:[#allocation4 + $0x10] sm:$0xff] %vm2845_vm10, %v2754_v50  ;;  %2191 = vrot.lane.b32.xlu0 %v7449_v1, %s6684_s24  ;;  %6428 = vmatmul.mubr.msk.f32.vlgmr.msra.gmra.mrb[4].mxu0 %vm3305_vm13, %v3265_v42  ;;  %v3083_v58 = vld [vmem:[#allocation2 + $0xc2] sm:$0xff] }
 0x3c1   : > { %v2178_v38 = vpop.permute.xlu1 %2177 }
 0x3c2   : > { %2270 = vst.msk [vmem:[#allocation4 + $0x20] sm:$0xff] %vm2265_vm7, %v2178_v38  ;;  %v1794_v59 = vpop.permute.xlu0 %1793  ;;  %v2313_v38 = vld [vmem:[#allocation2 + $0xc9] sm:$0xff] }
 0x3c3   : > { %1885 = vst.msk [vmem:[#allocation4 + $0x28] sm:$0xff] %vm1879_vm3, %v1794_v59  ;;  %3153 = vrot.lane.b32.xlu1 %v3080_v39, %s6687_s28 }
 0x3c4   : > { %2960 = vrot.lane.b32.xlu0 %v2309_v45, %s6685_s25 }
 0x3c5   : > { %v2947_v20 = vpop.permute.xlu1 %2946 }
 0x3c6   : > { %3041 = vst.msk [vmem:[#allocation4 + $0x10] sm:$0xff] %vm3038_vm11, %v2947_v20  ;;  %v2562_v21 = vpop.permute.xlu0 %2561 }
 0x3c7   : > { %2655 = vst.msk [vmem:[#allocation4 + $0x18] sm:$0xff] %vm2651_vm9, %v2562_v21  ;;  %2000 = vrot.lane.b32.xlu1 %v3079_v54, %s9838_s15  ;;  %v7901_v21 = vld [vmem:[#allocation2 + $0xca] sm:$0xff] }
 0x3c8   : > { %1807 = vrot.lane.b32.xlu0 %v2886_v47, %s9839_s16 }
 0x3c9   : > { %v2371_v1 = vpop.permute.xlu1 %2370 }
 0x3ca   : > { %2463 = vst.msk [vmem:[#allocation4 + $0x20] sm:$0xff] %vm2458_vm8, %v2371_v1  ;;  %v1987_v34 = vpop.permute.xlu0 %1986 }
 0x3cb   : > { %2078 = vst.msk [vmem:[#allocation4 + $0x28] sm:$0xff] %vm2072_vm4, %v1987_v34  ;;  %2769 = vrot.lane.b32.xlu1 %v7373_v29, %s6683_s22 }
 0x3cc   : > { %2575 = vrot.lane.b32.xlu0 %v3079_v54, %s6688_s17 }
 0x3cd   : > { %v3140_v40 = vpop.permute.xlu1 %3139 }
 0x3ce   : > { %3234 = vst.msk [vmem:[#allocation4 + $0x10] sm:$0xff] %vm3231_vm12, %v3140_v40  ;;  %v2756_v15 = vpop.permute.xlu0 %2755 }
 0x3cf   : > { %2849 = vst.msk [vmem:[#allocation4 + $0x18] sm:$0xff] %vm2845_vm10, %v2756_v15  ;;  %2193 = vrot.lane.b32.xlu1 %v7373_v29, %s6684_s24  ;;  %v7912_v15 = vld [vmem:[#allocation2 + $0x169] sm:$0xff] }
 0x3d0   : > { %1809 = vrot.lane.b32.xlu0 %v2309_v45, %s9839_s16 }
 0x3d1   : > { %v2373_v60 = vpop.permute.xlu1 %2372 }
 0x3d2   : > { %v2180_v23 = vpop.permute.xlu0 %2179 }
 0x3d3   : > { %2271 = vst.msk [vmem:[#allocation4 + $0x28] sm:$0xff] %vm2265_vm7, %v2180_v23  ;;  %2962 = vrot.lane.b32.xlu1 %v2888_v22, %s6685_s25 }
 0x3d4   : > { %2464 = vst.msk [vmem:[#allocation4 + $0x28] sm:$0xff] %vm2458_vm8, %v2373_v60  ;;  %2577 = vrot.lane.b32.xlu0 %v3080_v39, %s6688_s17 }
 0x3d5   : > { %v3142_v13 = vpop.permute.xlu1 %3141  ;;  %v3266_v46 = vld [vmem:[#allocation4 + $0x10] sm:$0xff] }
 0x3d6   : > { %v2949_v26 = vpop.permute.xlu0 %2948  ;;  %6430 = vmatprep.mubr.msk.f32.mxu0 %vm3305_vm13, %v3266_v46  ;;  %v7923_v46 = vld [vmem:[#allocation2 + $0x16a] sm:$0xff] }
 0x3d7   : > { %3042 = vst.msk [vmem:[#allocation4 + $0x18] sm:$0xff] %vm3038_vm11, %v2949_v26  ;;  %2386 = vrot.lane.b32.xlu1 %v2888_v22, %s6686_s27 }
 0x3d8   : > { %3235 = vst.msk [vmem:[#allocation4 + $0x18] sm:$0xff] %vm3231_vm12, %v3142_v13  ;;  %2002 = vrot.lane.b32.xlu0 %v3080_v39, %s9838_s15 }
 0x3d9   : > { %v1989_v29 = vpop.permute.xlu1 %1988 }
 0x3da   : > { %v1796_v5 = vpop.permute.xlu0 %1795 }
 0x3db   : > { %1886 = vst.msk [vmem:[#allocation4 + $0x30] sm:$0xff] %vm1879_vm3, %v1796_v5  ;;  %3155 = vrot.lane.b32.xlu1 %v3081_v9, %s6687_s28 }
 0x3dc   : > { %2079 = vst.msk [vmem:[#allocation4 + $0x30] sm:$0xff] %vm2072_vm4, %v1989_v29  ;;  %2771 = vrot.lane.b32.xlu0 %v7451_v3, %s6683_s22 }
 0x3dd   : > { %v2758_v8 = vpop.permute.xlu1 %2757 }
 0x3de   : > { %v2564_v56 = vpop.permute.xlu0 %2563 }
 0x3df   : > { %2656 = vst.msk [vmem:[#allocation4 + $0x20] sm:$0xff] %vm2651_vm9, %v2564_v56  ;;  %2388 = vrot.lane.b32.xlu1 %v2311_v19, %s6686_s27  ;;  %v3267_v30 = vld [vmem:[#allocation4 + $0x18] sm:$0xff] }
 0x3e0   : > { %2850 = vst.msk [vmem:[#allocation4 + $0x20] sm:$0xff] %vm2845_vm10, %v2758_v8  ;;  %2195 = vrot.lane.b32.xlu0 %v7451_v3, %s6684_s24  ;;  %6431 = vmatmul.mubr.msk.f32.gmra.mrb[6].mxu0 %vm3305_vm13, %v3267_v30 }
 0x3e1   : > { %v2182_v33 = vpop.permute.xlu1 %2181 }
 0x3e2   : > { %2272 = vst.msk [vmem:[#allocation4 + $0x30] sm:$0xff] %vm2265_vm7, %v2182_v33  ;;  %v1798_v63 = vpop.permute.xlu0 %1797 }
 0x3e3   : > { %1887 = vst.msk [vmem:[#allocation4 + $0x38] sm:$0xff] %vm1879_vm3, %v1798_v63  ;;  %3157 = vrot.lane.b32.xlu1 %v3082_v18, %s6687_s28 }
 0x3e4   : > { %2964 = vrot.lane.b32.xlu0 %v2311_v19, %s6685_s25 }
 0x3e5   : > { %v2951_v48 = vpop.permute.xlu1 %2950 }
 0x3e6   : > { %3043 = vst.msk [vmem:[#allocation4 + $0x20] sm:$0xff] %vm3038_vm11, %v2951_v48  ;;  %v2566_v52 = vpop.permute.xlu0 %2565 }
 0x3e7   : > { %2657 = vst.msk [vmem:[#allocation4 + $0x28] sm:$0xff] %vm2651_vm9, %v2566_v52  ;;  %2004 = vrot.lane.b32.xlu1 %v3081_v9, %s9838_s15  ;;  %v2713_v52 = vld [vmem:[#allocation2 + $0x180] sm:$0xff] }
 0x3e8   : > { %1811 = vrot.lane.b32.xlu0 %v2888_v22, %s9839_s16 }
 0x3e9   : > { %v2375_v3 = vpop.permute.xlu1 %2374 }
 0x3ea   : > { %2465 = vst.msk [vmem:[#allocation4 + $0x30] sm:$0xff] %vm2458_vm8, %v2375_v3  ;;  %v1991_v55 = vpop.permute.xlu0 %1990 }
 0x3eb   : > { %2080 = vst.msk [vmem:[#allocation4 + $0x38] sm:$0xff] %vm2072_vm4, %v1991_v55  ;;  %2773 = vrot.lane.b32.xlu1 %v7375_v10, %s6683_s22 }
 0x3ec   : > { %2579 = vrot.lane.b32.xlu0 %v3081_v9, %s6688_s17  ;;  %v2327_v9 = vld [vmem:[#allocation2 + $0x171] sm:$0xff] }
 0x3ed   : > { %v3144_v57 = vpop.permute.xlu1 %3143 }
 0x3ee   : > { %3236 = vst.msk [vmem:[#allocation4 + $0x20] sm:$0xff] %vm3231_vm12, %v3144_v57  ;;  %v2760_v47 = vpop.permute.xlu0 %2759 }
 0x3ef   : > { %2851 = vst.msk [vmem:[#allocation4 + $0x28] sm:$0xff] %vm2845_vm10, %v2760_v47  ;;  %2197 = vrot.lane.b32.xlu1 %v7375_v10, %s6684_s24  ;;  %v2906_v47 = vld [vmem:[#allocation2 + $0x181] sm:$0xff] }
 0x3f0   : > { %1813 = vrot.lane.b32.xlu0 %v2311_v19, %s9839_s16  ;;  %v3098_v19 = vld [vmem:[#allocation2 + $0x172] sm:$0xff] }
 0x3f1   : > { %v2377_v62 = vpop.permute.xlu1 %2376 }
 0x3f2   : > { %v2184_v41 = vpop.permute.xlu0 %2183 }
 0x3f3   : > { %2273 = vst.msk [vmem:[#allocation4 + $0x38] sm:$0xff] %vm2265_vm7, %v2184_v41  ;;  %2966 = vrot.lane.b32.xlu1 %v2890_v32, %s6685_s25 }
 0x3f4   : > { %2466 = vst.msk [vmem:[#allocation4 + $0x38] sm:$0xff] %vm2458_vm8, %v2377_v62  ;;  %2581 = vrot.lane.b32.xlu0 %v3082_v18, %s6688_s17 }
 0x3f5   : > { %v3146_v12 = vpop.permute.xlu1 %3145  ;;  %v3268_v25 = vld [vmem:[#allocation4 + $0x20] sm:$0xff] }
 0x3f6   : > { %v2953_v54 = vpop.permute.xlu0 %2952  ;;  %6433 = vmatprep.mubr.msk.f32.mxu0 %vm3305_vm13, %v3268_v25  ;;  %v3099_v25 = vld [vmem:[#allocation2 + $0x182] sm:$0xff] }
 0x3f7   : > { %3044 = vst.msk [vmem:[#allocation4 + $0x28] sm:$0xff] %vm3038_vm11, %v2953_v54  ;;  %2390 = vrot.lane.b32.xlu1 %v2890_v32, %s6686_s27 }
 0x3f8   : > { %3237 = vst.msk [vmem:[#allocation4 + $0x28] sm:$0xff] %vm3231_vm12, %v3146_v12  ;;  %2006 = vrot.lane.b32.xlu0 %v3082_v18, %s9838_s15 }
 0x3f9   : > { %v1993_v10 = vpop.permute.xlu1 %1992 }
 0x3fa   : > { %v1800_v50 = vpop.permute.xlu0 %1799 }
 0x3fb   : > { %1888 = vst.msk [vmem:[#allocation4 + $0x40] sm:$0xff] %vm1879_vm3, %v1800_v50  ;;  %3159 = vrot.lane.b32.xlu1 %v3083_v58, %s6687_s28 }
 0x3fc   : > { %2081 = vst.msk [vmem:[#allocation4 + $0x40] sm:$0xff] %vm2072_vm4, %v1993_v10  ;;  %2775 = vrot.lane.b32.xlu0 %v7456_v36, %s6683_s22 }
 0x3fd   : > { %v2762_v45 = vpop.permute.xlu1 %2761 }
 0x3fe   : > { %v2568_v42 = vpop.permute.xlu0 %2567 }
 0x3ff   : > { %2658 = vst.msk [vmem:[#allocation4 + $0x30] sm:$0xff] %vm2651_vm9, %v2568_v42  ;;  %2392 = vrot.lane.b32.xlu1 %v2313_v38, %s6686_s27  ;;  %v3269_v59 = vld [vmem:[#allocation4 + $0x28] sm:$0xff] }
 0x400   : > { %2852 = vst.msk [vmem:[#allocation4 + $0x30] sm:$0xff] %vm2845_vm10, %v2762_v45  ;;  %2199 = vrot.lane.b32.xlu0 %v7456_v36, %s6684_s24  ;;  %6434 = vmatmul.mubr.msk.f32.gmra.mrb[8].mxu0 %vm3305_vm13, %v3269_v59  ;;  %v2522_v42 = vld [vmem:[#allocation2 + $0x18a] sm:$0xff]  ;;  %v2716_v59 = vld [vmem:[#allocation2 + $0x1a0] sm:$0xff] }
 0x401   : > { %v2186_v39 = vpop.permute.xlu1 %2185 }
 0x402   : > { %2274 = vst.msk [vmem:[#allocation4 + $0x40] sm:$0xff] %vm2265_vm7, %v2186_v39  ;;  %v1802_v20 = vpop.permute.xlu0 %1801 }
 0x403   : > { %1889 = vst.msk [vmem:[#allocation4 + $0x48] sm:$0xff] %vm1879_vm3, %v1802_v20  ;;  %3161 = vrot.lane.b32.xlu1 %v7901_v21, %s6687_s28 }
 0x404   : > { %2968 = vrot.lane.b32.xlu0 %v2313_v38, %s6685_s25 }
 0x405   : > { %v2955_v1 = vpop.permute.xlu1 %2954 }
 0x406   : > { %3045 = vst.msk [vmem:[#allocation4 + $0x30] sm:$0xff] %vm3038_vm11, %v2955_v1  ;;  %v2570_v34 = vpop.permute.xlu0 %2569  ;;  %v2909_v1 = vld [vmem:[#allocation2 + $0x1a1] sm:$0xff] }
 0x407   : > { %2659 = vst.msk [vmem:[#allocation4 + $0x38] sm:$0xff] %vm2651_vm9, %v2570_v34  ;;  %2008 = vrot.lane.b32.xlu1 %v3083_v58, %s9838_s15 }
 0x408   : > { %1815 = vrot.lane.b32.xlu0 %v2890_v32, %s9839_s16 }
 0x409   : > { %v2379_v36 = vpop.permute.xlu1 %2378 }
 0x40a   : > { %2467 = vst.msk [vmem:[#allocation4 + $0x40] sm:$0xff] %vm2458_vm8, %v2379_v36  ;;  %v1995_v40 = vpop.permute.xlu0 %1994 }
 0x40b   : > { %2082 = vst.msk [vmem:[#allocation4 + $0x48] sm:$0xff] %vm2072_vm4, %v1995_v40  ;;  %2994 = vrot.lane.b32.xlu1 %v7912_v15, %s6685_s25  ;;  %v2907_v40 = vld [vmem:[#allocation2 + $0x189] sm:$0xff] }
 0x40c   : > { %2583 = vrot.lane.b32.xlu0 %v3083_v58, %s6688_s17 }
 0x40d   : > { %v3148_v60 = vpop.permute.xlu1 %3147 }
 0x40e   : > { %3238 = vst.msk [vmem:[#allocation4 + $0x30] sm:$0xff] %vm3231_vm12, %v3148_v60  ;;  %v2764_v23 = vpop.permute.xlu0 %2763 }
 0x40f   : > { %2853 = vst.msk [vmem:[#allocation4 + $0x38] sm:$0xff] %vm2845_vm10, %v2764_v23  ;;  %2418 = vrot.lane.b32.xlu1 %v7912_v15, %s6686_s27 }
 0x410   : > { %1817 = vrot.lane.b32.xlu0 %v2313_v38, %s9839_s16  ;;  %v2714_v38 = vld [vmem:[#allocation2 + $0x188] sm:$0xff] }
 0x411   : > { %v2381_v22 = vpop.permute.xlu1 %2380 }
 0x412   : > { %v2188_v13 = vpop.permute.xlu0 %2187 }
 0x413   : > { %2275 = vst.msk [vmem:[#allocation4 + $0x48] sm:$0xff] %vm2265_vm7, %v2188_v13  ;;  %3187 = vrot.lane.b32.xlu1 %v7923_v46, %s6687_s28 }
 0x414   : > { %2468 = vst.msk [vmem:[#allocation4 + $0x48] sm:$0xff] %vm2458_vm8, %v2381_v22  ;;  %2585 = vrot.lane.b32.xlu0 %v7901_v21, %s6688_s17 }
 0x415   : > { %v3150_v26 = vpop.permute.xlu1 %3149  ;;  %v3270_v29 = vld [vmem:[#allocation4 + $0x30] sm:$0xff] }
 0x416   : > { %v2957_v5 = vpop.permute.xlu0 %2956  ;;  %6436 = vmatprep.mubr.msk.f32.mxu0 %vm3305_vm13, %v3270_v29 }
 0x417   : > { %3046 = vst.msk [vmem:[#allocation4 + $0x38] sm:$0xff] %vm3038_vm11, %v2957_v5  ;;  %2420 = vrot.lane.b32.xlu1 %v2327_v9, %s6686_s27 }
 0x418   : > { %3239 = vst.msk [vmem:[#allocation4 + $0x38] sm:$0xff] %vm3231_vm12, %v3150_v26  ;;  %2010 = vrot.lane.b32.xlu0 %v7901_v21, %s9838_s15  ;;  %v2715_v26 = vld [vmem:[#allocation2 + $0x198] sm:$0xff] }
 0x419   : > { %v1997_v8 = vpop.permute.xlu1 %1996 }
 0x41a   : > { %v1804_v56 = vpop.permute.xlu0 %1803 }
 0x41b   : > { %1890 = vst.msk [vmem:[#allocation4 + $0x50] sm:$0xff] %vm1879_vm3, %v1804_v56  ;;  %3189 = vrot.lane.b32.xlu1 %v3098_v19, %s6687_s28 }
 0x41c   : > { %2083 = vst.msk [vmem:[#allocation4 + $0x50] sm:$0xff] %vm2072_vm4, %v1997_v8  ;;  %2803 = vrot.lane.b32.xlu0 %v7323_v51, %s6683_s22 }
 0x41d   : > { %v2766_v30 = vpop.permute.xlu1 %2765 }
 0x41e   : > { %v2572_v33 = vpop.permute.xlu0 %2571 }
 0x41f   : > { %2660 = vst.msk [vmem:[#allocation4 + $0x40] sm:$0xff] %vm2651_vm9, %v2572_v33  ;;  %2036 = vrot.lane.b32.xlu1 %v7923_v46, %s9838_s15  ;;  %v3271_v63 = vld [vmem:[#allocation4 + $0x38] sm:$0xff] }
 0x420   : > { %2854 = vst.msk [vmem:[#allocation4 + $0x40] sm:$0xff] %vm2845_vm10, %v2766_v30  ;;  %2227 = vrot.lane.b32.xlu0 %v7323_v51, %s6684_s24  ;;  %6437 = vmatmul.mubr.msk.f32.gmra.mrb[10].mxu0 %vm3305_vm13, %v3271_v63  ;;  %v3101_v30 = vld [vmem:[#allocation2 + $0x19a] sm:$0xff] }
 0x421   : > { %v2190_v18 = vpop.permute.xlu1 %2189 }
 0x422   : > { %2276 = vst.msk [vmem:[#allocation4 + $0x50] sm:$0xff] %vm2265_vm7, %v2190_v18  ;;  %v1806_v48 = vpop.permute.xlu0 %1805 }
 0x423   : > { %1891 = vst.msk [vmem:[#allocation4 + $0x58] sm:$0xff] %vm1879_vm3, %v1806_v48  ;;  %2805 = vrot.lane.b32.xlu1 %v2713_v52, %s6683_s22 }
 0x424   : > { %2996 = vrot.lane.b32.xlu0 %v2327_v9, %s6685_s25 }
 0x425   : > { %v2959_v3 = vpop.permute.xlu1 %2958 }
 0x426   : > { %3047 = vst.msk [vmem:[#allocation4 + $0x40] sm:$0xff] %vm3038_vm11, %v2959_v3  ;;  %v2574_v55 = vpop.permute.xlu0 %2573 }
 0x427   : > { %2661 = vst.msk [vmem:[#allocation4 + $0x48] sm:$0xff] %vm2651_vm9, %v2574_v55  ;;  %2229 = vrot.lane.b32.xlu1 %v2713_v52, %s6684_s24 }
 0x428   : > { %1843 = vrot.lane.b32.xlu0 %v7912_v15, %s9839_s16  ;;  %v3102_v15 = vld [vmem:[#allocation2 + $0x1a2] sm:$0xff] }
 0x429   : > { %v2383_v51 = vpop.permute.xlu1 %2382 }
 0x42a   : > { %2469 = vst.msk [vmem:[#allocation4 + $0x50] sm:$0xff] %vm2458_vm8, %v2383_v51  ;;  %v1999_v57 = vpop.permute.xlu0 %1998 }
 0x42b   : > { %2084 = vst.msk [vmem:[#allocation4 + $0x58] sm:$0xff] %vm2072_vm4, %v1999_v57  ;;  %2998 = vrot.lane.b32.xlu1 %v2906_v47, %s6685_s25 }
 0x42c   : > { %2611 = vrot.lane.b32.xlu0 %v7923_v46, %s6688_s17 }
 0x42d   : > { %v3152_v62 = vpop.permute.xlu1 %3151 }
 0x42e   : > { %3240 = vst.msk [vmem:[#allocation4 + $0x40] sm:$0xff] %vm3231_vm12, %v3152_v62  ;;  %v2768_v41 = vpop.permute.xlu0 %2767 }
 0x42f   : > { %2855 = vst.msk [vmem:[#allocation4 + $0x48] sm:$0xff] %vm2845_vm10, %v2768_v41  ;;  %2422 = vrot.lane.b32.xlu1 %v2906_v47, %s6686_s27 }
 0x430   : > { %1845 = vrot.lane.b32.xlu0 %v2327_v9, %s9839_s16  ;;  %v2908_v9 = vld [vmem:[#allocation2 + $0x199] sm:$0xff] }
 0x431   : > { %v2385_v32 = vpop.permute.xlu1 %2384 }
 0x432   : > { %v2192_v12 = vpop.permute.xlu0 %2191 }
 0x433   : > { %2277 = vst.msk [vmem:[#allocation4 + $0x58] sm:$0xff] %vm2265_vm7, %v2192_v12  ;;  %3191 = vrot.lane.b32.xlu1 %v3099_v25, %s6687_s28 }
 0x434   : > { %2470 = vst.msk [vmem:[#allocation4 + $0x58] sm:$0xff] %vm2458_vm8, %v2385_v32  ;;  %2613 = vrot.lane.b32.xlu0 %v3098_v19, %s6688_s17 }
 0x435   : > { %v3154_v54 = vpop.permute.xlu1 %3153  ;;  %v3272_v10 = vld [vmem:[#allocation4 + $0x40] sm:$0xff] }
 0x436   : > { %v2961_v50 = vpop.permute.xlu0 %2960  ;;  %6439 = vmatprep.mubr.msk.f32.mxu0 %vm3305_vm13, %v3272_v10 }
 0x437   : > { %3048 = vst.msk [vmem:[#allocation4 + $0x48] sm:$0xff] %vm3038_vm11, %v2961_v50  ;;  %2615 = vrot.lane.b32.xlu1 %v3099_v25, %s6688_s17 }
 0x438   : > { %3241 = vst.msk [vmem:[#allocation4 + $0x48] sm:$0xff] %vm3231_vm12, %v3154_v54  ;;  %2038 = vrot.lane.b32.xlu0 %v3098_v19, %s9838_s15 }
 0x439   : > { %v2001_v58 = vpop.permute.xlu1 %2000 }
 0x43a   : > { %v1808_v45 = vpop.permute.xlu0 %1807 }
 0x43b   : > { %1892 = vst.msk [vmem:[#allocation4 + $0x60] sm:$0xff] %vm1879_vm3, %v1808_v45  ;;  %2617 = vrot.lane.b32.xlu1 %v2522_v42, %s6688_s17  ;;  %v1631_v45 = vld [vmem:[%s9819_s13 + $0x8] sm:$0xff]  ;;  %s9859_s17 = smov 112  }
 0x43c   : > { %2085 = vst.msk [vmem:[#allocation4 + $0x60] sm:$0xff] %vm2072_vm4, %v2001_v58  ;;  %2807 = vrot.lane.b32.xlu0 %v2714_v38, %s6683_s22 }
 0x43d   : > { %v2770_v39 = vpop.permute.xlu1 %2769 }
 0x43e   : > { %v2576_v20 = vpop.permute.xlu0 %2575 }
 0x43f   : > { %2662 = vst.msk [vmem:[#allocation4 + $0x50] sm:$0xff] %vm2651_vm9, %v2576_v20  ;;  %v3273_v21 = vld [vmem:[#allocation4 + $0x48] sm:$0xff]  ;;  %2811 = vrot.lane.b32.xlu1 %v2716_v59, %s6683_s22 }
 0x440   : > { %2856 = vst.msk [vmem:[#allocation4 + $0x50] sm:$0xff] %vm2845_vm10, %v2770_v39  ;;  %2231 = vrot.lane.b32.xlu0 %v2714_v38, %s6684_s24  ;;  %6440 = vmatmul.mubr.msk.f32.gmra.mrb[12].mxu0 %vm3305_vm13, %v3273_v21  ;;  %v6689_v38 = vmov 0  }
 0x441   : > { %v2194_v34 = vpop.permute.xlu1 %2193  ;;  %6647 = vset.pattern.permute.xlu1 %v6689_v38  ;;  %6646 = vset.pattern.permute.xlu0 %v6689_v38 }
 0x442   : > { %2278 = vst.msk [vmem:[#allocation4 + $0x60] sm:$0xff] %vm2265_vm7, %v2194_v34  ;;  %v1810_v36 = vpop.permute.xlu0 %1809 }
 0x443   : > { %1893 = vst.msk [vmem:[#allocation4 + $0x68] sm:$0xff] %vm1879_vm3, %v1810_v36  ;;  %3004 = vrot.lane.b32.xlu1 %v2909_v1, %s6685_s25 }
 0x444   : > { %3000 = vrot.lane.b32.xlu0 %v2907_v40, %s6685_s25 }
 0x445   : > { %v2963_v60 = vpop.permute.xlu1 %2962 }
 0x446   : > { %3049 = vst.msk [vmem:[#allocation4 + $0x50] sm:$0xff] %vm3038_vm11, %v2963_v60  ;;  %v2578_v23 = vpop.permute.xlu0 %2577  ;;  %v3282_v60 = vld [vmem:[#allocation4 + $0x90] sm:$0xff] }
 0x447   : > { %2663 = vst.msk [vmem:[#allocation4 + $0x58] sm:$0xff] %vm2651_vm9, %v2578_v23  ;;  %3197 = vrot.lane.b32.xlu1 %v3102_v15, %s6687_s28 }
 0x448   : > { %2424 = vrot.lane.b32.xlu0 %v2907_v40, %s6686_s27 }
 0x449   : > { %v2387_v22 = vpop.permute.xlu1 %2386 }
 0x44a   : > { %2471 = vst.msk [vmem:[#allocation4 + $0x60] sm:$0xff] %vm2458_vm8, %v2387_v22  ;;  %v2003_v13 = vpop.permute.xlu0 %2002  ;;  %v3283_v22 = vld [vmem:[#allocation4 + $0x98] sm:$0xff] }
 0x44b   : > { %2086 = vst.msk [vmem:[#allocation4 + $0x68] sm:$0xff] %vm2072_vm4, %v2003_v13  ;;  %1640 = vperm.xlu1 %6647, %v1631_v45  }
 0x44c   : > { %3193 = vrot.lane.b32.xlu0 %v2522_v42, %s6687_s28  ;;  %v1630_v42 = vld [vmem:[%s9819_s13] sm:$0xff] }
 0x44d   : > { %v3156_v46 = vpop.permute.xlu1 %3155 }
 0x44e   : > { %3242 = vst.msk [vmem:[#allocation4 + $0x50] sm:$0xff] %vm3231_vm12, %v3156_v46  ;;  %v2772_v29 = vpop.permute.xlu0 %2771  ;;  %v3284_v46 = vld [vmem:[#allocation4 + $0xa0] sm:$0xff] }
 0x44f   : > { %2857 = vst.msk [vmem:[#allocation4 + $0x58] sm:$0xff] %vm2845_vm10, %v2772_v29  ;;  %v3285_v29 = vld [vmem:[#allocation4 + $0xa8] sm:$0xff] }
 0x450   : > { %2809 = vrot.lane.b32.xlu0 %v2715_v26, %s6683_s22 }
 0x451   : > { %v2389_v5 = vpop.permute.xlu1 %2388 }
 0x452   : > { %v2196_v8 = vpop.permute.xlu0 %2195 }
 0x453   : > { %2279 = vst.msk [vmem:[#allocation4 + $0x68] sm:$0xff] %vm2265_vm7, %v2196_v8 }
 0x454   : > { %2472 = vst.msk [vmem:[#allocation4 + $0x68] sm:$0xff] %vm2458_vm8, %v2389_v5  ;;  %3002 = vrot.lane.b32.xlu0 %v2908_v9, %s6685_s25  ;;  %v3286_v9 = vld [vmem:[#allocation4 + $0xb0] sm:$0xff] }
 0x455   : > { %v3158_v56 = vpop.permute.xlu1 %3157  ;;  %v3274_v19 = vld [vmem:[#allocation4 + $0x50] sm:$0xff] }
 0x456   : > { %v2965_v33 = vpop.permute.xlu0 %2964  ;;  %6442 = vmatprep.mubr.msk.f32.mxu0 %vm3305_vm13, %v3274_v19 }
 0x457   : > { %3050 = vst.msk [vmem:[#allocation4 + $0x58] sm:$0xff] %vm3038_vm11, %v2965_v33 }
 0x458   : > { %3243 = vst.msk [vmem:[#allocation4 + $0x58] sm:$0xff] %vm3231_vm12, %v3158_v56  ;;  %3195 = vrot.lane.b32.xlu0 %v3101_v30, %s6687_s28  ;;  %v3287_v56 = vld [vmem:[#allocation4 + $0xb8] sm:$0xff]  ;;  %v3288_v30 = vld [vmem:[#allocation4 + $0xc0] sm:$0xff] }
 0x459   : > { %v2005_v63 = vpop.permute.xlu1 %2004 }
 0x45a   : > { %v1812_v18 = vpop.permute.xlu0 %1811 }
 0x45b   : > { %1894 = vst.msk [vmem:[#allocation4 + $0x70] sm:$0xff] %vm1879_vm3, %v1812_v18 }
 0x45c   : > { %2087 = vst.msk [vmem:[#allocation4 + $0x70] sm:$0xff] %vm2072_vm4, %v2005_v63  ;;  %1635 = vperm.xlu0 %6646, %v1630_v42   ;;  %v3289_v63 = vld [vmem:[#allocation4 + $0xc8] sm:$0xff] }
 0x45d   : > { %v2774_v48 = vpop.permute.xlu1 %2773 }
 0x45e   : > { %v2580_v52 = vpop.permute.xlu0 %2579 }
 0x45f   : > { %2664 = vst.msk [vmem:[#allocation4 + $0x60] sm:$0xff] %vm2651_vm9, %v2580_v52  ;;  %v3275_v3 = vld [vmem:[#allocation4 + $0x58] sm:$0xff] }
 0x460   : > { %2858 = vst.msk [vmem:[#allocation4 + $0x60] sm:$0xff] %vm2845_vm10, %v2774_v48  ;;  %6443 = vmatmul.mubr.msk.f32.gmra.mrb[14].mxu0 %vm3305_vm13, %v3275_v3 }
 0x461   : > { %v2198_v55 = vpop.permute.xlu1 %2197 }
 0x462   : > { %2280 = vst.msk [vmem:[#allocation4 + $0x70] sm:$0xff] %vm2265_vm7, %v2198_v55  ;;  %v1814_v51 = vpop.permute.xlu0 %1813 }
 0x463   : > { %1895 = vst.msk [vmem:[#allocation4 + $0x78] sm:$0xff] %vm1879_vm3, %v1814_v51 }
 0x465   : > { %v2967_v57 = vpop.permute.xlu1 %2966 }
 0x466   : > { %3051 = vst.msk [vmem:[#allocation4 + $0x60] sm:$0xff] %vm3038_vm11, %v2967_v57  ;;  %v2582_v47 = vpop.permute.xlu0 %2581 }
 0x467   : > { %2665 = vst.msk [vmem:[#allocation4 + $0x68] sm:$0xff] %vm2651_vm9, %v2582_v47 }
 0x469   : > { %v2391_v62 = vpop.permute.xlu1 %2390 }
 0x46a   : > { %2473 = vst.msk [vmem:[#allocation4 + $0x70] sm:$0xff] %vm2458_vm8, %v2391_v62  ;;  %v2007_v41 = vpop.permute.xlu0 %2006 }
 0x46b   : > { %2088 = vst.msk [vmem:[#allocation4 + $0x78] sm:$0xff] %vm2072_vm4, %v2007_v41 }
 0x46d   : > { %v3160_v32 = vpop.permute.xlu1 %3159 }
 0x46e   : > { %3244 = vst.msk [vmem:[#allocation4 + $0x60] sm:$0xff] %vm3231_vm12, %v3160_v32  ;;  %v2776_v12 = vpop.permute.xlu0 %2775 }
 0x46f   : > { %2859 = vst.msk [vmem:[#allocation4 + $0x68] sm:$0xff] %vm2845_vm10, %v2776_v12 }
 0x471   : > { %v2393_v25 = vpop.permute.xlu1 %2392 }
 0x472   : > { %v2200_v54 = vpop.permute.xlu0 %2199 }
 0x473   : > { %2281 = vst.msk [vmem:[#allocation4 + $0x78] sm:$0xff] %vm2265_vm7, %v2200_v54 }
 0x474   : > { %2474 = vst.msk [vmem:[#allocation4 + $0x78] sm:$0xff] %vm2458_vm8, %v2393_v25 }
 0x475   : > { %v3162_v10 = vpop.permute.xlu1 %3161  ;;  %v3276_v50 = vld [vmem:[#allocation4 + $0x60] sm:$0xff] }
 0x476   : > { %v2969_v58 = vpop.permute.xlu0 %2968  ;;  %6445 = vmatprep.mubr.msk.f32.mxu0 %vm3305_vm13, %v3276_v50 }
 0x477   : > { %3052 = vst.msk [vmem:[#allocation4 + $0x68] sm:$0xff] %vm3038_vm11, %v2969_v58 }
 0x478   : > { %3245 = vst.msk [vmem:[#allocation4 + $0x68] sm:$0xff] %vm3231_vm12, %v3162_v10 }
 0x479   : > { %v2009_v59 = vpop.permute.xlu1 %2008 }
 0x47a   : > { %v1816_v39 = vpop.permute.xlu0 %1815 }
 0x47b   : > { %1896 = vst.msk [vmem:[#allocation4 + $0x80] sm:$0xff] %vm1879_vm3, %v1816_v39 }
 0x47c   : > { %2089 = vst.msk [vmem:[#allocation4 + $0x80] sm:$0xff] %vm2072_vm4, %v2009_v59 }
 0x47d   : > { %2282 = vst.msk [vmem:[#allocation4 + $0x80] sm:$0xff] %vm2265_vm7, %v7503_v16  ;;  %v2995_v20 = vpop.permute.xlu1 %2994 }
 0x47e   : > { %2475 = vst.msk [vmem:[#allocation4 + $0x80] sm:$0xff] %vm2458_vm8, %v7511_v43  ;;  %v2584_v21 = vpop.permute.xlu0 %2583 }
 0x47f   : > { %3065 = vst.msk [vmem:[#allocation4 + $0xd0] sm:$0xff] %vm3038_vm11, %v2995_v20  ;;  %v3277_v1 = vld [vmem:[#allocation4 + $0x68] sm:$0xff] }
 0x480   : > { %2668 = vst.msk [vmem:[#allocation4 + $0x80] sm:$0xff] %vm2651_vm9, %v7542_v14  ;;  %2666 = vst.msk [vmem:[#allocation4 + $0x70] sm:$0xff] %vm2651_vm9, %v2584_v21  ;;  %6446 = vmatmul.mubr.msk.f32.gmra.mrb[16].mxu0 %vm3305_vm13, %v3277_v1 }
 0x481   : > { %2862 = vst.msk [vmem:[#allocation4 + $0x80] sm:$0xff] %vm2845_vm10, %v7540_v24  ;;  %2860 = vst.msk [vmem:[#allocation4 + $0x70] sm:$0xff] %vm2845_vm10, %v7498_v27  ;;  %v2419_v16 = vpop.permute.xlu1 %2418 }
 0x482   : > { %3055 = vst.msk [vmem:[#allocation4 + $0x80] sm:$0xff] %vm3038_vm11, %v7551_v2  ;;  %3053 = vst.msk [vmem:[#allocation4 + $0x70] sm:$0xff] %vm3038_vm11, %v7507_v17  ;;  %v1818_v43 = vpop.permute.xlu0 %1817 }
 0x483   : > { %3248 = vst.msk [vmem:[#allocation4 + $0x80] sm:$0xff] %vm3231_vm12, %v7562_v49  ;;  %3246 = vst.msk [vmem:[#allocation4 + $0x70] sm:$0xff] %vm3231_vm12, %v7516_v7 }
 0x484   : > { %2487 = vst.msk [vmem:[#allocation4 + $0xe0] sm:$0xff] %vm2458_vm8, %v2419_v16 }
 0x485   : > { %1897 = vst.msk [vmem:[#allocation4 + $0x88] sm:$0xff] %vm1879_vm3, %v1818_v43  ;;  %v3188_v27 = vpop.permute.xlu1 %3187 }
 0x486   : > { %3258 = vst.msk [vmem:[#allocation4 + $0xd0] sm:$0xff] %vm3231_vm12, %v3188_v27  ;;  %v2586_v24 = vpop.permute.xlu0 %2585 }
 0x487   : > { %2667 = vst.msk [vmem:[#allocation4 + $0x78] sm:$0xff] %vm2651_vm9, %v2586_v24 }
 0x488   : > { %2861 = vst.msk [vmem:[#allocation4 + $0x78] sm:$0xff] %vm2845_vm10, %v7518_v44 }
 0x489   : > { %3054 = vst.msk [vmem:[#allocation4 + $0x78] sm:$0xff] %vm3038_vm11, %v7531_v28  ;;  %v2421_v17 = vpop.permute.xlu1 %2420 }
 0x48a   : > { %v3278_v14 = vld [vmem:[#allocation4 + $0x70] sm:$0xff]  ;;  %3247 = vst.msk [vmem:[#allocation4 + $0x78] sm:$0xff] %vm3231_vm12, %v7529_v37  ;;  %v2011_v7 = vpop.permute.xlu0 %2010  ;;  %v3280_v2 = vld [vmem:[#allocation4 + $0x80] sm:$0xff] }
 0x48b   : > { %6448 = vmatprep.mubr.msk.f32.mxu0 %vm3305_vm13, %v3278_v14  ;;  %2090 = vst.msk [vmem:[#allocation4 + $0x88] sm:$0xff] %vm2072_vm4, %v2011_v7 }
 0x48c   : > { %2283 = vst.msk [vmem:[#allocation4 + $0x88] sm:$0xff] %vm2265_vm7, %v7525_v35 }
 0x48d   : > { %2476 = vst.msk [vmem:[#allocation4 + $0x88] sm:$0xff] %vm2458_vm8, %v7523_v61  ;;  %v3190_v44 = vpop.permute.xlu1 %3189  ;;  %v3290_v48 = vld [vmem:[#allocation4 + $0xd0] sm:$0xff] }
 0x48e   : > { %2669 = vst.msk [vmem:[#allocation4 + $0x88] sm:$0xff] %vm2651_vm9, %v7553_v4  ;;  %v2804_v28 = vpop.permute.xlu0 %2803 }
 0x48f   : > { %2863 = vst.msk [vmem:[#allocation4 + $0x88] sm:$0xff] %vm2845_vm10, %v7564_v53  ;;  %2873 = vst.msk [vmem:[#allocation4 + $0xd8] sm:$0xff] %vm2845_vm10, %v2804_v28 }
 0x490   : > { %3056 = vst.msk [vmem:[#allocation4 + $0x88] sm:$0xff] %vm3038_vm11, %v7575_v6 }
 0x491   : > { %3249 = vst.msk [vmem:[#allocation4 + $0x88] sm:$0xff] %vm3231_vm12, %v7573_v0  ;;  %v2037_v35 = vpop.permute.xlu1 %2036  ;;  %v3279_v37 = vld [vmem:[#allocation4 + $0x78] sm:$0xff] }
 0x492   : > { %6449 = vmatmul.mubr.msk.f32.gmra.mrb[18].mxu0 %vm3305_vm13, %v3279_v37  ;;  %v2228_v61 = vpop.permute.xlu0 %2227 }
 0x493   : > { %2295 = vst.msk [vmem:[#allocation4 + $0xe8] sm:$0xff] %vm2265_vm7, %v2228_v61  ;;  %v8188_v4 = vpop.f32.mrb[4].mxu0  ;;  %6451 = vmatprep.mubr.msk.f32.mxu0 %vm3305_vm13, %v3280_v2 }
 0x494   : > { %2488 = vst.msk [vmem:[#allocation4 + $0xe8] sm:$0xff] %vm2458_vm8, %v2421_v17  ;;  %v3628_v49 = vsel %vm541_vm14, %v8188_v4, 0.0  ;;  %v8194_v53 = vpop.f32.mrb[5].mxu0 }
 0x495   : > { %v3627_v0 = vsel %vm541_vm14, %v8194_v53, 0.0  ;;  %v2806_v6 = vpop.permute.xlu1 %2805 }
 0x496   : > { %v3629_v34 = vadd.f32 %v3628_v49, %v3627_v0  ;;  %v2997_v36 = vpop.permute.xlu0 %2996  ;;  %v8266_v49 = vld [vmem:[%s9818_s12] ss:$0 sm:$0xff] }
 0x497   : > { %3066 = vst.msk [vmem:[#allocation4 + $0xd8] sm:$0xff] %vm3038_vm11, %v2997_v36  ;;  %v6690_v36 = vmov 0.0|0.0  }
 0x498   : > { %3259 = vst.msk [vmem:[#allocation4 + $0xd8] sm:$0xff] %vm3231_vm12, %v3190_v44  ;;  %v3281_v40 = vld [vmem:[#allocation4 + $0x88] sm:$0xff]  ;;  %6513 = vmatprep.subr.bf16.mxu0 %v6690_v36 }
 0x499   : > { %6452 = vmatmul.mubr.msk.f32.gmra.mrb[20].mxu0 %vm3305_vm13, %v3281_v40  ;;  %v2230_v15 = vpop.permute.xlu1 %2229  ;;  %v6691_v40 = vmov 1.0|1.0  }
 0x49a   : > { %6454 = vmatprep.mubr.msk.f32.mxu0 %vm3305_vm13, %v3282_v60  ;;  %v1844_v23 = vpop.permute.xlu0 %1843 }
 0x49b   : > { %1910 = vst.msk [vmem:[#allocation4 + $0xf0] sm:$0xff] %vm1879_vm3, %v1844_v23 }
 0x49c   : > { %2103 = vst.msk [vmem:[#allocation4 + $0xf0] sm:$0xff] %vm2072_vm4, %v2037_v35 }
 0x49d   : > { %2296 = vst.msk [vmem:[#allocation4 + $0xf0] sm:$0xff] %vm2265_vm7, %v2230_v15  ;;  %6455 = vmatmul.mubr.msk.f32.gmra.mrb[22].mxu0 %vm3305_vm13, %v3283_v22  ;;  %v2999_v13 = vpop.permute.xlu1 %2998 }
 0x49e   : > { %6457 = vmatprep.mubr.msk.f32.mxu0 %vm3305_vm13, %v3284_v46  ;;  %v2612_v26 = vpop.permute.xlu0 %2611 }
 0x49f   : > { %2680 = vst.msk [vmem:[#allocation4 + $0xe0] sm:$0xff] %vm2651_vm9, %v2612_v26  ;;  %v3291_v3 = vld [vmem:[#allocation4 + $0xd8] sm:$0xff] }
 0x4a0   : > { %2874 = vst.msk [vmem:[#allocation4 + $0xe0] sm:$0xff] %vm2845_vm10, %v2806_v6 }
 0x4a1   : > { %3067 = vst.msk [vmem:[#allocation4 + $0xe0] sm:$0xff] %vm3038_vm11, %v2999_v13  ;;  %6458 = vmatmul.mubr.msk.f32.gmra.mrb[24].mxu0 %vm3305_vm13, %v3285_v29  ;;  %v2423_v5 = vpop.permute.xlu1 %2422 }
 0x4a2   : > { %2489 = vst.msk [vmem:[#allocation4 + $0xf0] sm:$0xff] %vm2458_vm8, %v2423_v5  ;;  %6460 = vmatprep.mubr.msk.f32.mxu0 %vm3305_vm13, %v3286_v9  ;;  %v1846_v8 = vpop.permute.xlu0 %1845 }
 0x4a3   : > { %1911 = vst.msk [vmem:[#allocation4 + $0xf8] sm:$0xff] %vm1879_vm3, %v1846_v8  ;;  %vm6692_vm3 = vmmov 0  }
 0x4a5   : > { %6461 = vmatmul.mubr.msk.f32.gmra.mrb[26].mxu0 %vm3305_vm13, %v3287_v56  ;;  %v3192_v19 = vpop.permute.xlu1 %3191 }
 0x4a6   : > { %3260 = vst.msk [vmem:[#allocation4 + $0xe0] sm:$0xff] %vm3231_vm12, %v3192_v19  ;;  %6463 = vmatprep.mubr.msk.f32.mxu0 %vm3305_vm13, %v3288_v30  ;;  %v2614_v33 = vpop.permute.xlu0 %2613 }
 0x4a7   : > { %2681 = vst.msk [vmem:[#allocation4 + $0xe8] sm:$0xff] %vm2651_vm9, %v2614_v33 }
 0x4a9   : > { %6464 = vmatmul.mubr.msk.f32.gmra.mrb[28].mxu0 %vm3305_vm13, %v3289_v63  ;;  %v2616_v18 = vpop.permute.xlu1 %2615 }
 0x4aa   : > { %2682 = vst.msk [vmem:[#allocation4 + $0xf0] sm:$0xff] %vm2651_vm9, %v2616_v18  ;;  %6466 = vmatprep.mubr.msk.f32.mxu0 %vm3305_vm13, %v3290_v48  ;;  %v2039_v52 = vpop.permute.xlu0 %2038 }
 0x4ab   : > { %2104 = vst.msk [vmem:[#allocation4 + $0xf8] sm:$0xff] %vm2072_vm4, %v2039_v52 }
 0x4ad   : > { %6467 = vmatmul.mubr.msk.f32.gmra.mrb[30].mxu0 %vm3305_vm13, %v3291_v3  ;;  %v2618_v55 = vpop.permute.xlu1 %2617  ;;  %v3292_v51 = vld [vmem:[#allocation4 + $0xe0] sm:$0xff] }
 0x4ae   : > { %v2808_v57 = vpop.permute.xlu0 %2807  ;;  %6469 = vmatprep.mubr.msk.f32.mxu0 %vm3305_vm13, %v3292_v51 }
 0x4af   : > { %2875 = vst.msk [vmem:[#allocation4 + $0xe8] sm:$0xff] %vm2845_vm10, %v2808_v57 }
 0x4b1   : > { %v2812_v47 = vpop.permute.xlu1 %2811 }
 0x4b2   : > { %v2232_v62 = vpop.permute.xlu0 %2231 }
 0x4b3   : > { %2297 = vst.msk [vmem:[#allocation4 + $0xf8] sm:$0xff] %vm2265_vm7, %v2232_v62  ;;  %v8226_v41 = vpop.f32.mrb[6].mxu0 }
 0x4b4   : > { %v8228_v32 = vpop.f32.mrb[7].mxu0  ;;  %v3632_v50 = vsel %vm541_vm14, %v8226_v41, 0.0 }
 0x4b5   : > { %v3630_v12 = vsel %vm541_vm14, %v8228_v32, 0.0  ;;  %v3005_v10 = vpop.permute.xlu1 %3004 }
 0x4b6   : > { %v3631_v25 = vadd.f32 %v3630_v12, %v3629_v34  ;;  %v3001_v54 = vpop.permute.xlu0 %3000 }
 0x4b7   : > { %3068 = vst.msk [vmem:[#allocation4 + $0xe8] sm:$0xff] %vm3038_vm11, %v3001_v54 }
 0x4b8   : > { %v3633_v58 = vadd.f32 %v3632_v50, %v3631_v25 }
 0x4b9   : > { %v3198_v42 = vpop.permute.xlu1 %3197 }
 0x4ba   : > { %v2425_v45 = vpop.permute.xlu0 %2424 }
 0x4bb   : > { %2490 = vst.msk [vmem:[#allocation4 + $0xf8] sm:$0xff] %vm2458_vm8, %v2425_v45 }
 0x4bc   : > { %2683 = vst.msk [vmem:[#allocation4 + $0xf8] sm:$0xff] %vm2651_vm9, %v2618_v55 }
 0x4bd   : > { %2877 = vst.msk [vmem:[#allocation4 + $0xf8] sm:$0xff] %vm2845_vm10, %v2812_v47 }
 0x4be   : > { %v3194_v38 = vpop.permute.xlu0 %3193  ;;  %3070 = vst.msk [vmem:[#allocation4 + $0xf8] sm:$0xff] %vm3038_vm11, %v3005_v10 }
 0x4bf   : > { %3261 = vst.msk [vmem:[#allocation4 + $0xe8] sm:$0xff] %vm3231_vm12, %v3194_v38  ;;  %3263 = vst.msk [vmem:[#allocation4 + $0xf8] sm:$0xff] %vm3231_vm12, %v3198_v42 }
 0x4c2   : > { %v2810_v59 = vpop.permute.xlu0 %2809 }
 0x4c3   : > { %2876 = vst.msk [vmem:[#allocation4 + $0xf0] sm:$0xff] %vm2845_vm10, %v2810_v59 }
 0x4c6   : > { %v3003_v39 = vpop.permute.xlu0 %3002  ;;  %v3293_v20 = vld [vmem:[#allocation4 + $0xe8] sm:$0xff]  ;;  %v3295_v1 = vld [vmem:[#allocation4 + $0xf8] sm:$0xff] }
 0x4c7   : > { %3069 = vst.msk [vmem:[#allocation4 + $0xf0] sm:$0xff] %vm3038_vm11, %v3003_v39  ;;  %6470 = vmatmul.mubr.msk.f32.gmra.mrb[32].mxu0 %vm3305_vm13, %v3293_v20 }
 0x4ca   : > { %v3196_v21 = vpop.permute.xlu0 %3195  ;;  %v8268_v0 = vpop.permute.xlu1 %1640 }
 0x4cb   : > { %3262 = vst.msk [vmem:[#allocation4 + $0xf0] sm:$0xff] %vm3231_vm12, %v3196_v21  ;;  %vm9830_vm0 = vcmp.eq.f32.partialorder %v8268_v0, %v8266_v49 }
 0x4d2   : > { %v3294_v16 = vld [vmem:[#allocation4 + $0xf0] sm:$0xff] }
 0x4d3   : > { %v8245_v43 = vpop.f32.mrb[8].mxu0  ;;  %6472 = vmatprep.mubr.msk.f32.mxu0 %vm3305_vm13, %v3294_v16 }
 0x4d4   : > { %v8248_v27 = vpop.f32.mrb[9].mxu0  ;;  %6473 = vmatmul.mubr.msk.f32.gmra.mrb[34].mxu0 %vm3305_vm13, %v3295_v1  ;;  %v3636_v14 = vsel %vm541_vm14, %v8245_v43, 0.0 }
 0x4d5   : > { %v3634_v24 = vsel %vm541_vm14, %v8248_v27, 0.0  ;;  %6479 = vmatprep.mubr.msk.f32.mxu0 %vm6692_vm3, %v9832_v11 }
 0x4d6   : > { %v3635_v17 = vadd.f32 %v3634_v24, %v3633_v58 }
 0x4d8   : > { %v3637_v7 = vadd.f32 %v3636_v14, %v3635_v17 }
 0x4db   : > { %v8272_v6 = vpop.permute.xlu0 %1635 }
 0x4dc   : > { %vm9831_vm1 = vcmp.eq.f32.partialorder %v8272_v6, %v8266_v49 }
 0x4dd   : > { %vm8282_vm2 = vmpackc.low %vm9830_vm0, %vm9831_vm1 }
 0x4de   : > { %6515 = vmatpush3.bf16.msk.msra.mxu0 %vm8282_vm2, %v6691_v40 }
 0x4df   : > { %6516 = vmatprep.subr.bf16.mxu0 %v6690_v36 }
 0x4f3   : > { %v8255_v44 = vpop.f32.mrb[10].mxu0 }
 0x4f4   : > { %v8257_v28 = vpop.f32.mrb[11].mxu0  ;;  %v3640_v61 = vsel %vm541_vm14, %v8255_v44, 0.0 }
 0x4f5   : > { %v3638_v35 = vsel %vm541_vm14, %v8257_v28, 0.0 }
 0x4f6   : > { %v3639_v37 = vadd.f32 %v3638_v35, %v3637_v7 }
 0x4f8   : > { %v3641_v2 = vadd.f32 %v3640_v61, %v3639_v37 }
 0x513   : > { %v8289_v15 = vpop.f32.mrb[12].mxu0 }
 0x514   : > { %v8291_v60 = vpop.f32.mrb[13].mxu0  ;;  %v3644_v13 = vsel %vm541_vm14, %v8289_v15, 0.0 }
 0x515   : > { %v3642_v23 = vsel %vm541_vm14, %v8291_v60, 0.0 }
 0x516   : > { %v3643_v22 = vadd.f32 %v3642_v23, %v3641_v2 }
 0x518   : > { %v3645_v46 = vadd.f32 %v3644_v13, %v3643_v22 }
 0x533   : > { %v8297_v26 = vpop.f32.mrb[14].mxu0 }
 0x534   : > { %v8299_v29 = vpop.f32.mrb[15].mxu0  ;;  %v3648_v8 = vsel %vm541_vm14, %v8297_v26, 0.0 }
 0x535   : > { %v3646_v5 = vsel %vm541_vm14, %v8299_v29, 0.0 }
 0x536   : > { %v3647_v9 = vadd.f32 %v3646_v5, %v3645_v46 }
 0x538   : > { %v3649_v56 = vadd.f32 %v3648_v8, %v3647_v9 }
 0x553   : > { %v8307_v19 = vpop.f32.mrb[16].mxu0 }
 0x554   : > { %v8309_v30 = vpop.f32.mrb[17].mxu0  ;;  %v3652_v18 = vsel %vm541_vm14, %v8307_v19, 0.0 }
 0x555   : > { %v3650_v33 = vsel %vm541_vm14, %v8309_v30, 0.0 }
 0x556   : > { %v3651_v63 = vadd.f32 %v3650_v33, %v3649_v56 }
 0x558   : > { %v3653_v48 = vadd.f32 %v3652_v18, %v3651_v63 }
 0x565   : > { %v8315_v52 = vpop.f32.mrb[18].mxu0 }
 0x566   : > { %v8317_v3 = vpop.f32.mrb[19].mxu0  ;;  %v3656_v57 = vsel %vm541_vm14, %v8315_v52, 0.0 }
 0x567   : > { %v3654_v55 = vsel %vm541_vm14, %v8317_v3, 0.0 }
 0x568   : > { %v3655_v51 = vadd.f32 %v3654_v55, %v3653_v48 }
 0x56a   : > { %v3657_v47 = vadd.f32 %v3656_v57, %v3655_v51 }
 0x56c   : > { %v8323_v62 = vpop.f32.mrb[20].mxu0 }
 0x56d   : > { %v8325_v12 = vpop.f32.mrb[21].mxu0  ;;  %v3660_v10 = vsel %vm541_vm14, %v8323_v62, 0.0 }
 0x56e   : > { %v3658_v25 = vsel %vm541_vm14, %v8325_v12, 0.0 }
 0x56f   : > { %v3659_v54 = vadd.f32 %v3658_v25, %v3657_v47 }
 0x570   : > { %v8331_v50 = vpop.f32.mrb[22].mxu0 }
 0x571   : > { %v8333_v58 = vpop.f32.mrb[23].mxu0  ;;  %v3661_v45 = vadd.f32 %v3660_v10, %v3659_v54  ;;  %v3664_v59 = vsel %vm541_vm14, %v8331_v50, 0.0 }
 0x572   : > { %v3662_v42 = vsel %vm541_vm14, %v8333_v58, 0.0 }
 0x573   : > { %v3663_v38 = vadd.f32 %v3662_v42, %v3661_v45 }
 0x574   : > { %v8339_v39 = vpop.f32.mrb[24].mxu0 }
 0x575   : > { %v8341_v20 = vpop.f32.mrb[25].mxu0  ;;  %v3665_v21 = vadd.f32 %v3664_v59, %v3663_v38  ;;  %v3668_v24 = vsel %vm541_vm14, %v8339_v39, 0.0 }
 0x576   : > { %v3666_v1 = vsel %vm541_vm14, %v8341_v20, 0.0 }
 0x577   : > { %v3667_v16 = vadd.f32 %v3666_v1, %v3665_v21 }
 0x578   : > { %v8347_v17 = vpop.f32.mrb[26].mxu0 }
 0x579   : > { %v8349_v14 = vpop.f32.mrb[27].mxu0  ;;  %v3669_v7 = vadd.f32 %v3668_v24, %v3667_v16  ;;  %v3672_v61 = vsel %vm541_vm14, %v8347_v17, 0.0 }
 0x57a   : > { %v3670_v35 = vsel %vm541_vm14, %v8349_v14, 0.0 }
 0x57b   : > { %v3671_v37 = vadd.f32 %v3670_v35, %v3669_v7 }
 0x57c   : > { %v8355_v2 = vpop.f32.mrb[28].mxu0 }
 0x57d   : > { %v8357_v36 = vpop.f32.mrb[29].mxu0  ;;  %v3673_v23 = vadd.f32 %v3672_v61, %v3671_v37  ;;  %v3676_v46 = vsel %vm541_vm14, %v8355_v2, 0.0  ;;  %v3769_v61 = vld [vmem:[%s9811_s5] sm:$0x1] }
 0x57e   : > { %v3674_v22 = vsel %vm541_vm14, %v8357_v36, 0.0 }
 0x57f   : > { %v3675_v13 = vadd.f32 %v3674_v22, %v3673_v23  ;;  %v3775_v22 = vsub.s32 0, %v7098_v31 }
 0x580   : > { %v6468_v5 = vpop.f32.mrb[30].mxu0 }
 0x581   : > { %v3598_v9 = vpop.f32.mrb[31].mxu0  ;;  %v3677_v8 = vadd.f32 %v3676_v46, %v3675_v13  ;;  %v3680_v63 = vsel %vm541_vm14, %v6468_v5, 0.0 }
 0x582   : > { %v3678_v56 = vsel %vm541_vm14, %v3598_v9, 0.0 }
 0x583   : > { %v3679_v33 = vadd.f32 %v3678_v56, %v3677_v8 }
 0x585   : > { %v3681_v18 = vadd.f32 %v3680_v63, %v3679_v33 }
 0x59a   : > { %v6471_v48 = vpop.f32.mrb[32].mxu0 }
 0x59b   : > { %v3608_v55 = vpop.f32.mrb[33].mxu0  ;;  %v3684_v47 = vsel %vm541_vm14, %v6471_v48, 0.0 }
 0x59c   : > { %v3682_v51 = vsel %vm541_vm14, %v3608_v55, 0.0 }
 0x59d   : > { %v3683_v57 = vadd.f32 %v3682_v51, %v3681_v18 }
 0x59f   : > { %v3685_v25 = vadd.f32 %v3684_v47, %v3683_v57 }
 0x5a7   : > { %v6474_v54 = vpop.f32.mrb[34].mxu0 }
 0x5a8   : > { %v3618_v10 = vpop.f32.mrb[35].mxu0  ;;  %v3688_v38 = vsel %vm541_vm14, %v6474_v54, 0.0 }
 0x5a9   : > { %v3686_v45 = vsel %vm541_vm14, %v3618_v10, 0.0 }
 0x5aa   : > { %v3687_v42 = vadd.f32 %v3686_v45, %v3685_v25 }
 0x5ac   : > { %v3689_v59 = vadd.f32 %v3688_v38, %v3687_v42 }
 0x5ae   : > { %v3690_v21 = vrot.slane %v3689_v59, 4 }
 0x5b0   : > { %v3691_v1 = vadd.f32 %v3690_v21, %v3689_v59 }
 0x5b2   : > { %v3692_v16 = vrot.slane %v3691_v1, 2 }
 0x5b4   : > { %v3693_v24 = vadd.f32 %v3692_v16, %v3691_v1 }
 0x5b6   : > { %v3694_v7 = vrot.slane %v3693_v24, 1 }
 0x5b8   : > { %v3695_v35 = vadd.f32 %v3694_v7, %v3693_v24 }
 0x5ba   : > { %6480 = vmatmul.mubr.msk.f32.vlgmr.msra.gmra.mrb[36].mxu0 %vm541_vm14, %v3695_v35 }
 0x5bb   : > { %6518 = vmatpush3.bf16.msk.msra.mxu0 %vm8282_vm2, %v6691_v40  ;;  %6486 = vmatprep.mubr.msk.f32.mxu0 %vm6692_vm3, %v9832_v11 }
 0x68d   : > { %v3765_v37 = vpop.f32.mrb[36].mxu0 }
 0x68e   : > { %v3770_v23 = vmul.f32 0.001953125, %v3765_v37  ;;  %v6481_v13 = vpop.f32.mrb[37].mxu0 }
 0x690   : > { %v3771_v46 = vsub.f32 %v3769_v61, %v3770_v23 }
 0x692   : > { %v3776_v8 = vrot.slane %v3771_v46, %v3775_v22 }
 0x694   : > { %v8382_v56 = vadd.f32 %v3776_v8, %v8194_v53  ;;  %v8385_v34 = vadd.f32 %v8188_v4, %v3776_v8  ;;  %v8388_v40 = vadd.f32 %v3776_v8, %v8228_v32  ;;  %v8391_v33 = vadd.f32 %v8226_v41, %v3776_v8 }
 0x695   : > { %v8394_v63 = vadd.f32 %v3776_v8, %v8248_v27  ;;  %v8397_v18 = vadd.f32 %v8245_v43, %v3776_v8  ;;  %v8400_v51 = vadd.f32 %v3776_v8, %v8257_v28  ;;  %v8403_v53 = vadd.f32 %v8255_v44, %v3776_v8 }
 0x696   : > { %v8406_v4 = vadd.f32 %v3776_v8, %v8291_v60  ;;  %v8409_v32 = vadd.f32 %v8289_v15, %v3776_v8  ;;  %v8412_v41 = vadd.f32 %v3776_v8, %v8299_v29  ;;  %v8415_v27 = vadd.f32 %v8297_v26, %v3776_v8 }
 0x697   : > { %v8418_v43 = vadd.f32 %v3776_v8, %v8309_v30  ;;  %v8421_v28 = vadd.f32 %v8307_v19, %v3776_v8  ;;  %v8424_v44 = vadd.f32 %v3776_v8, %v8317_v3  ;;  %v8427_v60 = vadd.f32 %v8315_v52, %v3776_v8 }
 0x698   : > { %v8430_v15 = vadd.f32 %v3776_v8, %v8325_v12  ;;  %v8433_v29 = vadd.f32 %v8323_v62, %v3776_v8  ;;  %v8436_v26 = vadd.f32 %v3776_v8, %v8333_v58  ;;  %v8439_v30 = vadd.f32 %v8331_v50, %v3776_v8 }
 0x699   : > { %v8442_v19 = vadd.f32 %v3776_v8, %v8341_v20  ;;  %v8445_v3 = vadd.f32 %v8339_v39, %v3776_v8  ;;  %v8448_v52 = vadd.f32 %v3776_v8, %v8349_v14  ;;  %v8451_v12 = vadd.f32 %v8347_v17, %v3776_v8 }
 0x69a   : > { %v8454_v62 = vadd.f32 %v3776_v8, %v8357_v36  ;;  %v8457_v58 = vadd.f32 %v8355_v2, %v3776_v8  ;;  %v8459_v50 = vadd.f32 %v3776_v8, %v3598_v9  ;;  %v8461_v57 = vadd.f32 %v6468_v5, %v3776_v8 }
 0x69b   : > { %v8463_v20 = vadd.f32 %v3776_v8, %v3608_v55  ;;  %v8465_v39 = vadd.f32 %v6471_v48, %v3776_v8  ;;  %v8467_v47 = vadd.f32 %v3776_v8, %v3618_v10  ;;  %v8469_v14 = vadd.f32 %v6474_v54, %v3776_v8 }
 0x69c   : > { %v3810_v17 = vmul.f32 %v8382_v56, %v8382_v56  ;;  %v3811_v36 = vmul.f32 %v8385_v34, %v8385_v34  ;;  %v3812_v2 = vmul.f32 %v8388_v40, %v8388_v40  ;;  %v3813_v5 = vmul.f32 %v8391_v33, %v8391_v33 }
 0x69d   : > { %v3814_v25 = vmul.f32 %v8394_v63, %v8394_v63  ;;  %v3815_v45 = vmul.f32 %v8397_v18, %v8397_v18  ;;  %v3816_v59 = vmul.f32 %v8400_v51, %v8400_v51  ;;  %v3817_v16 = vmul.f32 %v8403_v53, %v8403_v53 }
 0x69e   : > { %v3842_v9 = vsel %vm541_vm14, %v3810_v17, 0.0  ;;  %v3843_v48 = vsel %vm541_vm14, %v3811_v36, 0.0  ;;  %v3845_v54 = vsel %vm541_vm14, %v3812_v2, 0.0  ;;  %v3847_v42 = vsel %vm541_vm14, %v3813_v5, 0.0 }
 0x69f   : > { %v3844_v55 = vadd.f32 %v3843_v48, %v3842_v9  ;;  %v3849_v21 = vsel %vm541_vm14, %v3814_v25, 0.0  ;;  %v3851_v24 = vsel %vm541_vm14, %v3815_v45, 0.0  ;;  %v3818_v35 = vmul.f32 %v8406_v4, %v8406_v4 }
 0x6a0   : > { %v3853_v37 = vsel %vm541_vm14, %v3816_v59, 0.0  ;;  %v3819_v23 = vmul.f32 %v8409_v32, %v8409_v32  ;;  %v3855_v13 = vsel %vm541_vm14, %v3817_v16, 0.0  ;;  %v3820_v8 = vmul.f32 %v8412_v41, %v8412_v41 }
 0x6a1   : > { %v3846_v10 = vadd.f32 %v3845_v54, %v3844_v55  ;;  %v3857_v17 = vsel %vm541_vm14, %v3818_v35, 0.0  ;;  %v3821_v2 = vmul.f32 %v8415_v27, %v8415_v27  ;;  %v3822_v48 = vmul.f32 %v8418_v43, %v8418_v43 }
 0x6a2   : > { %v3859_v5 = vsel %vm541_vm14, %v3819_v23, 0.0  ;;  %v3861_v55 = vsel %vm541_vm14, %v3820_v8, 0.0  ;;  %v3823_v54 = vmul.f32 %v8421_v28, %v8421_v28 }
 0x6a3   : > { %v3848_v38 = vadd.f32 %v3847_v42, %v3846_v10  ;;  %v3863_v10 = vsel %vm541_vm14, %v3821_v2, 0.0  ;;  %v3824_v42 = vmul.f32 %v8424_v44, %v8424_v44 }
 0x6a5   : > { %v3850_v1 = vadd.f32 %v3849_v21, %v3848_v38  ;;  %v3865_v38 = vsel %vm541_vm14, %v3822_v48, 0.0  ;;  %v3825_v21 = vmul.f32 %v8427_v60, %v8427_v60 }
 0x6a7   : > { %v3852_v7 = vadd.f32 %v3851_v24, %v3850_v1  ;;  %v3867_v1 = vsel %vm541_vm14, %v3823_v54, 0.0  ;;  %v3826_v24 = vmul.f32 %v8430_v15, %v8430_v15 }
 0x6a9   : > { %v3854_v61 = vadd.f32 %v3853_v37, %v3852_v7  ;;  %v3869_v7 = vsel %vm541_vm14, %v3824_v42, 0.0  ;;  %v3827_v37 = vmul.f32 %v8433_v29, %v8433_v29 }
 0x6ab   : > { %v3856_v46 = vadd.f32 %v3855_v13, %v3854_v61  ;;  %v3871_v61 = vsel %vm541_vm14, %v3825_v21, 0.0  ;;  %v3828_v13 = vmul.f32 %v8436_v26, %v8436_v26 }
 0x6ad   : > { %v3858_v36 = vadd.f32 %v3857_v17, %v3856_v46  ;;  %v3873_v46 = vsel %vm541_vm14, %v3826_v24, 0.0  ;;  %v3829_v17 = vmul.f32 %v8439_v30, %v8439_v30 }
 0x6af   : > { %v3860_v9 = vadd.f32 %v3859_v5, %v3858_v36  ;;  %v3875_v36 = vsel %vm541_vm14, %v3827_v37, 0.0  ;;  %v3830_v5 = vmul.f32 %v8442_v19, %v8442_v19 }
 0x6b1   : > { %v3862_v25 = vadd.f32 %v3861_v55, %v3860_v9  ;;  %v3877_v9 = vsel %vm541_vm14, %v3828_v13, 0.0  ;;  %v3831_v55 = vmul.f32 %v8445_v3, %v8445_v3 }
 0x6b3   : > { %v3864_v45 = vadd.f32 %v3863_v10, %v3862_v25  ;;  %v3879_v25 = vsel %vm541_vm14, %v3829_v17, 0.0  ;;  %v3832_v10 = vmul.f32 %v8448_v52, %v8448_v52 }
 0x6b5   : > { %v3866_v59 = vadd.f32 %v3865_v38, %v3864_v45  ;;  %v3881_v45 = vsel %vm541_vm14, %v3830_v5, 0.0  ;;  %v3833_v38 = vmul.f32 %v8451_v12, %v8451_v12 }
 0x6b7   : > { %v3868_v16 = vadd.f32 %v3867_v1, %v3866_v59  ;;  %v3883_v59 = vsel %vm541_vm14, %v3831_v55, 0.0  ;;  %v3834_v1 = vmul.f32 %v8454_v62, %v8454_v62 }
 0x6b9   : > { %v3870_v35 = vadd.f32 %v3869_v7, %v3868_v16  ;;  %v3885_v16 = vsel %vm541_vm14, %v3832_v10, 0.0  ;;  %v3835_v7 = vmul.f32 %v8457_v58, %v8457_v58 }
 0x6bb   : > { %v3872_v23 = vadd.f32 %v3871_v61, %v3870_v35  ;;  %v3887_v35 = vsel %vm541_vm14, %v3833_v38, 0.0  ;;  %v3836_v61 = vmul.f32 %v8459_v50, %v8459_v50 }
 0x6bd   : > { %v3874_v8 = vadd.f32 %v3873_v46, %v3872_v23  ;;  %v3889_v23 = vsel %vm541_vm14, %v3834_v1, 0.0  ;;  %v3837_v46 = vmul.f32 %v8461_v57, %v8461_v57 }
 0x6bf   : > { %v3876_v2 = vadd.f32 %v3875_v36, %v3874_v8  ;;  %v3891_v8 = vsel %vm541_vm14, %v3835_v7, 0.0  ;;  %v3838_v36 = vmul.f32 %v8463_v20, %v8463_v20 }
 0x6c1   : > { %v3878_v48 = vadd.f32 %v3877_v9, %v3876_v2  ;;  %v3893_v2 = vsel %vm541_vm14, %v3836_v61, 0.0  ;;  %v3839_v9 = vmul.f32 %v8465_v39, %v8465_v39 }
 0x6c3   : > { %v3880_v54 = vadd.f32 %v3879_v25, %v3878_v48  ;;  %v3895_v48 = vsel %vm541_vm14, %v3837_v46, 0.0  ;;  %v3840_v25 = vmul.f32 %v8467_v47, %v8467_v47  ;;  %v4258_v46 = vld [vmem:[#allocation3 + $0x9] sm:$0xff] }
 0x6c4   : > { %4323 = vrot.lane.b32.xlu0 %v4258_v46, %s9838_s15 }
 0x6c5   : > { %v3882_v42 = vadd.f32 %v3881_v45, %v3880_v54  ;;  %v3897_v54 = vsel %vm541_vm14, %v3838_v36, 0.0  ;;  %v3841_v45 = vmul.f32 %v8469_v14, %v8469_v14  ;;  %v5253_v36 = vld [vmem:[#allocation3 + $0x198] sm:$0xff] }
 0x6c7   : > { %v3884_v21 = vadd.f32 %v3883_v59, %v3882_v42  ;;  %v3899_v42 = vsel %vm541_vm14, %v3839_v9, 0.0  ;;  %v3901_v59 = vsel %vm541_vm14, %v3840_v25, 0.0  ;;  %v3903_v1 = vsel %vm541_vm14, %v3841_v45, 0.0 }
 0x6c9   : > { %v3886_v24 = vadd.f32 %v3885_v16, %v3884_v21 }
 0x6cb   : > { %v3888_v37 = vadd.f32 %v3887_v35, %v3886_v24 }
 0x6cd   : > { %v3890_v13 = vadd.f32 %v3889_v23, %v3888_v37 }
 0x6cf   : > { %v3892_v17 = vadd.f32 %v3891_v8, %v3890_v13  ;;  %v4257_v13 = vld [vmem:[#allocation3 + $0x1] sm:$0xff] }
 0x6d0   : > { %4321 = vrot.lane.b32.xlu1 %v4257_v13, %s9838_s15  ;;  %v4450_v8 = vld [vmem:[#allocation3 + $0x2] sm:$0xff] }
 0x6d1   : > { %v3894_v5 = vadd.f32 %v3893_v2, %v3892_v17  ;;  %v4451_v17 = vld [vmem:[#allocation3 + $0xa] sm:$0xff]  ;;  %v5254_v2 = vld [vmem:[#allocation3 + $0x1a0] sm:$0xff] }
 0x6d2   : > { %4516 = vrot.lane.b32.xlu0 %v4451_v17, %s6686_s27 }
 0x6d3   : > { %v3896_v55 = vadd.f32 %v3895_v48, %v3894_v5 }
 0x6d4   : > { %4514 = vrot.lane.b32.xlu1 %v4450_v8, %s6686_s27 }
 0x6d5   : > { %v3898_v10 = vadd.f32 %v3897_v54, %v3896_v55  ;;  %v3987_v54 = vld [vmem:[%s9812_s6] sm:$0x1] }
 0x6d6   : > { %5349 = vrot.lane.b32.xlu0 %v5254_v2, %s9837_s0 }
 0x6d7   : > { %v3900_v38 = vadd.f32 %v3899_v42, %v3898_v10 }
 0x6d8   : > { %5347 = vrot.lane.b32.xlu1 %v5253_v36, %s9837_s0 }
 0x6d9   : > { %v3902_v21 = vadd.f32 %v3901_v59, %v3900_v38 }
 0x6db   : > { %v3904_v16 = vadd.f32 %v3903_v1, %v3902_v21 }
 0x6dd   : > { %v3905_v24 = vrot.slane %v3904_v16, 4 }
 0x6df   : > { %v3906_v7 = vadd.f32 %v3905_v24, %v3904_v16 }
 0x6e1   : > { %v3907_v35 = vrot.slane %v3906_v7, 2 }
 0x6e3   : > { %v3908_v37 = vadd.f32 %v3907_v35, %v3906_v7 }
 0x6e5   : > { %v3909_v61 = vrot.slane %v3908_v37, 1 }
 0x6e7   : > { %v3910_v23 = vadd.f32 %v3909_v61, %v3908_v37 }
 0x6e9   : > { %6487 = vmatmul.mubr.msk.f32.vlgmr.msra.gmra.mrb[38].mxu0 %vm541_vm14, %v3910_v23 }
 0x6ea   : > { %5990 = vmatprep.mubr.f32.mxu0 %v9832_v11 }
 0x7bc   : > { %v3980_v5 = vpop.f32.mrb[38].mxu0 }
 0x7bd   : > { %v3984_v9 = vmul.f32 0.001953125, %v3980_v5  ;;  %v6488_v48 = vpop.f32.mrb[39].mxu0 }
 0x7bf   : > { %v3985_v55 = vadd.f32 1e-05, %v3984_v9 }
 0x7c1   : > { %6648 = vrsqrt.f32 %v3985_v55 }
 0x7cb   : > { %v6649_v25 = vpop.eup %6648 }
 0x7cc   : > { %v3988_v10 = vmul.f32 %v6649_v25, %v3987_v54 }
 0x7ce   : > { %v3992_v45 = vrot.slane %v3988_v10, %v3775_v22 }
 0x7d0   : > { %v3993_v42 = vmul.f32 %v3992_v45, %v8382_v56  ;;  %v3994_v38 = vmul.f32 %v3992_v45, %v8385_v34  ;;  %v3995_v59 = vmul.f32 %v3992_v45, %v8388_v40  ;;  %v3996_v21 = vmul.f32 %v3992_v45, %v8391_v33  ;;  %v4193_v34 = vld [vmem:[#allocation3] sm:$0xff]  ;;  %v4194_v40 = vld [vmem:[#allocation3 + $0x8] sm:$0xff] }
 0x7d1   : > { %v3997_v1 = vmul.f32 %v3992_v45, %v8394_v63  ;;  %v3998_v16 = vmul.f32 %v3992_v45, %v8397_v18  ;;  %v3999_v24 = vmul.f32 %v3992_v45, %v8400_v51  ;;  %v4000_v7 = vmul.f32 %v3992_v45, %v8403_v53  ;;  %4225 = vst.msk [vmem:[#allocation5] sm:$0xff] %vm541_vm14, %v4193_v34 }
 0x7d2   : > { %v4001_v35 = vmul.f32 %v3992_v45, %v8406_v4  ;;  %v4002_v31 = vmul.f32 %v3992_v45, %v8409_v32  ;;  %v4003_v22 = vmul.f32 %v3992_v45, %v8412_v41  ;;  %v4004_v56 = vmul.f32 %v3992_v45, %v8415_v27  ;;  %4226 = vst.msk [vmem:[#allocation5 + $0x10] sm:$0xff] %vm541_vm14, %v4194_v40  ;;  %v6294_v27 = vld [vmem:[%s9813_s7] ss:$0 sm:$0xff] }
 0x7d3   : > { %v4005_v33 = vmul.f32 %v3992_v45, %v8418_v43  ;;  %v4006_v63 = vmul.f32 %v3992_v45, %v8421_v28  ;;  %v4007_v18 = vmul.f32 %v3992_v45, %v8424_v44  ;;  %v4008_v51 = vmul.f32 %v3992_v45, %v8427_v60 }
 0x7d4   : > { %v4009_v53 = vmul.f32 %v3992_v45, %v8430_v15  ;;  %v4010_v4 = vmul.f32 %v3992_v45, %v8433_v29  ;;  %v4011_v32 = vmul.f32 %v3992_v45, %v8436_v26  ;;  %v4012_v41 = vmul.f32 %v3992_v45, %v8439_v30 }
 0x7d5   : > { %v4013_v43 = vmul.f32 %v3992_v45, %v8442_v19  ;;  %v4014_v28 = vmul.f32 %v3992_v45, %v8445_v3  ;;  %v4015_v44 = vmul.f32 %v3992_v45, %v8448_v52  ;;  %v4016_v60 = vmul.f32 %v3992_v45, %v8451_v12 }
 0x7d6   : > { %v4017_v15 = vmul.f32 %v3992_v45, %v8454_v62  ;;  %v4018_v29 = vmul.f32 %v3992_v45, %v8457_v58  ;;  %v4019_v26 = vmul.f32 %v3992_v45, %v8459_v50  ;;  %v4020_v30 = vmul.f32 %v3992_v45, %v8461_v57 }
 0x7d7   : > { %v4021_v37 = vmul.f32 %v3992_v45, %v8463_v20  ;;  %v4022_v61 = vmul.f32 %v3992_v45, %v8465_v39  ;;  %v4023_v19 = vmul.f32 %v3992_v45, %v8467_v47  ;;  %v4024_v3 = vmul.f32 %v3992_v45, %v8469_v14 }
 0x7d8   : > { %v8617_v23 = vadd.f32 %v6294_v27, %v3993_v42  ;;  %v8619_v52 = vadd.f32 %v6294_v27, %v3994_v38  ;;  %v8621_v12 = vadd.f32 %v6294_v27, %v3995_v59  ;;  %v8623_v62 = vadd.f32 %v6294_v27, %v3996_v21 }
 0x7d9   : > { %v8625_v58 = vadd.f32 %v6294_v27, %v3997_v1  ;;  %v8627_v50 = vadd.f32 %v6294_v27, %v3998_v16  ;;  %v8629_v57 = vadd.f32 %v6294_v27, %v3999_v24  ;;  %v8631_v20 = vadd.f32 %v6294_v27, %v4000_v7 }
 0x7da   : > { %v8633_v39 = vadd.f32 %v6294_v27, %v4001_v35  ;;  %v8635_v47 = vadd.f32 %v6294_v27, %v4002_v31  ;;  %v8637_v14 = vadd.f32 %v6294_v27, %v4003_v22  ;;  %v8639_v13 = vadd.f32 %v6294_v27, %v4004_v56 }
 0x7db   : > { %v8641_v46 = vadd.f32 %v6294_v27, %v4005_v33  ;;  %v8643_v8 = vadd.f32 %v6294_v27, %v4006_v63  ;;  %v8645_v17 = vadd.f32 %v6294_v27, %v4007_v18  ;;  %v8647_v36 = vadd.f32 %v6294_v27, %v4008_v51 }
 0x7dc   : > { %v8649_v2 = vadd.f32 %v6294_v27, %v4009_v53  ;;  %v8651_v5 = vadd.f32 %v6294_v27, %v4010_v4  ;;  %v8653_v9 = vadd.f32 %v6294_v27, %v4011_v32  ;;  %v8655_v48 = vadd.f32 %v6294_v27, %v4012_v41 }
 0x7dd   : > { %v8657_v55 = vadd.f32 %v6294_v27, %v4013_v43  ;;  %v8659_v25 = vadd.f32 %v6294_v27, %v4014_v28  ;;  %v8661_v54 = vadd.f32 %v6294_v27, %v4015_v44  ;;  %v8663_v10 = vadd.f32 %v6294_v27, %v4016_v60 }
 0x7de   : > { %v8665_v45 = vadd.f32 %v6294_v27, %v4017_v15  ;;  %v8667_v42 = vadd.f32 %v6294_v27, %v4018_v29  ;;  %v8669_v38 = vadd.f32 %v6294_v27, %v4019_v26  ;;  %v8671_v59 = vadd.f32 %v6294_v27, %v4020_v30 }
 0x7df   : > { %v8673_v21 = vadd.f32 %v6294_v27, %v4021_v37  ;;  %v8675_v1 = vadd.f32 %v6294_v27, %v4022_v61  ;;  %vm4064_vm4 = vcmp.gt.f32.partialorder %v8617_v23, 0.0  ;;  %vm4065_vm5 = vcmp.gt.f32.partialorder %v8619_v52, 0.0 }
 0x7e0   : > { %vm4066_vm6 = vcmp.gt.f32.partialorder %v8621_v12, 0.0  ;;  %vm4067_vm7 = vcmp.gt.f32.partialorder %v8623_v62, 0.0  ;;  %vm4068_vm8 = vcmp.gt.f32.partialorder %v8625_v58, 0.0  ;;  %vm4069_vm9 = vcmp.gt.f32.partialorder %v8627_v50, 0.0 }
 0x7e1   : > { %vm4070_vm10 = vcmp.gt.f32.partialorder %v8629_v57, 0.0  ;;  %vm4071_vm11 = vcmp.gt.f32.partialorder %v8631_v20, 0.0  ;;  %v8687_v16 = vadd.f32 %v6294_v27, %v4023_v19  ;;  %v4096_v24 = vmul.f32 0.01, %v8617_v23 }
 0x7e2   : > { %v4097_v7 = vmul.f32 0.01, %v8619_v52  ;;  %v4098_v35 = vmul.f32 0.01, %v8621_v12  ;;  %v8696_v31 = vadd.f32 %v6294_v27, %v4024_v3  ;;  %vm4079_vm13 = vcmp.gt.f32.partialorder %v8647_v36, 0.0 }
 0x7e3   : > { %vm4080_vm15 = vcmp.gt.f32.partialorder %v8649_v2, 0.0  ;;  %v4099_v22 = vmul.f32 0.01, %v8623_v62  ;;  %v4100_v56 = vmul.f32 0.01, %v8625_v58  ;;  %vm4085_vm1 = vcmp.gt.f32.partialorder %v8659_v25, 0.0 }
 0x7e4   : > { %v4101_v34 = vmul.f32 0.01, %v8627_v50  ;;  %v4102_v40 = vmul.f32 0.01, %v8629_v57  ;;  %v4103_v33 = vmul.f32 0.01, %v8631_v20  ;;  %v4128_v18 = vsel %vm4064_vm4, %v8617_v23, %v4096_v24 }
 0x7e5   : > { %v4104_v63 = vmul.f32 0.01, %v8633_v39  ;;  %vm4086_vm2 = vcmp.gt.f32.partialorder %v8661_v54, 0.0  ;;  %v4105_v51 = vmul.f32 0.01, %v8635_v47  ;;  %v4129_v32 = vsel %vm4065_vm5, %v8619_v52, %v4097_v7  ;;  %4161 = vst.msk [vmem:[#allocation3 + $0x19] sm:$0xff] %vm541_vm14, %v4128_v18 }
 0x7e6   : > { %v4106_v53 = vmul.f32 0.01, %v8637_v14  ;;  %v4107_v4 = vmul.f32 0.01, %v8639_v13  ;;  %vm4090_vm4 = vcmp.gt.f32.partialorder %v8669_v38, 0.0  ;;  %vm4092_vm3 = vcmp.gt.f32.partialorder %v8673_v21, 0.0 }
 0x7e7   : > { %vm4093_vm12 = vcmp.gt.f32.partialorder %v8675_v1, 0.0  ;;  %v4108_v41 = vmul.f32 0.01, %v8641_v46  ;;  %v4109_v27 = vmul.f32 0.01, %v8643_v8  ;;  %v4130_v28 = vsel %vm4066_vm6, %v8621_v12, %v4098_v35  ;;  %4162 = vst.msk [vmem:[#allocation3 + $0x21] sm:$0xff] %vm541_vm14, %v4129_v32 }
 0x7e8   : > { %v4110_v43 = vmul.f32 0.01, %v8645_v17  ;;  %vm4094_vm5 = vcmp.gt.f32.partialorder %v8687_v16, 0.0  ;;  %vm4095_vm0 = vcmp.gt.f32.partialorder %v8696_v31, 0.0  ;;  %v4111_v44 = vmul.f32 0.01, %v8647_v36 }
 0x7e9   : > { %v4112_v60 = vmul.f32 0.01, %v8649_v2  ;;  %v4113_v15 = vmul.f32 0.01, %v8651_v5  ;;  %v4131_v29 = vsel %vm4067_vm7, %v8623_v62, %v4099_v22  ;;  %4163 = vst.msk [vmem:[#allocation3 + $0x31] sm:$0xff] %vm541_vm14, %v4130_v28  ;;  %v4132_v61 = vsel %vm4068_vm8, %v8625_v58, %v4100_v56  ;;  %v8774_v56 = vpop.permute.xlu1 %4321 }
 0x7ea   : > { %v4114_v26 = vmul.f32 0.01, %v8653_v9  ;;  %v4115_v30 = vmul.f32 0.01, %v8655_v48  ;;  %v4116_v37 = vmul.f32 0.01, %v8657_v55  ;;  %v4133_v52 = vsel %vm4069_vm9, %v8627_v50, %v4101_v34  ;;  %v8776_v34 = vpop.permute.xlu0 %4323 }
 0x7eb   : > { %4164 = vst.msk [vmem:[#allocation3 + $0x39] sm:$0xff] %vm541_vm14, %v4131_v29  ;;  %v4117_v19 = vmul.f32 0.01, %v8659_v25  ;;  %v4118_v3 = vmul.f32 0.01, %v8661_v54  ;;  %4165 = vst.msk [vmem:[#allocation3 + $0x49] sm:$0xff] %vm541_vm14, %v4132_v61  ;;  %v4134_v24 = vsel %vm4070_vm10, %v8629_v57, %v4102_v40  ;;  %v4135_v22 = vsel %vm4071_vm11, %v8631_v20, %v4103_v33 }
 0x7ec   : > { %v4119_v23 = vmul.f32 0.01, %v8663_v10  ;;  %v4120_v12 = vmul.f32 0.01, %v8665_v45  ;;  %v4121_v62 = vmul.f32 0.01, %v8667_v42 }
 0x7ed   : > { %v4122_v58 = vmul.f32 0.01, %v8669_v38  ;;  %4166 = vst.msk [vmem:[#allocation3 + $0x51] sm:$0xff] %vm541_vm14, %v4133_v52  ;;  %v4123_v7 = vmul.f32 0.01, %v8671_v59  ;;  %4167 = vst.msk [vmem:[#allocation3 + $0x61] sm:$0xff] %vm541_vm14, %v4134_v24 }
 0x7ee   : > { %v4124_v35 = vmul.f32 0.01, %v8673_v21  ;;  %v4125_v50 = vmul.f32 0.01, %v8675_v1  ;;  %v8779_v57 = vmul.f32 0.01, %v8687_v16 }
 0x7ef   : > { %v8782_v40 = vmul.f32 0.01, %v8696_v31  ;;  %vm9842_vm6 = vcmp.gt.f32.partialorder %v8633_v39, 0.0  ;;  %vm9843_vm7 = vcmp.gt.f32.partialorder %v8635_v47, 0.0  ;;  %4168 = vst.msk [vmem:[#allocation3 + $0x69] sm:$0xff] %vm541_vm14, %v4135_v22  ;;  %v4643_v33 = vld [vmem:[#allocation3 + $0x18] sm:$0xff] }
 0x7f0   : > { %v4136_v18 = vsel %vm9842_vm6, %v8633_v39, %v4104_v63  ;;  %v4137_v20 = vsel %vm9843_vm7, %v8635_v47, %v4105_v51  ;;  %vm9844_vm8 = vcmp.gt.f32.partialorder %v8637_v14, 0.0  ;;  %vm9845_vm9 = vcmp.gt.f32.partialorder %v8639_v13, 0.0  ;;  %v4644_v47 = vld [vmem:[#allocation3 + $0x20] sm:$0xff]  ;;  %4707 = vrot.lane.b32.xlu1 %v4643_v33, %s6683_s22  ;;  %4227 = vst.msk [vmem:[#allocation5 + $0x20] sm:$0xff] %vm541_vm14, %v4643_v33 }
 0x7f1   : > { %v4138_v32 = vsel %vm9844_vm8, %v8637_v14, %v4106_v53  ;;  %v4139_v28 = vsel %vm9845_vm9, %v8639_v13, %v4107_v4  ;;  %vm9846_vm10 = vcmp.gt.f32.partialorder %v8641_v46, 0.0  ;;  %vm9847_vm11 = vcmp.gt.f32.partialorder %v8643_v8, 0.0  ;;  %4169 = vst.msk [vmem:[#allocation3 + $0x79] sm:$0xff] %vm541_vm14, %v4136_v18  ;;  %4170 = vst.msk [vmem:[#allocation3 + $0x81] sm:$0xff] %vm541_vm14, %v4137_v20  ;;  %4709 = vrot.lane.b32.xlu0 %v4644_v47, %s6683_s22  ;;  %v9013_v18 = vld [vmem:[#allocation3 + $0x31] sm:$0xff] }
 0x7f2   : > { %v4140_v29 = vsel %vm9846_vm10, %v8641_v46, %v4108_v41  ;;  %v4141_v39 = vsel %vm9847_vm11, %v8643_v8, %v4109_v27  ;;  %vm9848_vm6 = vcmp.gt.f32.partialorder %v8645_v17, 0.0  ;;  %v4143_v13 = vsel %vm4079_vm13, %v8647_v36, %v4111_v44  ;;  %4171 = vst.msk [vmem:[#allocation3 + $0x91] sm:$0xff] %vm541_vm14, %v4138_v32  ;;  %4172 = vst.msk [vmem:[#allocation3 + $0x99] sm:$0xff] %vm541_vm14, %v4139_v28  ;;  %v8845_v51 = vld [vmem:[#allocation3 + $0x3a] sm:$0xff]  ;;  %v4517_v44 = vpop.permute.xlu0 %4516 }
 0x7f3   : > { %v4142_v14 = vsel %vm9848_vm6, %v8645_v17, %v4110_v43  ;;  %v4144_v46 = vsel %vm4080_vm15, %v8649_v2, %v4112_v60  ;;  %vm9849_vm7 = vcmp.gt.f32.partialorder %v8651_v5, 0.0  ;;  %4173 = vst.msk [vmem:[#allocation3 + $0xa9] sm:$0xff] %vm541_vm14, %v4140_v29  ;;  %4174 = vst.msk [vmem:[#allocation3 + $0xb1] sm:$0xff] %vm541_vm14, %v4141_v39  ;;  %v8824_v17 = vld [vmem:[#allocation3 + $0x30] sm:$0xff]  ;;  %vm9850_vm13 = vcmp.gt.f32.partialorder %v8653_v9, 0.0  ;;  %v4515_v43 = vpop.permute.xlu1 %4514  ;;  %v9023_v32 = vld [vmem:[#allocation3 + $0x39] sm:$0xff] }
 0x7f4   : > { %v4145_v8 = vsel %vm9849_vm7, %v8651_v5, %v4113_v15  ;;  %4228 = vst.msk [vmem:[#allocation5 + $0x30] sm:$0xff] %vm541_vm14, %v4644_v47  ;;  %v4146_v36 = vsel %vm9850_vm13, %v8653_v9, %v4114_v26  ;;  %vm9851_vm15 = vcmp.gt.f32.partialorder %v8655_v48, 0.0  ;;  %vm9852_vm8 = vcmp.gt.f32.partialorder %v8657_v55, 0.0  ;;  %4175 = vst.msk [vmem:[#allocation3 + $0xc1] sm:$0xff] %vm541_vm14, %v4142_v14  ;;  %v8843_v9 = vld [vmem:[#allocation3 + $0x32] sm:$0xff]  ;;  %v8917_v15 = vld [vmem:[#allocation3 + $0x4a] sm:$0xff] }
 0x7f5   : > { %v4147_v2 = vsel %vm9851_vm15, %v8655_v48, %v4115_v30  ;;  %v4148_v5 = vsel %vm9852_vm8, %v8657_v55, %v4116_v37  ;;  %v4149_v63 = vsel %vm4085_vm1, %v8659_v25, %v4117_v19  ;;  %4176 = vst.msk [vmem:[#allocation3 + $0xc9] sm:$0xff] %vm541_vm14, %v4143_v13  ;;  %4177 = vst.msk [vmem:[#allocation3 + $0xd9] sm:$0xff] %vm541_vm14, %v4144_v46  ;;  %v8847_v48 = vld [vmem:[#allocation3 + $0x38] sm:$0xff]  ;;  %vm9853_vm1 = vcmp.gt.f32.partialorder %v8663_v10, 0.0  ;;  %v8919_v26 = vld [vmem:[#allocation3 + $0x60] sm:$0xff] }
 0x7f6   : > { %4178 = vst.msk [vmem:[#allocation3 + $0xe1] sm:$0xff] %vm541_vm14, %v4145_v8  ;;  %4229 = vst.msk [vmem:[#allocation5 + $0x40] sm:$0xff] %vm541_vm14, %v8824_v17  ;;  %v4150_v55 = vsel %vm4086_vm2, %v8661_v54, %v4118_v3  ;;  %v4151_v25 = vsel %vm9853_vm1, %v8663_v10, %v4119_v23  ;;  %vm9854_vm9 = vcmp.gt.f32.partialorder %v8665_v45, 0.0  ;;  %vm9855_vm10 = vcmp.gt.f32.partialorder %v8667_v42, 0.0  ;;  %v8867_v54 = vld [vmem:[#allocation3 + $0x19] sm:$0xff]  ;;  %v8873_v10 = vld [vmem:[#allocation3 + $0x48] sm:$0xff] }
 0x7f7   : > { %v4152_v53 = vsel %vm9854_vm9, %v8665_v45, %v4120_v12  ;;  %v4153_v4 = vsel %vm9855_vm10, %v8667_v42, %v4121_v62  ;;  %4179 = vst.msk [vmem:[#allocation3 + $0xf1] sm:$0xff] %vm541_vm14, %v4146_v36  ;;  %4180 = vst.msk [vmem:[#allocation3 + $0xf9] sm:$0xff] %vm541_vm14, %v4147_v2  ;;  %v4154_v45 = vsel %vm4090_vm4, %v8669_v38, %v4122_v58  ;;  %vm9856_vm2 = vcmp.gt.f32.partialorder %v8671_v59, 0.0  ;;  %v8893_v38 = vld [vmem:[#allocation3 + $0x21] sm:$0xff]  ;;  %v8931_v30 = vld [vmem:[#allocation3 + $0x6a] sm:$0xff] }
 0x7f8   : > { %4181 = vst.msk [vmem:[#allocation3 + $0x109] sm:$0xff] %vm541_vm14, %v4148_v5  ;;  %4182 = vst.msk [vmem:[#allocation3 + $0x111] sm:$0xff] %vm541_vm14, %v4149_v63  ;;  %v4155_v42 = vsel %vm9856_vm2, %v8671_v59, %v4123_v7  ;;  %v4156_v41 = vsel %vm4092_vm3, %v8673_v21, %v4124_v35  ;;  %v4157_v27 = vsel %vm4093_vm12, %v8675_v1, %v4125_v50  ;;  %4900 = vrot.lane.b32.xlu1 %v8867_v54, %s6687_s28  ;;  %v8897_v59 = vld [vmem:[#allocation3 + $0x50] sm:$0xff]  ;;  %vm4417_vm12 = vcmask 261248   ;;  %v8941_v37 = vld [vmem:[#allocation3 + $0x62] sm:$0xff] }
 0x7f9   : > { %5641 = vst.msk [vmem:[#allocation5 + $0x8] sm:$0xff] %vm541_vm14, %v8843_v9  ;;  %5642 = vst.msk [vmem:[#allocation5 + $0x18] sm:$0xff] %vm541_vm14, %v8845_v51  ;;  %v8899_v21 = vld [vmem:[#allocation3 + $0x52] sm:$0xff]  ;;  %v4158_v1 = vsel %vm4094_vm5, %v8687_v16, %v8779_v57  ;;  %v4159_v60 = vsel %vm4095_vm0, %v8696_v31, %v8782_v40  ;;  %4902 = vrot.lane.b32.xlu0 %v8893_v38, %s6687_s28  ;;  %vm4610_vm3 = vcmask 392448   ;;  %v8927_v16 = vld [vmem:[#allocation3 + $0x1a] sm:$0xff]  ;;  %vm4803_vm4 = vcmask 523648  }
 0x7fa   : > { %4230 = vst.msk [vmem:[#allocation5 + $0x50] sm:$0xff] %vm541_vm14, %v8847_v48  ;;  %4183 = vst.msk [vmem:[#allocation3 + $0x121] sm:$0xff] %vm541_vm14, %v4150_v55  ;;  %v8929_v31 = vld [vmem:[#allocation3 + $0x68] sm:$0xff]  ;;  %v8943_v61 = vld [vmem:[#allocation3 + $0x80] sm:$0xff]  ;;  %vm4996_vm5 = vcmask 654848   ;;  %vm5189_vm11 = vcmask 786048   ;;  %vm9861_vm13 = vcmp.eq.f32.partialorder %v8272_v6, %v8266_v49  ;;  %vm9862_vm15 = vcmp.eq.f32.partialorder %v8268_v0, %v8266_v49 }
 0x7fb   : > { %4184 = vst.msk [vmem:[#allocation3 + $0x129] sm:$0xff] %vm541_vm14, %v4151_v25  ;;  %4185 = vst.msk [vmem:[#allocation3 + $0x139] sm:$0xff] %vm541_vm14, %v4152_v53  ;;  %v8945_v19 = vld [vmem:[#allocation3 + $0x78] sm:$0xff]  ;;  %v8953_v3 = vld [vmem:[#allocation3 + $0x22] sm:$0xff]  ;;  %vm5383_vm6 = vcmask 917248   ;;  %vm5576_vm7 = vcmask 1048448  }
 0x7fc   : > { %4186 = vst.msk [vmem:[#allocation3 + $0x141] sm:$0xff] %vm541_vm14, %v4153_v4  ;;  %4231 = vst.msk [vmem:[#allocation5 + $0x60] sm:$0xff] %vm541_vm14, %v8873_v10  ;;  %5093 = vrot.lane.b32.xlu1 %v8927_v16, %s6679_s23  ;;  %v8957_v23 = vld [vmem:[#allocation3 + $0x82] sm:$0xff]  ;;  %v8967_v52 = vld [vmem:[#allocation3 + $0x7a] sm:$0xff] }
 0x7fd   : > { %4187 = vst.msk [vmem:[#allocation3 + $0x151] sm:$0xff] %vm541_vm14, %v4154_v45  ;;  %4188 = vst.msk [vmem:[#allocation3 + $0x159] sm:$0xff] %vm541_vm14, %v4155_v42  ;;  %5095 = vrot.lane.b32.xlu0 %v8953_v3, %s6679_s23  ;;  %v8969_v12 = vld [vmem:[#allocation3 + $0x98] sm:$0xff]  ;;  %v8971_v62 = vld [vmem:[#allocation3 + $0x90] sm:$0xff] }
 0x7fe   : > { %4189 = vst.msk [vmem:[#allocation3 + $0x169] sm:$0xff] %vm541_vm14, %v4156_v41  ;;  %4190 = vst.msk [vmem:[#allocation3 + $0x171] sm:$0xff] %vm541_vm14, %v4157_v27  ;;  %v8987_v50 = vld [vmem:[#allocation3 + $0x9a] sm:$0xff]  ;;  %v8989_v22 = vld [vmem:[#allocation3 + $0x92] sm:$0xff] }
 0x7ff   : > { %5644 = vst.msk [vmem:[#allocation5 + $0x38] sm:$0xff] %vm541_vm14, %v8899_v21  ;;  %4232 = vst.msk [vmem:[#allocation5 + $0x70] sm:$0xff] %vm541_vm14, %v8897_v59  ;;  %v9009_v57 = vld [vmem:[#allocation3 + $0xb2] sm:$0xff]  ;;  %v9011_v40 = vld [vmem:[#allocation3 + $0xaa] sm:$0xff] }
 0x800   : > { %4191 = vst.msk [vmem:[#allocation3 + $0x181] sm:$0xff] %vm541_vm14, %v4158_v1  ;;  %4192 = vst.msk [vmem:[#allocation3 + $0x189] sm:$0xff] %vm541_vm14, %v4159_v60  ;;  %v5678_v58 = vld [vmem:[#allocation5 + $0x8] sm:$0xff]  ;;  %v5680_v24 = vld [vmem:[#allocation5 + $0x18] sm:$0xff]  ;;  %5287 = vrot.lane.b32.xlu1 %v8824_v17, %s9837_s0 }
 0x801   : > { %4418 = vst.msk [vmem:[#allocation5] sm:$0xff] %vm4417_vm12, %v8774_v56  ;;  %4419 = vst.msk [vmem:[#allocation5 + $0x10] sm:$0xff] %vm4417_vm12, %v8776_v34  ;;  %v6519_v35 = vpack.c.bf16 %v5680_v24, %v5678_v58  ;;  %v8993_v56 = vld [vmem:[#allocation3 + $0xb0] sm:$0xff]  ;;  %v8995_v34 = vld [vmem:[#allocation3 + $0xa8] sm:$0xff]  ;;  %5289 = vrot.lane.b32.xlu0 %v8847_v48, %s9837_s0 }
 0x802   : > { %5643 = vst.msk [vmem:[#allocation5 + $0x28] sm:$0xff] %vm541_vm14, %v8917_v15  ;;  %4233 = vst.msk [vmem:[#allocation5 + $0x80] sm:$0xff] %vm541_vm14, %v8919_v26  ;;  %v9015_v20 = vld [vmem:[#allocation3 + $0xc8] sm:$0xff]  ;;  %v9017_v33 = vld [vmem:[#allocation3 + $0xc0] sm:$0xff] }
 0x803   : > { %4611 = vst.msk [vmem:[#allocation5] sm:$0xff] %vm4610_vm3, %v4515_v43  ;;  %4612 = vst.msk [vmem:[#allocation5 + $0x10] sm:$0xff] %vm4610_vm3, %v4517_v44  ;;  %v9033_v28 = vld [vmem:[#allocation3 + $0xc2] sm:$0xff]  ;;  %v9035_v29 = vld [vmem:[#allocation3 + $0xca] sm:$0xff] }
 0x804   : > { %5646 = vst.msk [vmem:[#allocation5 + $0x58] sm:$0xff] %vm541_vm14, %v8931_v30  ;;  %4234 = vst.msk [vmem:[#allocation5 + $0x90] sm:$0xff] %vm541_vm14, %v8929_v31  ;;  %5480 = vrot.lane.b32.xlu1 %v9013_v18, %s9859_s17  ;;  %v9037_v39 = vld [vmem:[#allocation3 + $0xd8] sm:$0xff]  ;;  %v9039_v47 = vld [vmem:[#allocation3 + $0xe0] sm:$0xff] }
 0x805   : > { %5645 = vst.msk [vmem:[#allocation5 + $0x48] sm:$0xff] %vm541_vm14, %v8941_v37  ;;  %4235 = vst.msk [vmem:[#allocation5 + $0xa0] sm:$0xff] %vm541_vm14, %v8945_v19  ;;  %5482 = vrot.lane.b32.xlu0 %v9023_v32, %s9859_s17  ;;  %v9051_v14 = vld [vmem:[#allocation3 + $0xda] sm:$0xff]  ;;  %v9053_v13 = vld [vmem:[#allocation3 + $0xe2] sm:$0xff] }
 0x806   : > { %4236 = vst.msk [vmem:[#allocation5 + $0xb0] sm:$0xff] %vm541_vm14, %v8943_v61  ;;  %5648 = vst.msk [vmem:[#allocation5 + $0x78] sm:$0xff] %vm541_vm14, %v8957_v23  ;;  %v9055_v46 = vld [vmem:[#allocation3 + $0xf0] sm:$0xff]  ;;  %v9059_v8 = vld [vmem:[#allocation3 + $0xf8] sm:$0xff] }
 0x807   : > { %vm8977_vm0 = vmpackc.low %vm541_vm14, %vm541_vm14  ;;  %5647 = vst.msk [vmem:[#allocation5 + $0x68] sm:$0xff] %vm541_vm14, %v8967_v52  ;;  %v9067_v36 = vld [vmem:[#allocation3 + $0xf2] sm:$0xff]  ;;  %v9071_v2 = vld [vmem:[#allocation3 + $0xfa] sm:$0xff] }
 0x808   : > { %4237 = vst.msk [vmem:[#allocation5 + $0xc0] sm:$0xff] %vm541_vm14, %v8971_v62  ;;  %4238 = vst.msk [vmem:[#allocation5 + $0xd0] sm:$0xff] %vm541_vm14, %v8969_v12  ;;  %6521 = vmatprep.subr.msk.bf16.mxu1 %vm8977_vm0, %v6519_v35  ;;  %4325 = vrot.lane.b32.xlu1 %v8867_v54, %s9838_s15  ;;  %v9073_v5 = vld [vmem:[#allocation3 + $0x108] sm:$0xff]  ;;  %v9075_v63 = vld [vmem:[#allocation3 + $0x110] sm:$0xff] }
 0x809   : > { %5649 = vst.msk [vmem:[#allocation5 + $0x88] sm:$0xff] %vm541_vm14, %v8989_v22  ;;  %5650 = vst.msk [vmem:[#allocation5 + $0x98] sm:$0xff] %vm541_vm14, %v8987_v50  ;;  %4327 = vrot.lane.b32.xlu0 %v8893_v38, %s9838_s15  ;;  %v9081_v55 = vld [vmem:[#allocation3 + $0x10a] sm:$0xff]  ;;  %v9091_v25 = vld [vmem:[#allocation3 + $0x112] sm:$0xff] }
 0x80a   : > { %4239 = vst.msk [vmem:[#allocation5 + $0xe0] sm:$0xff] %vm541_vm14, %v8995_v34  ;;  %4240 = vst.msk [vmem:[#allocation5 + $0xf0] sm:$0xff] %vm541_vm14, %v8993_v56  ;;  %v9095_v53 = vld [vmem:[#allocation3 + $0x120] sm:$0xff]  ;;  %v9097_v4 = vld [vmem:[#allocation3 + $0x128] sm:$0xff] }
 0x80b   : > { %5651 = vst.msk [vmem:[#allocation5 + $0xa8] sm:$0xff] %vm541_vm14, %v9011_v40  ;;  %5652 = vst.msk [vmem:[#allocation5 + $0xb8] sm:$0xff] %vm541_vm14, %v9009_v57  ;;  %v9101_v54 = vld [vmem:[#allocation3 + $0x122] sm:$0xff]  ;;  %v9103_v45 = vld [vmem:[#allocation3 + $0x12a] sm:$0xff] }
 0x80c   : > { %4241 = vst.msk [vmem:[#allocation5 + $0x100] sm:$0xff] %vm541_vm14, %v9017_v33  ;;  %4242 = vst.msk [vmem:[#allocation5 + $0x110] sm:$0xff] %vm541_vm14, %v9015_v20  ;;  %4518 = vrot.lane.b32.xlu1 %v8927_v16, %s6686_s27  ;;  %v9111_v42 = vld [vmem:[#allocation3 + $0x138] sm:$0xff]  ;;  %v9119_v41 = vld [vmem:[#allocation3 + $0x140] sm:$0xff] }
 0x80d   : > { %5653 = vst.msk [vmem:[#allocation5 + $0xc8] sm:$0xff] %vm541_vm14, %v9033_v28  ;;  %5654 = vst.msk [vmem:[#allocation5 + $0xd8] sm:$0xff] %vm541_vm14, %v9035_v29  ;;  %4520 = vrot.lane.b32.xlu0 %v8953_v3, %s6686_s27  ;;  %v9123_v27 = vld [vmem:[#allocation3 + $0x13a] sm:$0xff]  ;;  %v9125_v38 = vld [vmem:[#allocation3 + $0x142] sm:$0xff] }
 0x80e   : > { %4243 = vst.msk [vmem:[#allocation5 + $0x120] sm:$0xff] %vm541_vm14, %v9037_v39  ;;  %4244 = vst.msk [vmem:[#allocation5 + $0x130] sm:$0xff] %vm541_vm14, %v9039_v47  ;;  %v9131_v43 = vld [vmem:[#allocation3 + $0x158] sm:$0xff]  ;;  %v9149_v1 = vld [vmem:[#allocation3 + $0x168] sm:$0xff] }
 0x80f   : > { %5655 = vst.msk [vmem:[#allocation5 + $0xe8] sm:$0xff] %vm541_vm14, %v9051_v14  ;;  %5656 = vst.msk [vmem:[#allocation5 + $0xf8] sm:$0xff] %vm541_vm14, %v9053_v13  ;;  %v9147_v44 = vld [vmem:[#allocation3 + $0x15a] sm:$0xff]  ;;  %v9151_v60 = vld [vmem:[#allocation3 + $0x170] sm:$0xff] }
 0x810   : > { %4245 = vst.msk [vmem:[#allocation5 + $0x140] sm:$0xff] %vm541_vm14, %v9055_v46  ;;  %4246 = vst.msk [vmem:[#allocation5 + $0x150] sm:$0xff] %vm541_vm14, %v9059_v8  ;;  %4711 = vrot.lane.b32.xlu1 %v8824_v17, %s6683_s22  ;;  %v9129_v17 = vld [vmem:[#allocation3 + $0x150] sm:$0xff]  ;;  %v9173_v58 = vld [vmem:[#allocation3 + $0x182] sm:$0xff] }
 0x811   : > { %5657 = vst.msk [vmem:[#allocation5 + $0x108] sm:$0xff] %vm541_vm14, %v9067_v36  ;;  %5658 = vst.msk [vmem:[#allocation5 + $0x118] sm:$0xff] %vm541_vm14, %v9071_v2  ;;  %4713 = vrot.lane.b32.xlu0 %v8847_v48, %s6683_s22  ;;  %v9145_v48 = vld [vmem:[#allocation3 + $0x152] sm:$0xff]  ;;  %v9163_v16 = vld [vmem:[#allocation3 + $0x16a] sm:$0xff] }
 0x812   : > { %4247 = vst.msk [vmem:[#allocation5 + $0x160] sm:$0xff] %vm541_vm14, %v9073_v5  ;;  %4248 = vst.msk [vmem:[#allocation5 + $0x170] sm:$0xff] %vm541_vm14, %v9075_v63  ;;  %v9165_v3 = vld [vmem:[#allocation3 + $0x172] sm:$0xff]  ;;  %v9175_v24 = vld [vmem:[#allocation3 + $0x18a] sm:$0xff] }
 0x813   : > { %5659 = vst.msk [vmem:[#allocation5 + $0x128] sm:$0xff] %vm541_vm14, %v9081_v55  ;;  %5660 = vst.msk [vmem:[#allocation5 + $0x138] sm:$0xff] %vm541_vm14, %v9091_v25  ;;  %v5418_v35 = vld [vmem:[#allocation3 + $0x49] sm:$0xff]  ;;  %v5419_v11 = vld [vmem:[#allocation3 + $0x51] sm:$0xff] }
 0x814   : > { %4249 = vst.msk [vmem:[#allocation5 + $0x180] sm:$0xff] %vm541_vm14, %v9095_v53  ;;  %4250 = vst.msk [vmem:[#allocation5 + $0x190] sm:$0xff] %vm541_vm14, %v9097_v4  ;;  %4904 = vrot.lane.b32.xlu1 %v9013_v18, %s6687_s28  ;;  %v6010_v0 = vld [vmem:[%s9815_s9 + $0x8] sm:$0xff] }
 0x815   : > { %5661 = vst.msk [vmem:[#allocation5 + $0x148] sm:$0xff] %vm541_vm14, %v9101_v54  ;;  %5662 = vst.msk [vmem:[#allocation5 + $0x158] sm:$0xff] %vm541_vm14, %v9103_v45  ;;  %4906 = vrot.lane.b32.xlu0 %v9023_v32, %s6687_s28 }
 0x816   : > { %4251 = vst.msk [vmem:[#allocation5 + $0x1a0] sm:$0xff] %vm541_vm14, %v9111_v42  ;;  %4252 = vst.msk [vmem:[#allocation5 + $0x1b0] sm:$0xff] %vm541_vm14, %v9119_v41 }
 0x817   : > { %5663 = vst.msk [vmem:[#allocation5 + $0x168] sm:$0xff] %vm541_vm14, %v9123_v27  ;;  %5664 = vst.msk [vmem:[#allocation5 + $0x178] sm:$0xff] %vm541_vm14, %v9125_v38 }
 0x818   : > { %4253 = vst.msk [vmem:[#allocation5 + $0x1c0] sm:$0xff] %vm541_vm14, %v9129_v17  ;;  %4254 = vst.msk [vmem:[#allocation5 + $0x1d0] sm:$0xff] %vm541_vm14, %v9131_v43  ;;  %5097 = vrot.lane.b32.xlu1 %v8843_v9, %s6679_s23 }
 0x819   : > { %5665 = vst.msk [vmem:[#allocation5 + $0x188] sm:$0xff] %vm541_vm14, %v9145_v48  ;;  %5666 = vst.msk [vmem:[#allocation5 + $0x198] sm:$0xff] %vm541_vm14, %v9147_v44  ;;  %5099 = vrot.lane.b32.xlu0 %v8845_v51, %s6679_s23 }
 0x81a   : > { %4255 = vst.msk [vmem:[#allocation5 + $0x1e0] sm:$0xff] %vm541_vm14, %v9149_v1  ;;  %4256 = vst.msk [vmem:[#allocation5 + $0x1f0] sm:$0xff] %vm541_vm14, %v9151_v60 }
 0x81b   : > { %5667 = vst.msk [vmem:[#allocation5 + $0x1a8] sm:$0xff] %vm541_vm14, %v9163_v16  ;;  %5668 = vst.msk [vmem:[#allocation5 + $0x1b8] sm:$0xff] %vm541_vm14, %v9165_v3 }
 0x81c   : > { %5669 = vst.msk [vmem:[#allocation5 + $0x1c8] sm:$0xff] %vm541_vm14, %v9173_v58  ;;  %5291 = vrot.lane.b32.xlu1 %v8873_v10, %s9837_s0  ;;  %5670 = vst.msk [vmem:[#allocation5 + $0x1d8] sm:$0xff] %vm541_vm14, %v9175_v24 }
 0x81d   : > { %5293 = vrot.lane.b32.xlu0 %v8897_v59, %s9837_s0 }
 0x820   : > { %5484 = vrot.lane.b32.xlu1 %v5418_v35, %s9859_s17 }
 0x821   : > { %5486 = vrot.lane.b32.xlu0 %v5419_v11, %s9859_s17 }
 0x824   : > { %4329 = vrot.lane.b32.xlu1 %v9013_v18, %s9838_s15 }
 0x825   : > { %4331 = vrot.lane.b32.xlu0 %v9023_v32, %s9838_s15  ;;  %v5424_v32 = vld [vmem:[#allocation3 + $0x91] sm:$0xff] }
 0x828   : > { %4522 = vrot.lane.b32.xlu1 %v8843_v9, %s6686_s27  ;;  %v5420_v9 = vld [vmem:[#allocation3 + $0x61] sm:$0xff] }
 0x829   : > { %4524 = vrot.lane.b32.xlu0 %v8845_v51, %s6686_s27  ;;  %v5421_v51 = vld [vmem:[#allocation3 + $0x69] sm:$0xff] }
 0x82c   : > { %4715 = vrot.lane.b32.xlu1 %v8873_v10, %s6683_s22  ;;  %v5423_v10 = vld [vmem:[#allocation3 + $0x81] sm:$0xff] }
 0x82d   : > { %4717 = vrot.lane.b32.xlu0 %v8897_v59, %s6683_s22  ;;  %v9237_v59 = vpop.permute.xlu1 %5347 }
 0x830   : > { %4908 = vrot.lane.b32.xlu1 %v5418_v35, %s6687_s28 }
 0x831   : > { %4910 = vrot.lane.b32.xlu0 %v5419_v11, %s6687_s28 }
 0x834   : > { %5101 = vrot.lane.b32.xlu1 %v8917_v15, %s6679_s23 }
 0x835   : > { %5103 = vrot.lane.b32.xlu0 %v8899_v21, %s6679_s23 }
 0x838   : > { %5295 = vrot.lane.b32.xlu1 %v8919_v26, %s9837_s0 }
 0x839   : > { %5297 = vrot.lane.b32.xlu0 %v8929_v31, %s9837_s0 }
 0x83c   : > { %5488 = vrot.lane.b32.xlu1 %v5420_v9, %s9859_s17 }
 0x83d   : > { %5490 = vrot.lane.b32.xlu0 %v5421_v51, %s9859_s17 }
 0x840   : > { %4333 = vrot.lane.b32.xlu1 %v5418_v35, %s9838_s15  ;;  %v5425_v35 = vld [vmem:[#allocation3 + $0x99] sm:$0xff] }
 0x841   : > { %4335 = vrot.lane.b32.xlu0 %v5419_v11, %s9838_s15  ;;  %v5422_v11 = vld [vmem:[#allocation3 + $0x79] sm:$0xff] }
 0x844   : > { %4526 = vrot.lane.b32.xlu1 %v8917_v15, %s6686_s27 }
 0x845   : > { %4528 = vrot.lane.b32.xlu0 %v8899_v21, %s6686_s27  ;;  %v9241_v21 = vpop.permute.xlu0 %5349 }
 0x848   : > { %4719 = vrot.lane.b32.xlu1 %v8919_v26, %s6683_s22 }
 0x849   : > { %4721 = vrot.lane.b32.xlu0 %v8929_v31, %s6683_s22 }
 0x84c   : > { %4912 = vrot.lane.b32.xlu1 %v5420_v9, %s6687_s28 }
 0x84d   : > { %4914 = vrot.lane.b32.xlu0 %v5421_v51, %s6687_s28 }
 0x850   : > { %5105 = vrot.lane.b32.xlu1 %v8941_v37, %s6679_s23 }
 0x851   : > { %5107 = vrot.lane.b32.xlu0 %v8931_v30, %s6679_s23 }
 0x854   : > { %5299 = vrot.lane.b32.xlu1 %v8945_v19, %s9837_s0 }
 0x855   : > { %5301 = vrot.lane.b32.xlu0 %v8943_v61, %s9837_s0 }
 0x858   : > { %5492 = vrot.lane.b32.xlu1 %v5422_v11, %s9859_s17 }
 0x859   : > { %5494 = vrot.lane.b32.xlu0 %v5423_v10, %s9859_s17 }
 0x85c   : > { %4337 = vrot.lane.b32.xlu1 %v5420_v9, %s9838_s15 }
 0x85d   : > { %4339 = vrot.lane.b32.xlu0 %v5421_v51, %s9838_s15 }
 0x860   : > { %4530 = vrot.lane.b32.xlu1 %v8941_v37, %s6686_s27 }
 0x861   : > { %4532 = vrot.lane.b32.xlu0 %v8931_v30, %s6686_s27 }
 0x862   : > { %v4708_v15 = vpop.permute.xlu1 %4707 }
 0x863   : > { %4804 = vst.msk [vmem:[#allocation5] sm:$0xff] %vm4803_vm4, %v4708_v15  ;;  %v4710_v26 = vpop.permute.xlu0 %4709 }
 0x864   : > { %4723 = vrot.lane.b32.xlu1 %v8945_v19, %s6683_s22  ;;  %4805 = vst.msk [vmem:[#allocation5 + $0x10] sm:$0xff] %vm4803_vm4, %v4710_v26 }
 0x865   : > { %4725 = vrot.lane.b32.xlu0 %v8943_v61, %s6683_s22 }
 0x868   : > { %4916 = vrot.lane.b32.xlu1 %v5422_v11, %s6687_s28 }
 0x869   : > { %4918 = vrot.lane.b32.xlu0 %v5423_v10, %s6687_s28 }
 0x86a   : > { %v4901_v31 = vpop.permute.xlu1 %4900 }
 0x86b   : > { %4997 = vst.msk [vmem:[#allocation5] sm:$0xff] %vm4996_vm5, %v4901_v31  ;;  %v4903_v30 = vpop.permute.xlu0 %4902 }
 0x86c   : > { %4998 = vst.msk [vmem:[#allocation5 + $0x10] sm:$0xff] %vm4996_vm5, %v4903_v30  ;;  %5109 = vrot.lane.b32.xlu1 %v8967_v52, %s6679_s23 }
 0x86d   : > { %5111 = vrot.lane.b32.xlu0 %v8957_v23, %s6679_s23 }
 0x86e   : > { %v5094_v37 = vpop.permute.xlu1 %5093 }
 0x86f   : > { %5190 = vst.msk [vmem:[#allocation5] sm:$0xff] %vm5189_vm11, %v5094_v37  ;;  %v5096_v61 = vpop.permute.xlu0 %5095  ;;  %v5682_v37 = vld [vmem:[#allocation5 + $0x28] sm:$0xff] }
 0x870   : > { %5191 = vst.msk [vmem:[#allocation5 + $0x10] sm:$0xff] %vm5189_vm11, %v5096_v61  ;;  %5303 = vrot.lane.b32.xlu1 %v8971_v62, %s9837_s0  ;;  %v5684_v61 = vld [vmem:[#allocation5 + $0x38] sm:$0xff] }
 0x871   : > { %5305 = vrot.lane.b32.xlu0 %v8969_v12, %s9837_s0 }
 0x872   : > { %v5288_v19 = vpop.permute.xlu1 %5287 }
 0x873   : > { %5384 = vst.msk [vmem:[#allocation5] sm:$0xff] %vm5383_vm6, %v5288_v19  ;;  %v5290_v18 = vpop.permute.xlu0 %5289 }
 0x874   : > { %5385 = vst.msk [vmem:[#allocation5 + $0x10] sm:$0xff] %vm5383_vm6, %v5290_v18  ;;  %5496 = vrot.lane.b32.xlu1 %v5424_v32, %s9859_s17 }
 0x875   : > { %5498 = vrot.lane.b32.xlu0 %v5425_v35, %s9859_s17 }
 0x876   : > { %v5481_v9 = vpop.permute.xlu1 %5480 }
 0x877   : > { %5577 = vst.msk [vmem:[#allocation5] sm:$0xff] %vm5576_vm7, %v5481_v9  ;;  %v5483_v51 = vpop.permute.xlu0 %5482 }
 0x878   : > { %5578 = vst.msk [vmem:[#allocation5 + $0x10] sm:$0xff] %vm5576_vm7, %v5483_v51  ;;  %4341 = vrot.lane.b32.xlu1 %v5422_v11, %s9838_s15 }
 0x879   : > { %4343 = vrot.lane.b32.xlu0 %v5423_v10, %s9838_s15 }
 0x87a   : > { %v4326_v15 = vpop.permute.xlu1 %4325 }
 0x87b   : > { %4420 = vst.msk [vmem:[#allocation5 + $0x20] sm:$0xff] %vm4417_vm12, %v4326_v15  ;;  %v4328_v26 = vpop.permute.xlu0 %4327 }
 0x87c   : > { %4421 = vst.msk [vmem:[#allocation5 + $0x30] sm:$0xff] %vm4417_vm12, %v4328_v26  ;;  %4534 = vrot.lane.b32.xlu1 %v8967_v52, %s6686_s27  ;;  %v6524_v52 = vpack.c.bf16 %v5684_v61, %v5682_v37 }
 0x87d   : > { %4536 = vrot.lane.b32.xlu0 %v8957_v23, %s6686_s27 }
 0x87e   : > { %v4519_v31 = vpop.permute.xlu1 %4518  ;;  %v5677_v30 = vld [vmem:[#allocation5] sm:$0xff] }
 0x87f   : > { %4613 = vst.msk [vmem:[#allocation5 + $0x20] sm:$0xff] %vm4610_vm3, %v4519_v31  ;;  %v4521_v11 = vpop.permute.xlu0 %4520  ;;  %v5679_v10 = vld [vmem:[#allocation5 + $0x10] sm:$0xff]  ;;  %v5426_v31 = vld [vmem:[#allocation3 + $0xa9] sm:$0xff] }
 0x880   : > { %4614 = vst.msk [vmem:[#allocation5 + $0x30] sm:$0xff] %vm4610_vm3, %v4521_v11  ;;  %4727 = vrot.lane.b32.xlu1 %v8971_v62, %s6683_s22  ;;  %v6522_v19 = vpack.c.bf16 %v5679_v10, %v5677_v30  ;;  %v5427_v30 = vld [vmem:[#allocation3 + $0xb1] sm:$0xff] }
 0x881   : > { %4729 = vrot.lane.b32.xlu0 %v8969_v12, %s6683_s22 }
 0x882   : > { %6523 = vmatpush1.bf16.xpose.msra.mxu1 %v6522_v19  ;;  %v4712_v23 = vpop.permute.xlu1 %4711 }
 0x883   : > { %4806 = vst.msk [vmem:[#allocation5 + $0x20] sm:$0xff] %vm4803_vm4, %v4712_v23  ;;  %6526 = vmatprep.subr.msk.bf16.mxu1 %vm8977_vm0, %v6524_v52  ;;  %v4714_v18 = vpop.permute.xlu0 %4713  ;;  %v5686_v23 = vld [vmem:[#allocation5 + $0x48] sm:$0xff] }
 0x884   : > { %4807 = vst.msk [vmem:[#allocation5 + $0x30] sm:$0xff] %vm4803_vm4, %v4714_v18  ;;  %4920 = vrot.lane.b32.xlu1 %v5424_v32, %s6687_s28  ;;  %v5688_v18 = vld [vmem:[#allocation5 + $0x58] sm:$0xff] }
 0x885   : > { %4922 = vrot.lane.b32.xlu0 %v5425_v35, %s6687_s28 }
 0x886   : > { %v4905_v62 = vpop.permute.xlu1 %4904 }
 0x887   : > { %4999 = vst.msk [vmem:[#allocation5 + $0x20] sm:$0xff] %vm4996_vm5, %v4905_v62  ;;  %v4907_v9 = vpop.permute.xlu0 %4906 }
 0x888   : > { %5000 = vst.msk [vmem:[#allocation5 + $0x30] sm:$0xff] %vm4996_vm5, %v4907_v9  ;;  %5113 = vrot.lane.b32.xlu1 %v8989_v22, %s6679_s23 }
 0x889   : > { %5115 = vrot.lane.b32.xlu0 %v8987_v50, %s6679_s23 }
 0x88a   : > { %v5098_v12 = vpop.permute.xlu1 %5097 }
 0x88b   : > { %5192 = vst.msk [vmem:[#allocation5 + $0x20] sm:$0xff] %vm5189_vm11, %v5098_v12  ;;  %v5100_v51 = vpop.permute.xlu0 %5099 }
 0x88c   : > { %5193 = vst.msk [vmem:[#allocation5 + $0x30] sm:$0xff] %vm5189_vm11, %v5100_v51  ;;  %5307 = vrot.lane.b32.xlu1 %v8995_v34, %s9837_s0 }
 0x88d   : > { %5309 = vrot.lane.b32.xlu0 %v8993_v56, %s9837_s0 }
 0x88e   : > { %v5292_v15 = vpop.permute.xlu1 %5291 }
 0x88f   : > { %5386 = vst.msk [vmem:[#allocation5 + $0x20] sm:$0xff] %vm5383_vm6, %v5292_v15  ;;  %v5294_v26 = vpop.permute.xlu0 %5293 }
 0x890   : > { %5387 = vst.msk [vmem:[#allocation5 + $0x30] sm:$0xff] %vm5383_vm6, %v5294_v26  ;;  %5500 = vrot.lane.b32.xlu1 %v5426_v31, %s9859_s17 }
 0x891   : > { %5502 = vrot.lane.b32.xlu0 %v5427_v30, %s9859_s17 }
 0x892   : > { %v5485_v37 = vpop.permute.xlu1 %5484 }
 0x893   : > { %5579 = vst.msk [vmem:[#allocation5 + $0x20] sm:$0xff] %vm5576_vm7, %v5485_v37  ;;  %v5487_v61 = vpop.permute.xlu0 %5486  ;;  %v5428_v37 = vld [vmem:[#allocation3 + $0xc1] sm:$0xff] }
 0x894   : > { %5580 = vst.msk [vmem:[#allocation5 + $0x30] sm:$0xff] %vm5576_vm7, %v5487_v61  ;;  %4345 = vrot.lane.b32.xlu1 %v5424_v32, %s9838_s15  ;;  %v5429_v61 = vld [vmem:[#allocation3 + $0xc9] sm:$0xff] }
 0x895   : > { %4347 = vrot.lane.b32.xlu0 %v5425_v35, %s9838_s15 }
 0x896   : > { %v4330_v11 = vpop.permute.xlu1 %4329 }
 0x897   : > { %4422 = vst.msk [vmem:[#allocation5 + $0x40] sm:$0xff] %vm4417_vm12, %v4330_v11  ;;  %v4332_v10 = vpop.permute.xlu0 %4331 }
 0x898   : > { %4423 = vst.msk [vmem:[#allocation5 + $0x50] sm:$0xff] %vm4417_vm12, %v4332_v10  ;;  %4538 = vrot.lane.b32.xlu1 %v8989_v22, %s6686_s27  ;;  %v6529_v22 = vpack.c.bf16 %v5688_v18, %v5686_v23 }
 0x899   : > { %4540 = vrot.lane.b32.xlu0 %v8987_v50, %s6686_s27 }
 0x89a   : > { %v4523_v19 = vpop.permute.xlu1 %4522  ;;  %v5681_v52 = vld [vmem:[#allocation5 + $0x20] sm:$0xff] }
 0x89b   : > { %4615 = vst.msk [vmem:[#allocation5 + $0x40] sm:$0xff] %vm4610_vm3, %v4523_v19  ;;  %v4525_v32 = vpop.permute.xlu0 %4524  ;;  %v5683_v35 = vld [vmem:[#allocation5 + $0x30] sm:$0xff] }
 0x89c   : > { %4616 = vst.msk [vmem:[#allocation5 + $0x50] sm:$0xff] %vm4610_vm3, %v4525_v32  ;;  %4731 = vrot.lane.b32.xlu1 %v8995_v34, %s6683_s22  ;;  %v6527_v62 = vpack.c.bf16 %v5683_v35, %v5681_v52  ;;  %v5690_v32 = vld [vmem:[#allocation5 + $0x68] sm:$0xff]  ;;  %v5692_v35 = vld [vmem:[#allocation5 + $0x78] sm:$0xff] }
 0x89d   : > { %4733 = vrot.lane.b32.xlu0 %v8993_v56, %s6683_s22 }
 0x89e   : > { %6528 = vmatpush1.bf16.xpose.msra.mxu1 %v6527_v62  ;;  %v4716_v50 = vpop.permute.xlu1 %4715 }
 0x89f   : > { %4808 = vst.msk [vmem:[#allocation5 + $0x40] sm:$0xff] %vm4803_vm4, %v4716_v50  ;;  %6531 = vmatprep.subr.msk.bf16.mxu1 %vm8977_vm0, %v6529_v22  ;;  %v4718_v9 = vpop.permute.xlu0 %4717 }
 0x8a0   : > { %4809 = vst.msk [vmem:[#allocation5 + $0x50] sm:$0xff] %vm4803_vm4, %v4718_v9  ;;  %4924 = vrot.lane.b32.xlu1 %v5426_v31, %s6687_s28 }
 0x8a1   : > { %4926 = vrot.lane.b32.xlu0 %v5427_v30, %s6687_s28 }
 0x8a2   : > { %v4909_v34 = vpop.permute.xlu1 %4908 }
 0x8a3   : > { %5001 = vst.msk [vmem:[#allocation5 + $0x40] sm:$0xff] %vm4996_vm5, %v4909_v34  ;;  %v4911_v12 = vpop.permute.xlu0 %4910 }
 0x8a4   : > { %5002 = vst.msk [vmem:[#allocation5 + $0x50] sm:$0xff] %vm4996_vm5, %v4911_v12  ;;  %5117 = vrot.lane.b32.xlu1 %v9011_v40, %s6679_s23 }
 0x8a5   : > { %5119 = vrot.lane.b32.xlu0 %v9009_v57, %s6679_s23 }
 0x8a6   : > { %v5102_v56 = vpop.permute.xlu1 %5101 }
 0x8a7   : > { %5194 = vst.msk [vmem:[#allocation5 + $0x40] sm:$0xff] %vm5189_vm11, %v5102_v56  ;;  %v5104_v51 = vpop.permute.xlu0 %5103  ;;  %v5430_v56 = vld [vmem:[#allocation3 + $0xd9] sm:$0xff] }
 0x8a8   : > { %5195 = vst.msk [vmem:[#allocation5 + $0x50] sm:$0xff] %vm5189_vm11, %v5104_v51  ;;  %5311 = vrot.lane.b32.xlu1 %v9017_v33, %s9837_s0  ;;  %v5431_v51 = vld [vmem:[#allocation3 + $0xe1] sm:$0xff] }
 0x8a9   : > { %5313 = vrot.lane.b32.xlu0 %v9015_v20, %s9837_s0 }
 0x8aa   : > { %v5296_v15 = vpop.permute.xlu1 %5295 }
 0x8ab   : > { %5388 = vst.msk [vmem:[#allocation5 + $0x40] sm:$0xff] %vm5383_vm6, %v5296_v15  ;;  %v5298_v26 = vpop.permute.xlu0 %5297 }
 0x8ac   : > { %5389 = vst.msk [vmem:[#allocation5 + $0x50] sm:$0xff] %vm5383_vm6, %v5298_v26  ;;  %5504 = vrot.lane.b32.xlu1 %v5428_v37, %s9859_s17 }
 0x8ad   : > { %5506 = vrot.lane.b32.xlu0 %v5429_v61, %s9859_s17 }
 0x8ae   : > { %v5489_v11 = vpop.permute.xlu1 %5488 }
 0x8af   : > { %5581 = vst.msk [vmem:[#allocation5 + $0x40] sm:$0xff] %vm5576_vm7, %v5489_v11  ;;  %v5491_v10 = vpop.permute.xlu0 %5490 }
 0x8b0   : > { %5582 = vst.msk [vmem:[#allocation5 + $0x50] sm:$0xff] %vm5576_vm7, %v5491_v10  ;;  %4349 = vrot.lane.b32.xlu1 %v5426_v31, %s9838_s15 }
 0x8b1   : > { %4351 = vrot.lane.b32.xlu0 %v5427_v30, %s9838_s15 }
 0x8b2   : > { %v4334_v19 = vpop.permute.xlu1 %4333 }
 0x8b3   : > { %4424 = vst.msk [vmem:[#allocation5 + $0x60] sm:$0xff] %vm4417_vm12, %v4334_v19  ;;  %v4336_v52 = vpop.permute.xlu0 %4335 }
 0x8b4   : > { %4425 = vst.msk [vmem:[#allocation5 + $0x70] sm:$0xff] %vm4417_vm12, %v4336_v52  ;;  %4542 = vrot.lane.b32.xlu1 %v9011_v40, %s6686_s27  ;;  %v6534_v40 = vpack.c.bf16 %v5692_v35, %v5690_v32 }
 0x8b5   : > { %4544 = vrot.lane.b32.xlu0 %v9009_v57, %s6686_s27 }
 0x8b6   : > { %v4527_v23 = vpop.permute.xlu1 %4526  ;;  %v5685_v18 = vld [vmem:[#allocation5 + $0x40] sm:$0xff] }
 0x8b7   : > { %4617 = vst.msk [vmem:[#allocation5 + $0x60] sm:$0xff] %vm4610_vm3, %v4527_v23  ;;  %v4529_v31 = vpop.permute.xlu0 %4528  ;;  %v5687_v30 = vld [vmem:[#allocation5 + $0x50] sm:$0xff]  ;;  %v5694_v23 = vld [vmem:[#allocation5 + $0x88] sm:$0xff] }
 0x8b8   : > { %4618 = vst.msk [vmem:[#allocation5 + $0x70] sm:$0xff] %vm4610_vm3, %v4529_v31  ;;  %4735 = vrot.lane.b32.xlu1 %v9017_v33, %s6683_s22  ;;  %v6532_v62 = vpack.c.bf16 %v5687_v30, %v5685_v18  ;;  %v5696_v18 = vld [vmem:[#allocation5 + $0x98] sm:$0xff] }
 0x8b9   : > { %4737 = vrot.lane.b32.xlu0 %v9015_v20, %s6683_s22 }
 0x8ba   : > { %6533 = vmatpush1.bf16.xpose.msra.mxu1 %v6532_v62  ;;  %v4720_v57 = vpop.permute.xlu1 %4719 }
 0x8bb   : > { %4810 = vst.msk [vmem:[#allocation5 + $0x60] sm:$0xff] %vm4803_vm4, %v4720_v57  ;;  %6536 = vmatprep.subr.msk.bf16.mxu1 %vm8977_vm0, %v6534_v40  ;;  %v4722_v22 = vpop.permute.xlu0 %4721  ;;  %v5432_v57 = vld [vmem:[#allocation3 + $0xf1] sm:$0xff] }
 0x8bc   : > { %4811 = vst.msk [vmem:[#allocation5 + $0x70] sm:$0xff] %vm4803_vm4, %v4722_v22  ;;  %4928 = vrot.lane.b32.xlu1 %v5428_v37, %s6687_s28  ;;  %v5433_v22 = vld [vmem:[#allocation3 + $0xf9] sm:$0xff] }
 0x8bd   : > { %4930 = vrot.lane.b32.xlu0 %v5429_v61, %s6687_s28 }
 0x8be   : > { %v4913_v33 = vpop.permute.xlu1 %4912 }
 0x8bf   : > { %5003 = vst.msk [vmem:[#allocation5 + $0x60] sm:$0xff] %vm4996_vm5, %v4913_v33  ;;  %v4915_v50 = vpop.permute.xlu0 %4914 }
 0x8c0   : > { %5004 = vst.msk [vmem:[#allocation5 + $0x70] sm:$0xff] %vm4996_vm5, %v4915_v50  ;;  %5121 = vrot.lane.b32.xlu1 %v9033_v28, %s6679_s23 }
 0x8c1   : > { %5123 = vrot.lane.b32.xlu0 %v9035_v29, %s6679_s23 }
 0x8c2   : > { %v5106_v20 = vpop.permute.xlu1 %5105 }
 0x8c3   : > { %5196 = vst.msk [vmem:[#allocation5 + $0x60] sm:$0xff] %vm5189_vm11, %v5106_v20  ;;  %v5108_v9 = vpop.permute.xlu0 %5107 }
 0x8c4   : > { %5197 = vst.msk [vmem:[#allocation5 + $0x70] sm:$0xff] %vm5189_vm11, %v5108_v9  ;;  %5315 = vrot.lane.b32.xlu1 %v9037_v39, %s9837_s0 }
 0x8c5   : > { %5317 = vrot.lane.b32.xlu0 %v9039_v47, %s9837_s0 }
 0x8c6   : > { %v5300_v34 = vpop.permute.xlu1 %5299 }
 0x8c7   : > { %5390 = vst.msk [vmem:[#allocation5 + $0x60] sm:$0xff] %vm5383_vm6, %v5300_v34  ;;  %v5302_v12 = vpop.permute.xlu0 %5301 }
 0x8c8   : > { %5391 = vst.msk [vmem:[#allocation5 + $0x70] sm:$0xff] %vm5383_vm6, %v5302_v12  ;;  %5508 = vrot.lane.b32.xlu1 %v5430_v56, %s9859_s17 }
 0x8c9   : > { %5510 = vrot.lane.b32.xlu0 %v5431_v51, %s9859_s17 }
 0x8ca   : > { %v5493_v15 = vpop.permute.xlu1 %5492 }
 0x8cb   : > { %5583 = vst.msk [vmem:[#allocation5 + $0x60] sm:$0xff] %vm5576_vm7, %v5493_v15  ;;  %v5495_v26 = vpop.permute.xlu0 %5494  ;;  %v5698_v15 = vld [vmem:[#allocation5 + $0xa8] sm:$0xff] }
 0x8cc   : > { %5584 = vst.msk [vmem:[#allocation5 + $0x70] sm:$0xff] %vm5576_vm7, %v5495_v26  ;;  %4353 = vrot.lane.b32.xlu1 %v5428_v37, %s9838_s15  ;;  %v5700_v26 = vld [vmem:[#allocation5 + $0xb8] sm:$0xff] }
 0x8cd   : > { %4355 = vrot.lane.b32.xlu0 %v5429_v61, %s9838_s15 }
 0x8ce   : > { %v4338_v11 = vpop.permute.xlu1 %4337 }
 0x8cf   : > { %4426 = vst.msk [vmem:[#allocation5 + $0x80] sm:$0xff] %vm4417_vm12, %v4338_v11  ;;  %v4340_v10 = vpop.permute.xlu0 %4339 }
 0x8d0   : > { %4427 = vst.msk [vmem:[#allocation5 + $0x90] sm:$0xff] %vm4417_vm12, %v4340_v10  ;;  %4546 = vrot.lane.b32.xlu1 %v9033_v28, %s6686_s27  ;;  %v6539_v28 = vpack.c.bf16 %v5696_v18, %v5694_v23 }
 0x8d1   : > { %4548 = vrot.lane.b32.xlu0 %v9035_v29, %s6686_s27 }
 0x8d2   : > { %v4531_v19 = vpop.permute.xlu1 %4530  ;;  %v5689_v52 = vld [vmem:[#allocation5 + $0x60] sm:$0xff] }
 0x8d3   : > { %4619 = vst.msk [vmem:[#allocation5 + $0x80] sm:$0xff] %vm4610_vm3, %v4531_v19  ;;  %v4533_v37 = vpop.permute.xlu0 %4532  ;;  %v5691_v61 = vld [vmem:[#allocation5 + $0x70] sm:$0xff] }
 0x8d4   : > { %4620 = vst.msk [vmem:[#allocation5 + $0x90] sm:$0xff] %vm4610_vm3, %v4533_v37  ;;  %4739 = vrot.lane.b32.xlu1 %v9037_v39, %s6683_s22  ;;  %v6537_v32 = vpack.c.bf16 %v5691_v61, %v5689_v52  ;;  %v5434_v37 = vld [vmem:[#allocation3 + $0x109] sm:$0xff]  ;;  %v5435_v61 = vld [vmem:[#allocation3 + $0x111] sm:$0xff] }
 0x8d5   : > { %4741 = vrot.lane.b32.xlu0 %v9039_v47, %s6683_s22 }
 0x8d6   : > { %6538 = vmatpush1.bf16.xpose.msra.mxu1 %v6537_v32  ;;  %v4724_v29 = vpop.permute.xlu1 %4723 }
 0x8d7   : > { %4812 = vst.msk [vmem:[#allocation5 + $0x80] sm:$0xff] %vm4803_vm4, %v4724_v29  ;;  %6541 = vmatprep.subr.msk.bf16.mxu1 %vm8977_vm0, %v6539_v28  ;;  %v4726_v35 = vpop.permute.xlu0 %4725 }
 0x8d8   : > { %4813 = vst.msk [vmem:[#allocation5 + $0x90] sm:$0xff] %vm4803_vm4, %v4726_v35  ;;  %4932 = vrot.lane.b32.xlu1 %v5430_v56, %s6687_s28 }
 0x8d9   : > { %4934 = vrot.lane.b32.xlu0 %v5431_v51, %s6687_s28 }
 0x8da   : > { %v4917_v39 = vpop.permute.xlu1 %4916 }
 0x8db   : > { %5005 = vst.msk [vmem:[#allocation5 + $0x80] sm:$0xff] %vm4996_vm5, %v4917_v39  ;;  %v4919_v31 = vpop.permute.xlu0 %4918 }
 0x8dc   : > { %5006 = vst.msk [vmem:[#allocation5 + $0x90] sm:$0xff] %vm4996_vm5, %v4919_v31  ;;  %5125 = vrot.lane.b32.xlu1 %v9051_v14, %s6679_s23 }
 0x8dd   : > { %5127 = vrot.lane.b32.xlu0 %v9053_v13, %s6679_s23 }
 0x8de   : > { %v5110_v47 = vpop.permute.xlu1 %5109 }
 0x8df   : > { %5198 = vst.msk [vmem:[#allocation5 + $0x80] sm:$0xff] %vm5189_vm11, %v5110_v47  ;;  %v5112_v30 = vpop.permute.xlu0 %5111  ;;  %v5702_v47 = vld [vmem:[#allocation5 + $0xc8] sm:$0xff] }
 0x8e0   : > { %5199 = vst.msk [vmem:[#allocation5 + $0x90] sm:$0xff] %vm5189_vm11, %v5112_v30  ;;  %5319 = vrot.lane.b32.xlu1 %v9055_v46, %s9837_s0  ;;  %v5704_v30 = vld [vmem:[#allocation5 + $0xd8] sm:$0xff] }
 0x8e1   : > { %5321 = vrot.lane.b32.xlu0 %v9059_v8, %s9837_s0 }
 0x8e2   : > { %v5304_v62 = vpop.permute.xlu1 %5303 }
 0x8e3   : > { %5392 = vst.msk [vmem:[#allocation5 + $0x80] sm:$0xff] %vm5383_vm6, %v5304_v62  ;;  %v5306_v40 = vpop.permute.xlu0 %5305 }
 0x8e4   : > { %5393 = vst.msk [vmem:[#allocation5 + $0x90] sm:$0xff] %vm5383_vm6, %v5306_v40  ;;  %5512 = vrot.lane.b32.xlu1 %v5432_v57, %s9859_s17 }
 0x8e5   : > { %5514 = vrot.lane.b32.xlu0 %v5433_v22, %s9859_s17 }
 0x8e6   : > { %v5497_v33 = vpop.permute.xlu1 %5496 }
 0x8e7   : > { %5585 = vst.msk [vmem:[#allocation5 + $0x80] sm:$0xff] %vm5576_vm7, %v5497_v33  ;;  %v5499_v50 = vpop.permute.xlu0 %5498 }
 0x8e8   : > { %5586 = vst.msk [vmem:[#allocation5 + $0x90] sm:$0xff] %vm5576_vm7, %v5499_v50  ;;  %4357 = vrot.lane.b32.xlu1 %v5430_v56, %s9838_s15 }
 0x8e9   : > { %4359 = vrot.lane.b32.xlu0 %v5431_v51, %s9838_s15 }
 0x8ea   : > { %v4342_v20 = vpop.permute.xlu1 %4341 }
 0x8eb   : > { %4428 = vst.msk [vmem:[#allocation5 + $0xa0] sm:$0xff] %vm4417_vm12, %v4342_v20  ;;  %v4344_v9 = vpop.permute.xlu0 %4343 }
 0x8ec   : > { %4429 = vst.msk [vmem:[#allocation5 + $0xb0] sm:$0xff] %vm4417_vm12, %v4344_v9  ;;  %4550 = vrot.lane.b32.xlu1 %v9051_v14, %s6686_s27  ;;  %v6544_v14 = vpack.c.bf16 %v5700_v26, %v5698_v15 }
 0x8ed   : > { %4552 = vrot.lane.b32.xlu0 %v9053_v13, %s6686_s27 }
 0x8ee   : > { %v4535_v34 = vpop.permute.xlu1 %4534  ;;  %v5693_v12 = vld [vmem:[#allocation5 + $0x80] sm:$0xff] }
 0x8ef   : > { %4621 = vst.msk [vmem:[#allocation5 + $0xa0] sm:$0xff] %vm4610_vm3, %v4535_v34  ;;  %v4537_v56 = vpop.permute.xlu0 %4536  ;;  %v5695_v51 = vld [vmem:[#allocation5 + $0x90] sm:$0xff] }
 0x8f0   : > { %4622 = vst.msk [vmem:[#allocation5 + $0xb0] sm:$0xff] %vm4610_vm3, %v4537_v56  ;;  %4743 = vrot.lane.b32.xlu1 %v9055_v46, %s6683_s22  ;;  %v6542_v11 = vpack.c.bf16 %v5695_v51, %v5693_v12  ;;  %v5436_v34 = vld [vmem:[#allocation3 + $0x121] sm:$0xff]  ;;  %v5437_v12 = vld [vmem:[#allocation3 + $0x129] sm:$0xff] }
 0x8f1   : > { %4745 = vrot.lane.b32.xlu0 %v9059_v8, %s6683_s22 }
 0x8f2   : > { %6543 = vmatpush1.bf16.xpose.msra.mxu1 %v6542_v11  ;;  %v4728_v13 = vpop.permute.xlu1 %4727 }
 0x8f3   : > { %4814 = vst.msk [vmem:[#allocation5 + $0xa0] sm:$0xff] %vm4803_vm4, %v4728_v13  ;;  %6546 = vmatprep.subr.msk.bf16.mxu1 %vm8977_vm0, %v6544_v14  ;;  %v4730_v10 = vpop.permute.xlu0 %4729  ;;  %v5706_v13 = vld [vmem:[#allocation5 + $0xe8] sm:$0xff] }
 0x8f4   : > { %4815 = vst.msk [vmem:[#allocation5 + $0xb0] sm:$0xff] %vm4803_vm4, %v4730_v10  ;;  %4936 = vrot.lane.b32.xlu1 %v5432_v57, %s6687_s28  ;;  %v5708_v10 = vld [vmem:[#allocation5 + $0xf8] sm:$0xff] }
 0x8f5   : > { %4938 = vrot.lane.b32.xlu0 %v5433_v22, %s6687_s28 }
 0x8f6   : > { %v4921_v46 = vpop.permute.xlu1 %4920 }
 0x8f7   : > { %5007 = vst.msk [vmem:[#allocation5 + $0xa0] sm:$0xff] %vm4996_vm5, %v4921_v46  ;;  %v4923_v19 = vpop.permute.xlu0 %4922 }
 0x8f8   : > { %5008 = vst.msk [vmem:[#allocation5 + $0xb0] sm:$0xff] %vm4996_vm5, %v4923_v19  ;;  %5129 = vrot.lane.b32.xlu1 %v9067_v36, %s6679_s23 }
 0x8f9   : > { %5131 = vrot.lane.b32.xlu0 %v9071_v2, %s6679_s23 }
 0x8fa   : > { %v5114_v8 = vpop.permute.xlu1 %5113 }
 0x8fb   : > { %5200 = vst.msk [vmem:[#allocation5 + $0xa0] sm:$0xff] %vm5189_vm11, %v5114_v8  ;;  %v5116_v52 = vpop.permute.xlu0 %5115 }
 0x8fc   : > { %5201 = vst.msk [vmem:[#allocation5 + $0xb0] sm:$0xff] %vm5189_vm11, %v5116_v52  ;;  %5323 = vrot.lane.b32.xlu1 %v9073_v5, %s9837_s0 }
 0x8fd   : > { %5325 = vrot.lane.b32.xlu0 %v9075_v63, %s9837_s0 }
 0x8fe   : > { %v5308_v23 = vpop.permute.xlu1 %5307 }
 0x8ff   : > { %5394 = vst.msk [vmem:[#allocation5 + $0xa0] sm:$0xff] %vm5383_vm6, %v5308_v23  ;;  %v5310_v18 = vpop.permute.xlu0 %5309 }
 0x900   : > { %5395 = vst.msk [vmem:[#allocation5 + $0xb0] sm:$0xff] %vm5383_vm6, %v5310_v18  ;;  %5516 = vrot.lane.b32.xlu1 %v5434_v37, %s9859_s17 }
 0x901   : > { %5518 = vrot.lane.b32.xlu0 %v5435_v61, %s9859_s17 }
 0x902   : > { %v5501_v32 = vpop.permute.xlu1 %5500 }
 0x903   : > { %5587 = vst.msk [vmem:[#allocation5 + $0xa0] sm:$0xff] %vm5576_vm7, %v5501_v32  ;;  %v5503_v28 = vpop.permute.xlu0 %5502  ;;  %v5438_v32 = vld [vmem:[#allocation3 + $0x139] sm:$0xff] }
 0x904   : > { %5588 = vst.msk [vmem:[#allocation5 + $0xb0] sm:$0xff] %vm5576_vm7, %v5503_v28  ;;  %4361 = vrot.lane.b32.xlu1 %v5432_v57, %s9838_s15  ;;  %v5439_v28 = vld [vmem:[#allocation3 + $0x141] sm:$0xff] }
 0x905   : > { %4363 = vrot.lane.b32.xlu0 %v5433_v22, %s9838_s15 }
 0x906   : > { %v4346_v29 = vpop.permute.xlu1 %4345 }
 0x907   : > { %4430 = vst.msk [vmem:[#allocation5 + $0xc0] sm:$0xff] %vm4417_vm12, %v4346_v29  ;;  %v4348_v35 = vpop.permute.xlu0 %4347 }
 0x908   : > { %4431 = vst.msk [vmem:[#allocation5 + $0xd0] sm:$0xff] %vm4417_vm12, %v4348_v35  ;;  %4554 = vrot.lane.b32.xlu1 %v9067_v36, %s6686_s27  ;;  %v6549_v36 = vpack.c.bf16 %v5704_v30, %v5702_v47 }
 0x909   : > { %4556 = vrot.lane.b32.xlu0 %v9071_v2, %s6686_s27 }
 0x90a   : > { %v4539_v39 = vpop.permute.xlu1 %4538  ;;  %v5697_v31 = vld [vmem:[#allocation5 + $0xa0] sm:$0xff] }
 0x90b   : > { %4623 = vst.msk [vmem:[#allocation5 + $0xc0] sm:$0xff] %vm4610_vm3, %v4539_v39  ;;  %v4541_v62 = vpop.permute.xlu0 %4540  ;;  %v5699_v40 = vld [vmem:[#allocation5 + $0xb0] sm:$0xff] }
 0x90c   : > { %4624 = vst.msk [vmem:[#allocation5 + $0xd0] sm:$0xff] %vm4610_vm3, %v4541_v62  ;;  %4747 = vrot.lane.b32.xlu1 %v9073_v5, %s6683_s22  ;;  %v6547_v57 = vpack.c.bf16 %v5699_v40, %v5697_v31  ;;  %v5710_v62 = vld [vmem:[#allocation5 + $0x108] sm:$0xff]  ;;  %v5712_v40 = vld [vmem:[#allocation5 + $0x118] sm:$0xff] }
 0x90d   : > { %4749 = vrot.lane.b32.xlu0 %v9075_v63, %s6683_s22 }
 0x90e   : > { %6548 = vmatpush1.bf16.xpose.msra.mxu1 %v6547_v57  ;;  %v4732_v2 = vpop.permute.xlu1 %4731 }
 0x90f   : > { %4816 = vst.msk [vmem:[#allocation5 + $0xc0] sm:$0xff] %vm4803_vm4, %v4732_v2  ;;  %6551 = vmatprep.subr.msk.bf16.mxu1 %vm8977_vm0, %v6549_v36  ;;  %v4734_v22 = vpop.permute.xlu0 %4733 }
 0x910   : > { %4817 = vst.msk [vmem:[#allocation5 + $0xd0] sm:$0xff] %vm4803_vm4, %v4734_v22  ;;  %4940 = vrot.lane.b32.xlu1 %v5434_v37, %s6687_s28 }
 0x911   : > { %4942 = vrot.lane.b32.xlu0 %v5435_v61, %s6687_s28 }
 0x912   : > { %v4925_v5 = vpop.permute.xlu1 %4924 }
 0x913   : > { %5009 = vst.msk [vmem:[#allocation5 + $0xc0] sm:$0xff] %vm4996_vm5, %v4925_v5  ;;  %v4927_v33 = vpop.permute.xlu0 %4926 }
 0x914   : > { %5010 = vst.msk [vmem:[#allocation5 + $0xd0] sm:$0xff] %vm4996_vm5, %v4927_v33  ;;  %5133 = vrot.lane.b32.xlu1 %v9081_v55, %s6679_s23 }
 0x915   : > { %5135 = vrot.lane.b32.xlu0 %v9091_v25, %s6679_s23 }
 0x916   : > { %v5118_v63 = vpop.permute.xlu1 %5117 }
 0x917   : > { %5202 = vst.msk [vmem:[#allocation5 + $0xc0] sm:$0xff] %vm5189_vm11, %v5118_v63  ;;  %v5120_v50 = vpop.permute.xlu0 %5119 }
 0x918   : > { %5203 = vst.msk [vmem:[#allocation5 + $0xd0] sm:$0xff] %vm5189_vm11, %v5120_v50  ;;  %5327 = vrot.lane.b32.xlu1 %v9095_v53, %s9837_s0 }
 0x919   : > { %5329 = vrot.lane.b32.xlu0 %v9097_v4, %s9837_s0 }
 0x91a   : > { %v5312_v20 = vpop.permute.xlu1 %5311 }
 0x91b   : > { %5396 = vst.msk [vmem:[#allocation5 + $0xc0] sm:$0xff] %vm5383_vm6, %v5312_v20  ;;  %v5314_v9 = vpop.permute.xlu0 %5313  ;;  %v5440_v20 = vld [vmem:[#allocation3 + $0x151] sm:$0xff] }
 0x91c   : > { %5397 = vst.msk [vmem:[#allocation5 + $0xd0] sm:$0xff] %vm5383_vm6, %v5314_v9  ;;  %5520 = vrot.lane.b32.xlu1 %v5436_v34, %s9859_s17  ;;  %v5441_v9 = vld [vmem:[#allocation3 + $0x159] sm:$0xff] }
 0x91d   : > { %5522 = vrot.lane.b32.xlu0 %v5437_v12, %s9859_s17 }
 0x91e   : > { %v5505_v15 = vpop.permute.xlu1 %5504 }
 0x91f   : > { %5589 = vst.msk [vmem:[#allocation5 + $0xc0] sm:$0xff] %vm5576_vm7, %v5505_v15  ;;  %v5507_v26 = vpop.permute.xlu0 %5506 }
 0x920   : > { %5590 = vst.msk [vmem:[#allocation5 + $0xd0] sm:$0xff] %vm5576_vm7, %v5507_v26  ;;  %4365 = vrot.lane.b32.xlu1 %v5434_v37, %s9838_s15 }
 0x921   : > { %4367 = vrot.lane.b32.xlu0 %v5435_v61, %s9838_s15 }
 0x922   : > { %v4350_v56 = vpop.permute.xlu1 %4349 }
 0x923   : > { %4432 = vst.msk [vmem:[#allocation5 + $0xe0] sm:$0xff] %vm4417_vm12, %v4350_v56  ;;  %v4352_v51 = vpop.permute.xlu0 %4351 }
 0x924   : > { %4433 = vst.msk [vmem:[#allocation5 + $0xf0] sm:$0xff] %vm4417_vm12, %v4352_v51  ;;  %4558 = vrot.lane.b32.xlu1 %v9081_v55, %s6686_s27  ;;  %v6554_v55 = vpack.c.bf16 %v5708_v10, %v5706_v13 }
 0x925   : > { %4560 = vrot.lane.b32.xlu0 %v9091_v25, %s6686_s27 }
 0x926   : > { %v4543_v11 = vpop.permute.xlu1 %4542  ;;  %v5701_v14 = vld [vmem:[#allocation5 + $0xc0] sm:$0xff] }
 0x927   : > { %4625 = vst.msk [vmem:[#allocation5 + $0xe0] sm:$0xff] %vm4610_vm3, %v4543_v11  ;;  %v4545_v46 = vpop.permute.xlu0 %4544  ;;  %v5703_v19 = vld [vmem:[#allocation5 + $0xd0] sm:$0xff]  ;;  %v5714_v11 = vld [vmem:[#allocation5 + $0x128] sm:$0xff] }
 0x928   : > { %4626 = vst.msk [vmem:[#allocation5 + $0xf0] sm:$0xff] %vm4610_vm3, %v4545_v46  ;;  %4751 = vrot.lane.b32.xlu1 %v9095_v53, %s6683_s22  ;;  %v6552_v8 = vpack.c.bf16 %v5703_v19, %v5701_v14  ;;  %v5716_v14 = vld [vmem:[#allocation5 + $0x138] sm:$0xff] }
 0x929   : > { %4753 = vrot.lane.b32.xlu0 %v9097_v4, %s6683_s22 }
 0x92a   : > { %6553 = vmatpush1.bf16.xpose.msra.mxu1 %v6552_v8  ;;  %v4736_v25 = vpop.permute.xlu1 %4735 }
 0x92b   : > { %4818 = vst.msk [vmem:[#allocation5 + $0xe0] sm:$0xff] %vm4803_vm4, %v4736_v25  ;;  %6556 = vmatprep.subr.msk.bf16.mxu1 %vm8977_vm0, %v6554_v55  ;;  %v4738_v52 = vpop.permute.xlu0 %4737 }
 0x92c   : > { %4819 = vst.msk [vmem:[#allocation5 + $0xf0] sm:$0xff] %vm4803_vm4, %v4738_v52  ;;  %4944 = vrot.lane.b32.xlu1 %v5436_v34, %s6687_s28 }
 0x92d   : > { %4946 = vrot.lane.b32.xlu0 %v5437_v12, %s6687_s28 }
 0x92e   : > { %v4929_v53 = vpop.permute.xlu1 %4928 }
 0x92f   : > { %5011 = vst.msk [vmem:[#allocation5 + $0xe0] sm:$0xff] %vm4996_vm5, %v4929_v53  ;;  %v4931_v23 = vpop.permute.xlu0 %4930  ;;  %v9606_v53 = vld [vmem:[#allocation3 + $0x169] sm:$0xff] }
 0x930   : > { %5012 = vst.msk [vmem:[#allocation5 + $0xf0] sm:$0xff] %vm4996_vm5, %v4931_v23  ;;  %5137 = vrot.lane.b32.xlu1 %v9101_v54, %s6679_s23  ;;  %v5443_v23 = vld [vmem:[#allocation3 + $0x171] sm:$0xff] }
 0x931   : > { %5139 = vrot.lane.b32.xlu0 %v9103_v45, %s6679_s23 }
 0x932   : > { %v5122_v4 = vpop.permute.xlu1 %5121 }
 0x933   : > { %5204 = vst.msk [vmem:[#allocation5 + $0xe0] sm:$0xff] %vm5189_vm11, %v5122_v4  ;;  %v5124_v18 = vpop.permute.xlu0 %5123 }
 0x934   : > { %5205 = vst.msk [vmem:[#allocation5 + $0xf0] sm:$0xff] %vm5189_vm11, %v5124_v18  ;;  %5331 = vrot.lane.b32.xlu1 %v9111_v42, %s9837_s0 }
 0x935   : > { %5333 = vrot.lane.b32.xlu0 %v9119_v41, %s9837_s0 }
 0x936   : > { %v5316_v37 = vpop.permute.xlu1 %5315 }
 0x937   : > { %5398 = vst.msk [vmem:[#allocation5 + $0xe0] sm:$0xff] %vm5383_vm6, %v5316_v37  ;;  %v5318_v61 = vpop.permute.xlu0 %5317 }
 0x938   : > { %5399 = vst.msk [vmem:[#allocation5 + $0xf0] sm:$0xff] %vm5383_vm6, %v5318_v61  ;;  %5524 = vrot.lane.b32.xlu1 %v5438_v32, %s9859_s17 }
 0x939   : > { %5526 = vrot.lane.b32.xlu0 %v5439_v28, %s9859_s17 }
 0x93a   : > { %v5509_v29 = vpop.permute.xlu1 %5508 }
 0x93b   : > { %5591 = vst.msk [vmem:[#allocation5 + $0xe0] sm:$0xff] %vm5576_vm7, %v5509_v29  ;;  %v5511_v35 = vpop.permute.xlu0 %5510  ;;  %v5718_v29 = vld [vmem:[#allocation5 + $0x148] sm:$0xff] }
 0x93c   : > { %5592 = vst.msk [vmem:[#allocation5 + $0xf0] sm:$0xff] %vm5576_vm7, %v5511_v35  ;;  %4369 = vrot.lane.b32.xlu1 %v5436_v34, %s9838_s15  ;;  %v5720_v35 = vld [vmem:[#allocation5 + $0x158] sm:$0xff] }
 0x93d   : > { %4371 = vrot.lane.b32.xlu0 %v5437_v12, %s9838_s15 }
 0x93e   : > { %v4354_v39 = vpop.permute.xlu1 %4353 }
 0x93f   : > { %4434 = vst.msk [vmem:[#allocation5 + $0x100] sm:$0xff] %vm4417_vm12, %v4354_v39  ;;  %v4356_v31 = vpop.permute.xlu0 %4355 }
 0x940   : > { %4435 = vst.msk [vmem:[#allocation5 + $0x110] sm:$0xff] %vm4417_vm12, %v4356_v31  ;;  %4562 = vrot.lane.b32.xlu1 %v9101_v54, %s6686_s27  ;;  %v6559_v54 = vpack.c.bf16 %v5712_v40, %v5710_v62 }
 0x941   : > { %4564 = vrot.lane.b32.xlu0 %v9103_v45, %s6686_s27 }
 0x942   : > { %v4547_v47 = vpop.permute.xlu1 %4546  ;;  %v5705_v30 = vld [vmem:[#allocation5 + $0xe0] sm:$0xff] }
 0x943   : > { %4627 = vst.msk [vmem:[#allocation5 + $0x100] sm:$0xff] %vm4610_vm3, %v4547_v47  ;;  %v4549_v57 = vpop.permute.xlu0 %4548  ;;  %v5707_v36 = vld [vmem:[#allocation5 + $0xf0] sm:$0xff] }
 0x944   : > { %4628 = vst.msk [vmem:[#allocation5 + $0x110] sm:$0xff] %vm4610_vm3, %v4549_v57  ;;  %4755 = vrot.lane.b32.xlu1 %v9111_v42, %s6683_s22  ;;  %v6557_v2 = vpack.c.bf16 %v5707_v36, %v5705_v30  ;;  %v5251_v57 = vld [vmem:[#allocation3 + $0x180] sm:$0xff]  ;;  %v5252_v36 = vld [vmem:[#allocation3 + $0x188] sm:$0xff] }
 0x945   : > { %4757 = vrot.lane.b32.xlu0 %v9119_v41, %s6683_s22 }
 0x946   : > { %6558 = vmatpush1.bf16.xpose.msra.mxu1 %v6557_v2  ;;  %v4740_v45 = vpop.permute.xlu1 %4739 }
 0x947   : > { %4820 = vst.msk [vmem:[#allocation5 + $0x100] sm:$0xff] %vm4803_vm4, %v4740_v45  ;;  %6561 = vmatprep.subr.msk.bf16.mxu1 %vm8977_vm0, %v6559_v54  ;;  %v4742_v22 = vpop.permute.xlu0 %4741  ;;  %v5444_v45 = vld [vmem:[#allocation3 + $0x181] sm:$0xff] }
 0x948   : > { %4821 = vst.msk [vmem:[#allocation5 + $0x110] sm:$0xff] %vm4803_vm4, %v4742_v22  ;;  %4948 = vrot.lane.b32.xlu1 %v5438_v32, %s6687_s28  ;;  %v5445_v22 = vld [vmem:[#allocation3 + $0x189] sm:$0xff] }
 0x949   : > { %4950 = vrot.lane.b32.xlu0 %v5439_v28, %s6687_s28 }
 0x94a   : > { %v4933_v42 = vpop.permute.xlu1 %4932 }
 0x94b   : > { %5013 = vst.msk [vmem:[#allocation5 + $0x100] sm:$0xff] %vm4996_vm5, %v4933_v42  ;;  %v4935_v5 = vpop.permute.xlu0 %4934 }
 0x94c   : > { %5014 = vst.msk [vmem:[#allocation5 + $0x110] sm:$0xff] %vm4996_vm5, %v4935_v5  ;;  %5141 = vrot.lane.b32.xlu1 %v9123_v27, %s6679_s23 }
 0x94d   : > { %5143 = vrot.lane.b32.xlu0 %v9125_v38, %s6679_s23 }
 0x94e   : > { %v5126_v41 = vpop.permute.xlu1 %5125 }
 0x94f   : > { %5206 = vst.msk [vmem:[#allocation5 + $0x100] sm:$0xff] %vm5189_vm11, %v5126_v41  ;;  %v5128_v33 = vpop.permute.xlu0 %5127 }
 0x950   : > { %5207 = vst.msk [vmem:[#allocation5 + $0x110] sm:$0xff] %vm5189_vm11, %v5128_v33  ;;  %5335 = vrot.lane.b32.xlu1 %v9129_v17, %s9837_s0 }
 0x951   : > { %5337 = vrot.lane.b32.xlu0 %v9131_v43, %s9837_s0 }
 0x952   : > { %v5320_v63 = vpop.permute.xlu1 %5319 }
 0x953   : > { %5400 = vst.msk [vmem:[#allocation5 + $0x100] sm:$0xff] %vm5383_vm6, %v5320_v63  ;;  %v5322_v50 = vpop.permute.xlu0 %5321 }
 0x954   : > { %5401 = vst.msk [vmem:[#allocation5 + $0x110] sm:$0xff] %vm5383_vm6, %v5322_v50  ;;  %5528 = vrot.lane.b32.xlu1 %v5440_v20, %s9859_s17 }
 0x955   : > { %5530 = vrot.lane.b32.xlu0 %v5441_v9, %s9859_s17 }
 0x956   : > { %v5513_v34 = vpop.permute.xlu1 %5512 }
 0x957   : > { %5593 = vst.msk [vmem:[#allocation5 + $0x100] sm:$0xff] %vm5576_vm7, %v5513_v34  ;;  %v5515_v12 = vpop.permute.xlu0 %5514 }
 0x958   : > { %5594 = vst.msk [vmem:[#allocation5 + $0x110] sm:$0xff] %vm5576_vm7, %v5515_v12  ;;  %4373 = vrot.lane.b32.xlu1 %v5438_v32, %s9838_s15 }
 0x959   : > { %4375 = vrot.lane.b32.xlu0 %v5439_v28, %s9838_s15 }
 0x95a   : > { %v4358_v15 = vpop.permute.xlu1 %4357 }
 0x95b   : > { %4436 = vst.msk [vmem:[#allocation5 + $0x120] sm:$0xff] %vm4417_vm12, %v4358_v15  ;;  %v4360_v26 = vpop.permute.xlu0 %4359 }
 0x95c   : > { %4437 = vst.msk [vmem:[#allocation5 + $0x130] sm:$0xff] %vm4417_vm12, %v4360_v26  ;;  %4566 = vrot.lane.b32.xlu1 %v9123_v27, %s6686_s27  ;;  %v6564_v27 = vpack.c.bf16 %v5716_v14, %v5714_v11  ;;  %v5639_v26 = vld [vmem:[#allocation3 + $0x19a] sm:$0xff] }
 0x95d   : > { %4568 = vrot.lane.b32.xlu0 %v9125_v38, %s6686_s27  ;;  %5671 = vst.msk [vmem:[#allocation5 + $0x1e8] sm:$0xff] %vm541_vm14, %v5639_v26 }
 0x95e   : > { %v4551_v56 = vpop.permute.xlu1 %4550  ;;  %v5709_v51 = vld [vmem:[#allocation5 + $0x100] sm:$0xff] }
 0x95f   : > { %4629 = vst.msk [vmem:[#allocation5 + $0x120] sm:$0xff] %vm4610_vm3, %v4551_v56  ;;  %v4553_v13 = vpop.permute.xlu0 %4552  ;;  %v5711_v10 = vld [vmem:[#allocation5 + $0x110] sm:$0xff] }
 0x960   : > { %4630 = vst.msk [vmem:[#allocation5 + $0x130] sm:$0xff] %vm4610_vm3, %v4553_v13  ;;  %4759 = vrot.lane.b32.xlu1 %v9129_v17, %s6683_s22  ;;  %v6562_v46 = vpack.c.bf16 %v5711_v10, %v5709_v51  ;;  %v5640_v56 = vld [vmem:[#allocation3 + $0x1a2] sm:$0xff]  ;;  %v5446_v13 = vld [vmem:[#allocation3 + $0x199] sm:$0xff] }
 0x961   : > { %4761 = vrot.lane.b32.xlu0 %v9131_v43, %s6683_s22  ;;  %5672 = vst.msk [vmem:[#allocation5 + $0x1f8] sm:$0xff] %vm541_vm14, %v5640_v56 }
 0x962   : > { %6563 = vmatpush1.bf16.xpose.msra.mxu1 %v6562_v46  ;;  %v4744_v38 = vpop.permute.xlu1 %4743  ;;  %v5447_v46 = vld [vmem:[#allocation3 + $0x1a1] sm:$0xff] }
 0x963   : > { %4822 = vst.msk [vmem:[#allocation5 + $0x120] sm:$0xff] %vm4803_vm4, %v4744_v38  ;;  %6566 = vmatprep.subr.msk.bf16.mxu1 %vm8977_vm0, %v6564_v27  ;;  %v4746_v19 = vpop.permute.xlu0 %4745  ;;  %v5674_v27 = vld [vmem:[%s9814_s8 + $0x8] sm:$0xff] }
 0x964   : > { %4823 = vst.msk [vmem:[#allocation5 + $0x130] sm:$0xff] %vm4803_vm4, %v4746_v19  ;;  %4952 = vrot.lane.b32.xlu1 %v5440_v20, %s6687_s28  ;;  %6327 = vmatprep.mubr.msk.f32.mxu1 %vm541_vm14, %v5674_v27 }
 0x965   : > { %4954 = vrot.lane.b32.xlu0 %v5441_v9, %s6687_s28 }
 0x966   : > { %v4937_v17 = vpop.permute.xlu1 %4936 }
 0x967   : > { %5015 = vst.msk [vmem:[#allocation5 + $0x120] sm:$0xff] %vm4996_vm5, %v4937_v17  ;;  %v4939_v8 = vpop.permute.xlu0 %4938 }
 0x968   : > { %5016 = vst.msk [vmem:[#allocation5 + $0x130] sm:$0xff] %vm4996_vm5, %v4939_v8  ;;  %5145 = vrot.lane.b32.xlu1 %v9145_v48, %s6679_s23 }
 0x969   : > { %5147 = vrot.lane.b32.xlu0 %v9147_v44, %s6679_s23 }
 0x96a   : > { %v5130_v43 = vpop.permute.xlu1 %5129 }
 0x96b   : > { %5208 = vst.msk [vmem:[#allocation5 + $0x120] sm:$0xff] %vm5189_vm11, %v5130_v43  ;;  %v5132_v55 = vpop.permute.xlu0 %5131 }
 0x96c   : > { %5209 = vst.msk [vmem:[#allocation5 + $0x130] sm:$0xff] %vm5189_vm11, %v5132_v55  ;;  %5339 = vrot.lane.b32.xlu1 %v9149_v1, %s9837_s0 }
 0x96d   : > { %5341 = vrot.lane.b32.xlu0 %v9151_v60, %s9837_s0 }
 0x96e   : > { %v5324_v25 = vpop.permute.xlu1 %5323 }
 0x96f   : > { %5402 = vst.msk [vmem:[#allocation5 + $0x120] sm:$0xff] %vm5383_vm6, %v5324_v25  ;;  %v5326_v52 = vpop.permute.xlu0 %5325 }
 0x970   : > { %5403 = vst.msk [vmem:[#allocation5 + $0x130] sm:$0xff] %vm5383_vm6, %v5326_v52  ;;  %5532 = vrot.lane.b32.xlu1 %v9606_v53, %s9859_s17  ;;  %v5726_v52 = vld [vmem:[#allocation5 + $0x188] sm:$0xff] }
 0x971   : > { %5534 = vrot.lane.b32.xlu0 %v5443_v23, %s9859_s17 }
 0x972   : > { %v5517_v4 = vpop.permute.xlu1 %5516 }
 0x973   : > { %5595 = vst.msk [vmem:[#allocation5 + $0x120] sm:$0xff] %vm5576_vm7, %v5517_v4  ;;  %v5519_v18 = vpop.permute.xlu0 %5518 }
 0x974   : > { %5596 = vst.msk [vmem:[#allocation5 + $0x130] sm:$0xff] %vm5576_vm7, %v5519_v18  ;;  %4377 = vrot.lane.b32.xlu1 %v5440_v20, %s9838_s15  ;;  %v5722_v20 = vld [vmem:[#allocation5 + $0x168] sm:$0xff] }
 0x975   : > { %4379 = vrot.lane.b32.xlu0 %v5441_v9, %s9838_s15  ;;  %v5724_v9 = vld [vmem:[#allocation5 + $0x178] sm:$0xff] }
 0x976   : > { %v4362_v37 = vpop.permute.xlu1 %4361 }
 0x977   : > { %4438 = vst.msk [vmem:[#allocation5 + $0x140] sm:$0xff] %vm4417_vm12, %v4362_v37  ;;  %v4364_v61 = vpop.permute.xlu0 %4363 }
 0x978   : > { %4439 = vst.msk [vmem:[#allocation5 + $0x150] sm:$0xff] %vm4417_vm12, %v4364_v61  ;;  %4570 = vrot.lane.b32.xlu1 %v9145_v48, %s6686_s27  ;;  %v6569_v48 = vpack.c.bf16 %v5720_v35, %v5718_v29 }
 0x979   : > { %4572 = vrot.lane.b32.xlu0 %v9147_v44, %s6686_s27 }
 0x97a   : > { %v4555_v32 = vpop.permute.xlu1 %4554  ;;  %v5713_v28 = vld [vmem:[#allocation5 + $0x120] sm:$0xff] }
 0x97b   : > { %4631 = vst.msk [vmem:[#allocation5 + $0x140] sm:$0xff] %vm4610_vm3, %v4555_v32  ;;  %v4557_v39 = vpop.permute.xlu0 %4556  ;;  %v5715_v31 = vld [vmem:[#allocation5 + $0x130] sm:$0xff] }
 0x97c   : > { %4632 = vst.msk [vmem:[#allocation5 + $0x150] sm:$0xff] %vm4610_vm3, %v4557_v39  ;;  %4763 = vrot.lane.b32.xlu1 %v9149_v1, %s6683_s22  ;;  %v6567_v47 = vpack.c.bf16 %v5715_v31, %v5713_v28 }
 0x97d   : > { %4765 = vrot.lane.b32.xlu0 %v9151_v60, %s6683_s22 }
 0x97e   : > { %6568 = vmatpush1.bf16.xpose.msra.mxu1 %v6567_v47  ;;  %v4748_v44 = vpop.permute.xlu1 %4747 }
 0x97f   : > { %4824 = vst.msk [vmem:[#allocation5 + $0x140] sm:$0xff] %vm4803_vm4, %v4748_v44  ;;  %6571 = vmatprep.subr.msk.bf16.mxu1 %vm8977_vm0, %v6569_v48  ;;  %v4750_v30 = vpop.permute.xlu0 %4749 }
 0x980   : > { %4825 = vst.msk [vmem:[#allocation5 + $0x150] sm:$0xff] %vm4803_vm4, %v4750_v30  ;;  %4956 = vrot.lane.b32.xlu1 %v9606_v53, %s6687_s28 }
 0x981   : > { %4958 = vrot.lane.b32.xlu0 %v5443_v23, %s6687_s28 }
 0x982   : > { %v4941_v1 = vpop.permute.xlu1 %4940 }
 0x983   : > { %5017 = vst.msk [vmem:[#allocation5 + $0x140] sm:$0xff] %vm4996_vm5, %v4941_v1  ;;  %v4943_v60 = vpop.permute.xlu0 %4942 }
 0x984   : > { %5018 = vst.msk [vmem:[#allocation5 + $0x150] sm:$0xff] %vm4996_vm5, %v4943_v60  ;;  %5149 = vrot.lane.b32.xlu1 %v9163_v16, %s6679_s23 }
 0x985   : > { %5151 = vrot.lane.b32.xlu0 %v9165_v3, %s6679_s23 }
 0x986   : > { %v5134_v62 = vpop.permute.xlu1 %5133 }
 0x987   : > { %5210 = vst.msk [vmem:[#allocation5 + $0x140] sm:$0xff] %vm5189_vm11, %v5134_v62  ;;  %v5136_v40 = vpop.permute.xlu0 %5135 }
 0x988   : > { %5211 = vst.msk [vmem:[#allocation5 + $0x150] sm:$0xff] %vm5189_vm11, %v5136_v40  ;;  %5343 = vrot.lane.b32.xlu1 %v5251_v57, %s9837_s0  ;;  %v5730_v40 = vld [vmem:[#allocation5 + $0x1a8] sm:$0xff] }
 0x989   : > { %5345 = vrot.lane.b32.xlu0 %v5252_v36, %s9837_s0 }
 0x98a   : > { %v5328_v2 = vpop.permute.xlu1 %5327 }
 0x98b   : > { %5404 = vst.msk [vmem:[#allocation5 + $0x140] sm:$0xff] %vm5383_vm6, %v5328_v2  ;;  %v5330_v54 = vpop.permute.xlu0 %5329 }
 0x98c   : > { %5405 = vst.msk [vmem:[#allocation5 + $0x150] sm:$0xff] %vm5383_vm6, %v5330_v54  ;;  %5536 = vrot.lane.b32.xlu1 %v5444_v45, %s9859_s17 }
 0x98d   : > { %5538 = vrot.lane.b32.xlu0 %v5445_v22, %s9859_s17 }
 0x98e   : > { %v5521_v42 = vpop.permute.xlu1 %5520 }
 0x98f   : > { %5597 = vst.msk [vmem:[#allocation5 + $0x140] sm:$0xff] %vm5576_vm7, %v5521_v42  ;;  %v5523_v5 = vpop.permute.xlu0 %5522 }
 0x990   : > { %5598 = vst.msk [vmem:[#allocation5 + $0x150] sm:$0xff] %vm5576_vm7, %v5523_v5  ;;  %4381 = vrot.lane.b32.xlu1 %v9606_v53, %s9838_s15  ;;  %v5728_v53 = vld [vmem:[#allocation5 + $0x198] sm:$0xff] }
 0x991   : > { %4383 = vrot.lane.b32.xlu0 %v5443_v23, %s9838_s15  ;;  %v6579_v37 = vpack.c.bf16 %v5728_v53, %v5726_v52  ;;  %v5738_v52 = vld [vmem:[#allocation5 + $0x1e8] sm:$0xff]  ;;  %v5740_v53 = vld [vmem:[#allocation5 + $0x1f8] sm:$0xff]  ;;  %s6336_s15 = sshll.u32 %s9864_s30, 5 }
 0x992   : > { %v4366_v41 = vpop.permute.xlu1 %4365  ;;  %s484_s20 = scalar_lea.vmem %s9820_s14, %s6336_s15 }
 0x993   : > { %4440 = vst.msk [vmem:[#allocation5 + $0x160] sm:$0xff] %vm4417_vm12, %v4366_v41  ;;  %v4368_v33 = vpop.permute.xlu0 %4367 }
 0x994   : > { %4441 = vst.msk [vmem:[#allocation5 + $0x170] sm:$0xff] %vm4417_vm12, %v4368_v33  ;;  %4574 = vrot.lane.b32.xlu1 %v9163_v16, %s6686_s27  ;;  %v6574_v16 = vpack.c.bf16 %v5724_v9, %v5722_v20 }
 0x995   : > { %4576 = vrot.lane.b32.xlu0 %v9165_v3, %s6686_s27 }
 0x996   : > { %v4559_v63 = vpop.permute.xlu1 %4558  ;;  %v5717_v50 = vld [vmem:[#allocation5 + $0x140] sm:$0xff] }
 0x997   : > { %4633 = vst.msk [vmem:[#allocation5 + $0x160] sm:$0xff] %vm4610_vm3, %v4559_v63  ;;  %v4561_v34 = vpop.permute.xlu0 %4560  ;;  %v5719_v12 = vld [vmem:[#allocation5 + $0x150] sm:$0xff] }
 0x998   : > { %4634 = vst.msk [vmem:[#allocation5 + $0x170] sm:$0xff] %vm4610_vm3, %v4561_v34  ;;  %4767 = vrot.lane.b32.xlu1 %v5251_v57, %s6683_s22  ;;  %v6572_v15 = vpack.c.bf16 %v5719_v12, %v5717_v50  ;;  %v5732_v57 = vld [vmem:[#allocation5 + $0x1b8] sm:$0xff] }
 0x999   : > { %4769 = vrot.lane.b32.xlu0 %v5252_v36, %s6683_s22 }
 0x99a   : > { %6573 = vmatpush1.bf16.xpose.msra.mxu1 %v6572_v15  ;;  %v4752_v3 = vpop.permute.xlu1 %4751 }
 0x99b   : > { %4826 = vst.msk [vmem:[#allocation5 + $0x160] sm:$0xff] %vm4803_vm4, %v4752_v3  ;;  %6576 = vmatprep.subr.msk.bf16.mxu1 %vm8977_vm0, %v6574_v16  ;;  %v4754_v51 = vpop.permute.xlu0 %4753  ;;  %v5734_v16 = vld [vmem:[#allocation5 + $0x1c8] sm:$0xff]  ;;  %v5736_v3 = vld [vmem:[#allocation5 + $0x1d8] sm:$0xff] }
 0x99c   : > { %4827 = vst.msk [vmem:[#allocation5 + $0x170] sm:$0xff] %vm4803_vm4, %v4754_v51  ;;  %4960 = vrot.lane.b32.xlu1 %v5444_v45, %s6687_s28  ;;  %v6584_v45 = vpack.c.bf16 %v5732_v57, %v5730_v40 }
 0x99d   : > { %4962 = vrot.lane.b32.xlu0 %v5445_v22, %s6687_s28 }
 0x99e   : > { %v4945_v11 = vpop.permute.xlu1 %4944 }
 0x99f   : > { %5019 = vst.msk [vmem:[#allocation5 + $0x160] sm:$0xff] %vm4996_vm5, %v4945_v11  ;;  %v4947_v14 = vpop.permute.xlu0 %4946 }
 0x9a0   : > { %5020 = vst.msk [vmem:[#allocation5 + $0x170] sm:$0xff] %vm4996_vm5, %v4947_v14  ;;  %5153 = vrot.lane.b32.xlu1 %v9173_v58, %s6679_s23 }
 0x9a1   : > { %5155 = vrot.lane.b32.xlu0 %v9175_v24, %s6679_s23 }
 0x9a2   : > { %v5138_v10 = vpop.permute.xlu1 %5137 }
 0x9a3   : > { %5212 = vst.msk [vmem:[#allocation5 + $0x160] sm:$0xff] %vm5189_vm11, %v5138_v10  ;;  %v5140_v38 = vpop.permute.xlu0 %5139 }
 0x9a4   : > { %5213 = vst.msk [vmem:[#allocation5 + $0x170] sm:$0xff] %vm5189_vm11, %v5140_v38  ;;  %5540 = vrot.lane.b32.xlu1 %v5446_v13, %s9859_s17  ;;  %v6589_v13 = vpack.c.bf16 %v5736_v3, %v5734_v16 }
 0x9a5   : > { %5542 = vrot.lane.b32.xlu0 %v5447_v46, %s9859_s17 }
 0x9a6   : > { %v5332_v58 = vpop.permute.xlu1 %5331 }
 0x9a7   : > { %5406 = vst.msk [vmem:[#allocation5 + $0x160] sm:$0xff] %vm5383_vm6, %v5332_v58  ;;  %v5334_v24 = vpop.permute.xlu0 %5333 }
 0x9a8   : > { %5407 = vst.msk [vmem:[#allocation5 + $0x170] sm:$0xff] %vm5383_vm6, %v5334_v24 }
 0x9aa   : > { %v5525_v19 = vpop.permute.xlu1 %5524 }
 0x9ab   : > { %5599 = vst.msk [vmem:[#allocation5 + $0x160] sm:$0xff] %vm5576_vm7, %v5525_v19  ;;  %v5527_v17 = vpop.permute.xlu0 %5526 }
 0x9ac   : > { %5600 = vst.msk [vmem:[#allocation5 + $0x170] sm:$0xff] %vm5576_vm7, %v5527_v17 }
 0x9ae   : > { %v4370_v8 = vpop.permute.xlu1 %4369 }
 0x9af   : > { %4442 = vst.msk [vmem:[#allocation5 + $0x180] sm:$0xff] %vm4417_vm12, %v4370_v8  ;;  %v4372_v43 = vpop.permute.xlu0 %4371 }
 0x9b0   : > { %4443 = vst.msk [vmem:[#allocation5 + $0x190] sm:$0xff] %vm4417_vm12, %v4372_v43 }
 0x9b2   : > { %v4563_v55 = vpop.permute.xlu1 %4562  ;;  %v5721_v25 = vld [vmem:[#allocation5 + $0x160] sm:$0xff] }
 0x9b3   : > { %4635 = vst.msk [vmem:[#allocation5 + $0x180] sm:$0xff] %vm4610_vm3, %v4563_v55  ;;  %v4565_v23 = vpop.permute.xlu0 %4564  ;;  %v5723_v4 = vld [vmem:[#allocation5 + $0x170] sm:$0xff] }
 0x9b4   : > { %4636 = vst.msk [vmem:[#allocation5 + $0x190] sm:$0xff] %vm4610_vm3, %v4565_v23  ;;  %v6577_v18 = vpack.c.bf16 %v5723_v4, %v5721_v25 }
 0x9b6   : > { %6578 = vmatpush1.bf16.xpose.msra.mxu1 %v6577_v18  ;;  %v4756_v61 = vpop.permute.xlu1 %4755 }
 0x9b7   : > { %4828 = vst.msk [vmem:[#allocation5 + $0x180] sm:$0xff] %vm4803_vm4, %v4756_v61  ;;  %6581 = vmatprep.subr.msk.bf16.mxu1 %vm8977_vm0, %v6579_v37  ;;  %v4758_v32 = vpop.permute.xlu0 %4757  ;;  %v6594_v61 = vpack.c.bf16 %v5740_v53, %v5738_v52 }
 0x9b8   : > { %4829 = vst.msk [vmem:[#allocation5 + $0x190] sm:$0xff] %vm4803_vm4, %v4758_v32 }
 0x9ba   : > { %v4949_v28 = vpop.permute.xlu1 %4948 }
 0x9bb   : > { %5021 = vst.msk [vmem:[#allocation5 + $0x180] sm:$0xff] %vm4996_vm5, %v4949_v28  ;;  %v4951_v29 = vpop.permute.xlu0 %4950 }
 0x9bc   : > { %5022 = vst.msk [vmem:[#allocation5 + $0x190] sm:$0xff] %vm4996_vm5, %v4951_v29 }
 0x9be   : > { %v5142_v35 = vpop.permute.xlu1 %5141 }
 0x9bf   : > { %5214 = vst.msk [vmem:[#allocation5 + $0x180] sm:$0xff] %vm5189_vm11, %v5142_v35  ;;  %v5144_v39 = vpop.permute.xlu0 %5143 }
 0x9c0   : > { %5215 = vst.msk [vmem:[#allocation5 + $0x190] sm:$0xff] %vm5189_vm11, %v5144_v39 }
 0x9c2   : > { %v5336_v31 = vpop.permute.xlu1 %5335 }
 0x9c3   : > { %5408 = vst.msk [vmem:[#allocation5 + $0x180] sm:$0xff] %vm5383_vm6, %v5336_v31  ;;  %v5338_v47 = vpop.permute.xlu0 %5337 }
 0x9c4   : > { %5409 = vst.msk [vmem:[#allocation5 + $0x190] sm:$0xff] %vm5383_vm6, %v5338_v47 }
 0x9c6   : > { %v5529_v48 = vpop.permute.xlu1 %5528 }
 0x9c7   : > { %5601 = vst.msk [vmem:[#allocation5 + $0x180] sm:$0xff] %vm5576_vm7, %v5529_v48  ;;  %v5531_v44 = vpop.permute.xlu0 %5530 }
 0x9c8   : > { %5602 = vst.msk [vmem:[#allocation5 + $0x190] sm:$0xff] %vm5576_vm7, %v5531_v44 }
 0x9ca   : > { %v4374_v30 = vpop.permute.xlu1 %4373 }
 0x9cb   : > { %4444 = vst.msk [vmem:[#allocation5 + $0x1a0] sm:$0xff] %vm4417_vm12, %v4374_v30  ;;  %v4376_v1 = vpop.permute.xlu0 %4375 }
 0x9cc   : > { %4445 = vst.msk [vmem:[#allocation5 + $0x1b0] sm:$0xff] %vm4417_vm12, %v4376_v1 }
 0x9ce   : > { %v4567_v60 = vpop.permute.xlu1 %4566  ;;  %v5725_v62 = vld [vmem:[#allocation5 + $0x180] sm:$0xff] }
 0x9cf   : > { %4637 = vst.msk [vmem:[#allocation5 + $0x1a0] sm:$0xff] %vm4610_vm3, %v4567_v60  ;;  %v4569_v36 = vpop.permute.xlu0 %4568  ;;  %v5727_v2 = vld [vmem:[#allocation5 + $0x190] sm:$0xff]  ;;  %v5673_v60 = vld [vmem:[%s9814_s8] sm:$0xff] }
 0x9d0   : > { %4638 = vst.msk [vmem:[#allocation5 + $0x1b0] sm:$0xff] %vm4610_vm3, %v4569_v36  ;;  %v6582_v54 = vpack.c.bf16 %v5727_v2, %v5725_v62 }
 0x9d2   : > { %6583 = vmatpush1.bf16.xpose.msra.mxu1 %v6582_v54  ;;  %v4760_v22 = vpop.permute.xlu1 %4759 }
 0x9d3   : > { %4830 = vst.msk [vmem:[#allocation5 + $0x1a0] sm:$0xff] %vm4803_vm4, %v4760_v22  ;;  %6586 = vmatprep.subr.msk.bf16.mxu1 %vm8977_vm0, %v6584_v45  ;;  %v4762_v42 = vpop.permute.xlu0 %4761  ;;  %v9860_v45 = vmov 0.0  }
 0x9d4   : > { %4831 = vst.msk [vmem:[#allocation5 + $0x1b0] sm:$0xff] %vm4803_vm4, %v4762_v42  ;;  %v6254_v22 = vsel %vm9861_vm13, 1.0, %v9860_v45  ;;  %v6255_v42 = vsel %vm9862_vm15, 1.0, %v9860_v45 }
 0x9d6   : > { %v4953_v5 = vpop.permute.xlu1 %4952 }
 0x9d7   : > { %5023 = vst.msk [vmem:[#allocation5 + $0x1a0] sm:$0xff] %vm4996_vm5, %v4953_v5  ;;  %v4955_v41 = vpop.permute.xlu0 %4954 }
 0x9d8   : > { %5024 = vst.msk [vmem:[#allocation5 + $0x1b0] sm:$0xff] %vm4996_vm5, %v4955_v41 }
 0x9da   : > { %v5146_v33 = vpop.permute.xlu1 %5145 }
 0x9db   : > { %5216 = vst.msk [vmem:[#allocation5 + $0x1a0] sm:$0xff] %vm5189_vm11, %v5146_v33  ;;  %v5148_v63 = vpop.permute.xlu0 %5147 }
 0x9dc   : > { %5217 = vst.msk [vmem:[#allocation5 + $0x1b0] sm:$0xff] %vm5189_vm11, %v5148_v63 }
 0x9de   : > { %v5340_v50 = vpop.permute.xlu1 %5339 }
 0x9df   : > { %5410 = vst.msk [vmem:[#allocation5 + $0x1a0] sm:$0xff] %vm5383_vm6, %v5340_v50  ;;  %v5342_v20 = vpop.permute.xlu0 %5341 }
 0x9e0   : > { %5411 = vst.msk [vmem:[#allocation5 + $0x1b0] sm:$0xff] %vm5383_vm6, %v5342_v20  ;;  %v6009_v20 = vld [vmem:[%s9815_s9] sm:$0xff] }
 0x9e2   : > { %v5533_v9 = vpop.permute.xlu1 %5532 }
 0x9e3   : > { %5603 = vst.msk [vmem:[#allocation5 + $0x1a0] sm:$0xff] %vm5576_vm7, %v5533_v9  ;;  %v5535_v34 = vpop.permute.xlu0 %5534 }
 0x9e4   : > { %5604 = vst.msk [vmem:[#allocation5 + $0x1b0] sm:$0xff] %vm5576_vm7, %v5535_v34 }
 0x9e6   : > { %v4378_v12 = vpop.permute.xlu1 %4377 }
 0x9e7   : > { %4446 = vst.msk [vmem:[#allocation5 + $0x1c0] sm:$0xff] %vm4417_vm12, %v4378_v12  ;;  %v4380_v15 = vpop.permute.xlu0 %4379 }
 0x9e8   : > { %4447 = vst.msk [vmem:[#allocation5 + $0x1d0] sm:$0xff] %vm4417_vm12, %v4380_v15 }
 0x9ea   : > { %v4571_v26 = vpop.permute.xlu1 %4570  ;;  %v5729_v56 = vld [vmem:[#allocation5 + $0x1a0] sm:$0xff] }
 0x9eb   : > { %4639 = vst.msk [vmem:[#allocation5 + $0x1c0] sm:$0xff] %vm4610_vm3, %v4571_v26  ;;  %v4573_v51 = vpop.permute.xlu0 %4572  ;;  %v5731_v11 = vld [vmem:[#allocation5 + $0x1b0] sm:$0xff] }
 0x9ec   : > { %4640 = vst.msk [vmem:[#allocation5 + $0x1d0] sm:$0xff] %vm4610_vm3, %v4573_v51  ;;  %v6587_v14 = vpack.c.bf16 %v5731_v11, %v5729_v56 }
 0x9ee   : > { %6588 = vmatpush1.bf16.xpose.msra.mxu1 %v6587_v14  ;;  %v4764_v10 = vpop.permute.xlu1 %4763 }
 0x9ef   : > { %4832 = vst.msk [vmem:[#allocation5 + $0x1c0] sm:$0xff] %vm4803_vm4, %v4764_v10  ;;  %6591 = vmatprep.subr.msk.bf16.mxu1 %vm8977_vm0, %v6589_v13  ;;  %v4766_v46 = vpop.permute.xlu0 %4765 }
 0x9f0   : > { %4833 = vst.msk [vmem:[#allocation5 + $0x1d0] sm:$0xff] %vm4803_vm4, %v4766_v46 }
 0x9f2   : > { %v4957_v27 = vpop.permute.xlu1 %4956 }
 0x9f3   : > { %5025 = vst.msk [vmem:[#allocation5 + $0x1c0] sm:$0xff] %vm4996_vm5, %v4957_v27  ;;  %v4959_v38 = vpop.permute.xlu0 %4958 }
 0x9f4   : > { %5026 = vst.msk [vmem:[#allocation5 + $0x1d0] sm:$0xff] %vm4996_vm5, %v4959_v38 }
 0x9f6   : > { %v5150_v58 = vpop.permute.xlu1 %5149 }
 0x9f7   : > { %5218 = vst.msk [vmem:[#allocation5 + $0x1c0] sm:$0xff] %vm5189_vm11, %v5150_v58  ;;  %v5152_v24 = vpop.permute.xlu0 %5151 }
 0x9f8   : > { %5219 = vst.msk [vmem:[#allocation5 + $0x1d0] sm:$0xff] %vm5189_vm11, %v5152_v24 }
 0x9fa   : > { %v5344_v19 = vpop.permute.xlu1 %5343 }
 0x9fb   : > { %5412 = vst.msk [vmem:[#allocation5 + $0x1c0] sm:$0xff] %vm5383_vm6, %v5344_v19  ;;  %v5346_v17 = vpop.permute.xlu0 %5345 }
 0x9fc   : > { %5413 = vst.msk [vmem:[#allocation5 + $0x1d0] sm:$0xff] %vm5383_vm6, %v5346_v17 }
 0x9fe   : > { %v5537_v8 = vpop.permute.xlu1 %5536 }
 0x9ff   : > { %5605 = vst.msk [vmem:[#allocation5 + $0x1c0] sm:$0xff] %vm5576_vm7, %v5537_v8  ;;  %v5539_v43 = vpop.permute.xlu0 %5538 }
 0xa00   : > { %5606 = vst.msk [vmem:[#allocation5 + $0x1d0] sm:$0xff] %vm5576_vm7, %v5539_v43 }
 0xa02   : > { %v4382_v55 = vpop.permute.xlu1 %4381 }
 0xa03   : > { %4448 = vst.msk [vmem:[#allocation5 + $0x1e0] sm:$0xff] %vm4417_vm12, %v4382_v55  ;;  %v4384_v25 = vpop.permute.xlu0 %4383 }
 0xa04   : > { %4449 = vst.msk [vmem:[#allocation5 + $0x1f0] sm:$0xff] %vm4417_vm12, %v4384_v25 }
 0xa06   : > { %v4575_v23 = vpop.permute.xlu1 %4574  ;;  %v5733_v4 = vld [vmem:[#allocation5 + $0x1c0] sm:$0xff] }
 0xa07   : > { %4641 = vst.msk [vmem:[#allocation5 + $0x1e0] sm:$0xff] %vm4610_vm3, %v4575_v23  ;;  %v4577_v18 = vpop.permute.xlu0 %4576  ;;  %v5735_v37 = vld [vmem:[#allocation5 + $0x1d0] sm:$0xff] }
 0xa08   : > { %4642 = vst.msk [vmem:[#allocation5 + $0x1f0] sm:$0xff] %vm4610_vm3, %v4577_v18  ;;  %v6592_v32 = vpack.c.bf16 %v5735_v37, %v5733_v4  ;;  %v6122_v37 = vld [vmem:[%s9816_s10] sm:$0xff] }
 0xa0a   : > { %6593 = vmatpush1.bf16.xpose.msra.mxu1 %v6592_v32  ;;  %v4768_v28 = vpop.permute.xlu1 %4767 }
 0xa0b   : > { %4834 = vst.msk [vmem:[#allocation5 + $0x1e0] sm:$0xff] %vm4803_vm4, %v4768_v28  ;;  %v4770_v29 = vpop.permute.xlu0 %4769  ;;  %6596 = vmatprep.subr.msk.bf16.mxu1 %vm8977_vm0, %v6594_v61  ;;  %v6123_v28 = vld [vmem:[%s9816_s10 + $0x8] sm:$0xff] }
 0xa0c   : > { %4835 = vst.msk [vmem:[#allocation5 + $0x1f0] sm:$0xff] %vm4803_vm4, %v4770_v29 }
 0xa0e   : > { %v4961_v35 = vpop.permute.xlu1 %4960 }
 0xa0f   : > { %5027 = vst.msk [vmem:[#allocation5 + $0x1e0] sm:$0xff] %vm4996_vm5, %v4961_v35  ;;  %v4963_v39 = vpop.permute.xlu0 %4962  ;;  %v6141_v35 = vld [vmem:[%s9817_s11 + $0x8] sm:$0xff] }
 0xa10   : > { %5028 = vst.msk [vmem:[#allocation5 + $0x1f0] sm:$0xff] %vm4996_vm5, %v4963_v39 }
 0xa12   : > { %v5154_v31 = vpop.permute.xlu1 %5153 }
 0xa13   : > { %5220 = vst.msk [vmem:[#allocation5 + $0x1e0] sm:$0xff] %vm5189_vm11, %v5154_v31  ;;  %v5156_v47 = vpop.permute.xlu0 %5155  ;;  %v6140_v31 = vld [vmem:[%s9817_s11] sm:$0xff] }
 0xa14   : > { %5414 = vst.msk [vmem:[#allocation5 + $0x1e0] sm:$0xff] %vm5383_vm6, %v9237_v59  ;;  %v5676_v59 = vld [vmem:[%s9814_s8 + $0x18] sm:$0xff] }
 0xa15   : > { %5221 = vst.msk [vmem:[#allocation5 + $0x1f0] sm:$0xff] %vm5189_vm11, %v5156_v47 }
 0xa16   : > { %5415 = vst.msk [vmem:[#allocation5 + $0x1f0] sm:$0xff] %vm5383_vm6, %v9241_v21  ;;  %v5541_v7 = vpop.permute.xlu1 %5540  ;;  %v5675_v21 = vld [vmem:[%s9814_s8 + $0x10] sm:$0xff] }
 0xa17   : > { %5607 = vst.msk [vmem:[#allocation5 + $0x1e0] sm:$0xff] %vm5576_vm7, %v5541_v7  ;;  %v5543_v48 = vpop.permute.xlu0 %5542 }
 0xa18   : > { %5608 = vst.msk [vmem:[#allocation5 + $0x1f0] sm:$0xff] %vm5576_vm7, %v5543_v48 }
 0xa1e   : > { %v5737_v44 = vld [vmem:[#allocation5 + $0x1e0] sm:$0xff] }
 0xa1f   : > { %v5739_v30 = vld [vmem:[#allocation5 + $0x1f0] sm:$0xff] }
 0xa20   : > { %v6597_v1 = vpack.c.bf16 %v5739_v30, %v5737_v44 }
 0xa22   : > { %6598 = vmatpush1.bf16.xpose.msra.mxu1 %v6597_v1 }
 0xa29   : > { %5908 = vmatmul.mubr.f32.vlgmr.msra.gmra.mrb[0].mxu1 %v5673_v60 }
 0xa2a   : > { %6328 = vmatprep.mubr.msk.f32.mxu1 %vm541_vm14, %v5676_v59 }
 0xa2d   : > { %5914 = vmatmul.mubr.f32.gmra.mrb[2].mxu1 %v5675_v21 }
 0xafc   : > { %v5909_v62 = vpop.f32.mrb[0].mxu1 }
 0xafd   : > { %v5911_v40 = vpop.f32.mrb[1].mxu1 }
 0xb00   : > { %v5915_v57 = vpop.f32.mrb[2].mxu1 }
 0xb01   : > { %v6601_v36 = vpack.c.bf16 %v5915_v57, %v5909_v62  ;;  %v5917_v2 = vpop.f32.mrb[3].mxu1 }
 0xb02   : > { %v6599_v54 = vpack.c.bf16 %v5917_v2, %v5911_v40 }
 0xb04   : > { %6600 = vmatprep.subr.bf16.mxu0 %v6599_v54 }
 0xb05   : > { %6602 = vmatpush1.bf16.msra.mxu0 %v6601_v36 }
 0xb08   : > { %6329 = vmatmul.mubr.msk.f32.vlgmr.msra.gmra.mrb[40].mxu0 %vm541_vm14, %v6254_v22 }
 0xb09   : > { %5996 = vmatprep.mubr.f32.mxu0 %v9860_v45 }
 0xb0c   : > { %6330 = vmatmul.mubr.msk.f32.gmra.mrb[42].mxu0 %vm541_vm14, %v6255_v42 }
 0xb0d   : > { %6097 = vmatprep.mubr.f32.mxu0 %v9860_v45 }
 0xbdb   : > { %v5992_v5 = vpop.f32.mrb[40].mxu0 }
 0xbdc   : > { %v5994_v41 = vpop.f32.mrb[41].mxu0 }
 0xbdd   : > { %v6003_v33 = vadd.f32 %v5994_v41, %v5992_v5 }
 0xbdf   : > { %6004 = vadd.xlane.f32.xlu1 %v6003_v33  ;;  %v5998_v63 = vpop.f32.mrb[42].mxu0 }
 0xbe0   : > { %v6000_v6 = vpop.f32.mrb[43].mxu0 }
 0xbe1   : > { %v6006_v50 = vadd.f32 %v6000_v6, %v5998_v63 }
 0xbe3   : > { %6007 = vadd.xlane.f32.xlu0 %v6006_v50 }
 0xc6c   : > { %v6005_v9 = vpop.xlane.xlu1 %6004 }
 0xc6d   : > { %v6011_v34 = vmul.f32 0.001953125, %v6005_v9 }
 0xc6f   : > { %v6013_v49 = vsub.f32 %v6009_v20, %v6011_v34 }
 0xc70   : > { %v6008_v12 = vpop.xlane.xlu0 %6007 }
 0xc71   : > { %v6012_v15 = vmul.f32 0.001953125, %v6008_v12  ;;  %6017 = vperm.xlu0 %6646, %v6013_v49  }
 0xc73   : > { %v6014_v26 = vsub.f32 %v6010_v0, %v6012_v15 }
 0xc75   : > { %6022 = vperm.xlu1 %6647, %v6014_v26  }
 0xcf0   : > { %v6018_v56 = vpop.permute.xlu0 %6017 }
 0xcf1   : > { %v6025_v16 = vadd.f32 %v6018_v56, %v5909_v62  ;;  %v6026_v3 = vadd.f32 %v6018_v56, %v5911_v40 }
 0xcf3   : > { %v6029_v13 = vmul.f32 %v6025_v16, %v6025_v16  ;;  %v6030_v10 = vmul.f32 %v6026_v3, %v6026_v3 }
 0xcf4   : > { %v6023_v51 = vpop.permute.xlu1 %6022 }
 0xcf5   : > { %v6027_v11 = vadd.f32 %v6023_v51, %v5915_v57  ;;  %v6028_v14 = vadd.f32 %v6023_v51, %v5917_v2 }
 0xcf7   : > { %v6031_v46 = vmul.f32 %v6027_v11, %v6027_v11  ;;  %v6032_v27 = vmul.f32 %v6028_v14, %v6028_v14 }
 0xcf9   : > { %v6605_v38 = vpack.c.bf16 %v6031_v46, %v6029_v13  ;;  %v6603_v58 = vpack.c.bf16 %v6032_v27, %v6030_v10 }
 0xcfb   : > { %6604 = vmatprep.subr.bf16.mxu0 %v6603_v58 }
 0xcfc   : > { %6606 = vmatpush1.bf16.msra.mxu0 %v6605_v38 }
 0xcff   : > { %6331 = vmatmul.mubr.msk.f32.vlgmr.msra.gmra.mrb[44].mxu0 %vm541_vm14, %v6254_v22 }
 0xd00   : > { %6103 = vmatprep.mubr.f32.mxu0 %v9860_v45 }
 0xd03   : > { %6332 = vmatmul.mubr.msk.f32.gmra.mrb[46].mxu0 %vm541_vm14, %v6255_v42 }
 0xdd2   : > { %v6099_v24 = vpop.f32.mrb[44].mxu0 }
 0xdd3   : > { %v6101_v19 = vpop.f32.mrb[45].mxu0 }
 0xdd4   : > { %v6110_v17 = vadd.f32 %v6101_v19, %v6099_v24 }
 0xdd6   : > { %6111 = vadd.xlane.f32.xlu1 %v6110_v17  ;;  %v6105_v8 = vpop.f32.mrb[46].mxu0 }
 0xdd7   : > { %v6107_v43 = vpop.f32.mrb[47].mxu0 }
 0xdd8   : > { %v6113_v55 = vadd.f32 %v6107_v43, %v6105_v8 }
 0xdda   : > { %6114 = vadd.xlane.f32.xlu0 %v6113_v55 }
 0xe63   : > { %v6112_v25 = vpop.xlane.xlu1 %6111 }
 0xe64   : > { %v6116_v52 = vmul.f32 0.001953125, %v6112_v25 }
 0xe66   : > { %v6118_v53 = vadd.f32 1e-05, %v6116_v52 }
 0xe67   : > { %v6115_v23 = vpop.xlane.xlu0 %6114 }
 0xe68   : > { %6650 = vrsqrt.f32 %v6118_v53  ;;  %v6117_v4 = vmul.f32 0.001953125, %v6115_v23 }
 0xe6a   : > { %v6119_v18 = vadd.f32 1e-05, %v6117_v4 }
 0xe6c   : > { %6652 = vrsqrt.f32 %v6119_v18 }
 0xe72   : > { %v6651_v61 = vpop.eup %6650 }
 0xe73   : > { %v6124_v32 = vmul.f32 %v6651_v61, %v6122_v37 }
 0xe75   : > { %6128 = vperm.xlu0 %6646, %v6124_v32  }
 0xe76   : > { %v6653_v29 = vpop.eup %6652 }
 0xe77   : > { %v6125_v39 = vmul.f32 %v6653_v29, %v6123_v28 }
 0xe79   : > { %6149 = vperm.xlu0 %6646, %v6141_v35   ;;  %6133 = vperm.xlu1 %6647, %v6125_v39  }
 0xe7d   : > { %6144 = vperm.xlu1 %6647, %v6140_v31  }
 0xef4   : > { %v6129_v47 = vpop.permute.xlu0 %6128 }
 0xef5   : > { %v6136_v59 = vmul.f32 %v6129_v47, %v6025_v16  ;;  %v6137_v21 = vmul.f32 %v6129_v47, %v6026_v3 }
 0xef8   : > { %v6134_v7 = vpop.permute.xlu1 %6133  ;;  %v6150_v30 = vpop.permute.xlu0 %6149 }
 0xef9   : > { %v6138_v48 = vmul.f32 %v6134_v7, %v6027_v11  ;;  %v6139_v44 = vmul.f32 %v6134_v7, %v6028_v14 }
 0xefb   : > { %v6154_v1 = vadd.f32 %v6150_v30, %v6138_v48  ;;  %v6155_v60 = vadd.f32 %v6150_v30, %v6139_v44 }
 0xefc   : > { %v6145_v62 = vpop.permute.xlu1 %6144 }
 0xefd   : > { %vm6158_vm14 = vcmp.gt.f32.partialorder %v6154_v1, 0.0  ;;  %vm6159_vm8 = vcmp.gt.f32.partialorder %v6155_v60, 0.0  ;;  %v6162_v40 = vmul.f32 0.01, %v6154_v1  ;;  %v6163_v57 = vmul.f32 0.01, %v6155_v60 }
 0xefe   : > { %v6152_v36 = vadd.f32 %v6145_v62, %v6136_v59  ;;  %v6153_v2 = vadd.f32 %v6145_v62, %v6137_v21 }
 0xeff   : > { %v6166_v54 = vsel %vm6158_vm14, %v6154_v1, %v6162_v40  ;;  %v6167_v45 = vsel %vm6159_vm8, %v6155_v60, %v6163_v57 }
 0xf00   : > { %6170 = vst [vmem:[%s484_s20 + $0x10] sm:$0xff] %v6166_v54  ;;  %6171 = vst [vmem:[%s484_s20 + $0x18] sm:$0xff] %v6167_v45  ;;  %vm6156_vm1 = vcmp.gt.f32.partialorder %v6152_v36, 0.0  ;;  %vm6157_vm9 = vcmp.gt.f32.partialorder %v6153_v2, 0.0  ;;  %v6160_v22 = vmul.f32 0.01, %v6152_v36 }
 0xf01   : > { %v6161_v42 = vmul.f32 0.01, %v6153_v2 }
 0xf02   : > { %v6164_v5 = vsel %vm6156_vm1, %v6152_v36, %v6160_v22 }
 0xf03   : > { %v6165_v41 = vsel %vm6157_vm9, %v6153_v2, %v6161_v42  ;;  %6168 = vst [vmem:[%s484_s20] sm:$0xff] %v6164_v5 }
 0xf04   : > { %6169 = vst [vmem:[%s484_s20 + $0x8] sm:$0xff] %v6165_v41 }
 0xf05 PF: > { %s24_s29 = sadd.s32 1, %s6660_s29  }
 0xf06   : > { %p21_p4 = scmp.ge.s32.totalorder %s24_s29, 4  }
 0xf08   :  { %23 = sbr.rel (!%p21_p4) target bundleno = 2 (0x2), region = 113 }

</bundles_post_ra>
